<compile_context>
chip_gen: v7x
topology: tpu7x:2x2x1
jax: 0.10.0
libtpu: 0.0.40
codegen_flags: <defaults>
</compile_context>

<pallas_src>
import functools

import jax
import jax.numpy as jnp
from jax.experimental import pallas as pl
from jax.experimental.pallas import tpu as pltpu

_BN_EPS = 1e-5


# ----------------------------------------------------------------------------
# Conv + folded-BN + ReLU kernel.
# x_ref: (H*Wo, k*Cin) bf16   rows in (h, wo) order, cols in (kw, cin) order
# w_ref: (k, k*Cin, Cout) bf16  (BN scale folded in)
# b_ref: (1, Cout) f32          (bias with BN shift folded in)
# o_ref: (Ho*Wo, Cout) f32
# ----------------------------------------------------------------------------
def _conv_kernel(x_ref, w_ref, b_ref, o_ref, *, ksize, n_rows, wo):
    acc = jnp.dot(x_ref[0:n_rows, :], w_ref[0],
                  preferred_element_type=jnp.float32)
    for di in range(1, ksize):
        # row window [di*Wo, di*Wo + Ho*Wo): sublane-aligned (Wo % 8 == 0 here).
        acc = acc + jnp.dot(x_ref[di * wo: di * wo + n_rows, :], w_ref[di],
                            preferred_element_type=jnp.float32)
    # torch order is conv -> bn -> maxpool -> relu; ReLU commutes with max-pool,
    # so applying it here and pooling outside is exact.
    o_ref[...] = jnp.maximum(acc + b_ref[...], 0.0)


def conv_bn_relu_nhwc(x_nhwc, wf, bias, k):
    """x_nhwc: (B, H, W, Cin) -> (B, Ho, Wo, Cout), BN(eval)+ReLU fused."""
    B, H, W, Cin = x_nhwc.shape
    Cout = wf.shape[-1]
    Ho, Wo = H - k + 1, W - k + 1
    x = x_nhwc.astype(jnp.bfloat16)
    # kw-direction patch stack only (k-fold, bf16); kh handled in-kernel.
    cols = [x[:, :, dj:dj + Wo, :] for dj in range(k)]      # k x (B, H, Wo, Cin)
    xcol = jnp.stack(cols, axis=3).reshape(B, H * Wo, k * Cin)
    kernel = functools.partial(_conv_kernel, ksize=k, n_rows=Ho * Wo, wo=Wo)
    out = pl.pallas_call(
        kernel,
        out_shape=jax.ShapeDtypeStruct((B, Ho * Wo, Cout), jnp.float32),
        grid=(B,),
        in_specs=[
            pl.BlockSpec((None, H * Wo, k * Cin), lambda b: (b, 0, 0)),
            pl.BlockSpec((k, k * Cin, Cout), lambda b: (0, 0, 0)),
            pl.BlockSpec((1, Cout), lambda b: (0, 0)),
        ],
        out_specs=pl.BlockSpec((None, Ho * Wo, Cout), lambda b: (b, 0, 0)),
        compiler_params=pltpu.CompilerParams(
            dimension_semantics=("parallel",),
            vmem_limit_bytes=32 * 1024 * 1024),
    )(xcol, wf, bias)
    return out.reshape(B, Ho, Wo, Cout)


def maxpool2x2_nhwc(x):
    B, H, W, C = x.shape
    return x.reshape(B, H // 2, 2, W // 2, 2, C).max(axis=(2, 4))


# ----------------------------------------------------------------------------
# Fully fused classifier + domain head (single pallas_call).
# ----------------------------------------------------------------------------
def _log_softmax_f32(y):
    m = jnp.max(y, axis=-1, keepdims=True)
    z = y - m
    return z - jnp.log(jnp.sum(jnp.exp(z), axis=-1, keepdims=True))


def _head_kernel(f_ref, w1_ref, b1_ref, w2c_ref, b2c_ref, w3c_ref, b3c_ref,
                 w2d_ref, b2d_ref, cls_ref, dom_ref):
    f = f_ref[...]                                                   # (TB,800) bf16
    h1 = jnp.dot(f, w1_ref[...], preferred_element_type=jnp.float32)
    h1 = jnp.maximum(h1 + b1_ref[...], 0.0)                          # (TB,256) f32
    hc = h1[:, 0:128].astype(jnp.bfloat16)       # class branch (cols 100:128 = 0)
    hd = h1[:, 128:256].astype(jnp.bfloat16)     # domain branch (cols 228:256 = 0)
    h2 = jnp.dot(hc, w2c_ref[...], preferred_element_type=jnp.float32)
    h2 = jnp.maximum(h2 + b2c_ref[...], 0.0).astype(jnp.bfloat16)    # (TB,100)
    lc = jnp.dot(h2, w3c_ref[...], preferred_element_type=jnp.float32) + b3c_ref[...]
    ld = jnp.dot(hd, w2d_ref[...], preferred_element_type=jnp.float32) + b2d_ref[...]
    cls_ref[...] = _log_softmax_f32(lc)
    dom_ref[...] = _log_softmax_f32(ld)


def fused_head(feat, hp):
    B = feat.shape[0]
    tb = B if B <= 256 else 256
    grid_m = pl.cdiv(B, tb)
    full = lambda i: (0, 0)
    return pl.pallas_call(
        _head_kernel,
        out_shape=(jax.ShapeDtypeStruct((B, 10), jnp.float32),
                   jax.ShapeDtypeStruct((B, 2), jnp.float32)),
        grid=(grid_m,),
        in_specs=[
            pl.BlockSpec((tb, 800), lambda i: (i, 0)),
            pl.BlockSpec((800, 256), full),
            pl.BlockSpec((1, 256), full),
            pl.BlockSpec((128, 100), full),
            pl.BlockSpec((1, 100), full),
            pl.BlockSpec((100, 10), full),
            pl.BlockSpec((1, 10), full),
            pl.BlockSpec((128, 2), full),
            pl.BlockSpec((1, 2), full),
        ],
        out_specs=(pl.BlockSpec((tb, 10), lambda i: (i, 0)),
                   pl.BlockSpec((tb, 2), lambda i: (i, 0))),
        compiler_params=pltpu.CompilerParams(
            dimension_semantics=("parallel",),
            vmem_limit_bytes=32 * 1024 * 1024),
    )(feat.astype(jnp.bfloat16), hp["w1"], hp["b1"], hp["w2c"], hp["b2c"],
      hp["w3c"], hp["b3c"], hp["w2d"], hp["b2d"])


# ----------------------------------------------------------------------------
# Parameter preparation (one-time): BN folding, NHWC weight-row permutation,
# class/domain fc1 concatenation, bf16 weight casts.
# ----------------------------------------------------------------------------
def _fold_conv(w, b, gamma, beta, k):
    """w: (Cout, Cin, k, k) torch-OIHW -> (k, k*Cin, Cout) bf16, bias (1,Cout) f32."""
    inv = 1.0 / jnp.sqrt(1.0 + _BN_EPS)
    scale = gamma * inv
    cout, cin = w.shape[0], w.shape[1]
    wf = (w * scale[:, None, None, None]).transpose(2, 3, 1, 0)   # (kh, kw, Cin, Cout)
    wf = wf.reshape(k, k * cin, cout)
    bias = (b * scale + beta).reshape(1, cout)
    return wf.astype(jnp.bfloat16), bias.astype(jnp.float32)


def _nhwc_rows(w):
    """fc1 weight (800, out) with rows in torch (c,h,w) order -> (h,w,c) order."""
    return w.reshape(50, 4, 4, -1).transpose(1, 2, 0, 3).reshape(800, -1)


def prepare_params(p):
    inv = 1.0 / jnp.sqrt(1.0 + _BN_EPS)
    hp = {}
    hp["conv1_w"], hp["conv1_b"] = _fold_conv(
        p["f_conv1_w"], p["f_conv1_b"], p["f_bn1_g"], p["f_bn1_b"], 5)
    hp["conv2_w"], hp["conv2_b"] = _fold_conv(
        p["f_conv2_w"], p["f_conv2_b"], p["f_bn2_g"], p["f_bn2_b"], 5)

    s_c1 = p["c_bn1_g"] * inv
    s_d1 = p["d_bn1_g"] * inv
    s_c2 = p["c_bn2_g"] * inv
    w1 = jnp.zeros((800, 256), jnp.float32)
    w1 = w1.at[:, 0:100].set(_nhwc_rows(p["c_fc1_w"]) * s_c1[None, :])
    w1 = w1.at[:, 128:228].set(_nhwc_rows(p["d_fc1_w"]) * s_d1[None, :])
    b1 = jnp.zeros((256,), jnp.float32)
    b1 = b1.at[0:100].set(p["c_fc1_b"] * s_c1 + p["c_bn1_b"])
    b1 = b1.at[128:228].set(p["d_fc1_b"] * s_d1 + p["d_bn1_b"])
    w2c = jnp.zeros((128, 100), jnp.float32).at[0:100, :].set(
        p["c_fc2_w"] * s_c2[None, :])
    b2c = p["c_fc2_b"] * s_c2 + p["c_bn2_b"]
    w2d = jnp.zeros((128, 2), jnp.float32).at[0:100, :].set(p["d_fc2_w"])

    hp["w1"] = w1.astype(jnp.bfloat16)
    hp["b1"] = b1.reshape(1, 256)
    hp["w2c"] = w2c.astype(jnp.bfloat16)
    hp["b2c"] = b2c.reshape(1, 100)
    hp["w3c"] = p["c_fc3_w"].astype(jnp.bfloat16)
    hp["b3c"] = p["c_fc3_b"].reshape(1, 10)
    hp["w2d"] = w2d.astype(jnp.bfloat16)
    hp["b2d"] = p["d_fc2_b"].reshape(1, 2)
    return hp


# ----------------------------------------------------------------------------
# Forward passes.
# ----------------------------------------------------------------------------
def dann_forward_pallas(hp, x, epsilon):
    """x: (B, 1, 28, 28) or (B, 3, 28, 28).  ReverseLayerF forward is identity;
    epsilon only affects the (unmodeled) backward pass."""
    del epsilon
    B = x.shape[0]
    x = jnp.broadcast_to(x, (B, 3, 28, 28)).astype(jnp.float32)
    x = x.transpose(0, 2, 3, 1)                                   # NHWC
    h = conv_bn_relu_nhwc(x, hp["conv1_w"], hp["conv1_b"], 5)     # (B,24,24,64)
    h = maxpool2x2_nhwc(h)                                        # (B,12,12,64)
    h = conv_bn_relu_nhwc(h, hp["conv2_w"], hp["conv2_b"], 5)     # (B, 8, 8,50)
    h = maxpool2x2_nhwc(h)                                        # (B, 4, 4,50)
    feat = h.reshape(B, 800)            # NHWC flatten; fc1 rows pre-permuted
    return fused_head(feat, hp)


def dann_forward_ref(p, x, epsilon):
    """Pure-JAX f32 NCHW reference mirroring the torch module (eval BN/Dropout)."""
    del epsilon
    B = x.shape[0]
    x = jnp.broadcast_to(x, (B, 3, 28, 28)).astype(jnp.float32)
    inv = 1.0 / jnp.sqrt(1.0 + _BN_EPS)

    def conv(z, w, b):
        y = jax.lax.conv_general_dilated(
            z, w, (1, 1), "VALID", dimension_numbers=("NCHW", "OIHW", "NCHW"))
        return y + b[None, :, None, None]

    def bn2d(z, g, bta):
        return z * (g * inv)[None, :, None, None] + bta[None, :, None, None]

    def pool(z):
        b_, c, hh, ww = z.shape
        return z.reshape(b_, c, hh // 2, 2, ww // 2, 2).max(axis=(3, 5))

    def bn1d(z, g, bta):
        return z * (g * inv)[None, :] + bta[None, :]

    h = conv(x, p["f_conv1_w"], p["f_conv1_b"])
    h = jnp.maximum(pool(bn2d(h, p["f_bn1_g"], p["f_bn1_b"])), 0.0)
    h = conv(h, p["f_conv2_w"], p["f_conv2_b"])
    h = bn2d(h, p["f_bn2_g"], p["f_bn2_b"])          # Dropout2d = identity (eval)
    h = jnp.maximum(pool(h), 0.0)
    feat = h.reshape(B, 800)                         # torch (C,H,W) flatten order

    c = jnp.maximum(bn1d(feat @ p["c_fc1_w"] + p["c_fc1_b"],
                         p["c_bn1_g"], p["c_bn1_b"]), 0.0)
    c = jnp.maximum(bn1d(c @ p["c_fc2_w"] + p["c_fc2_b"],
                         p["c_bn2_g"], p["c_bn2_b"]), 0.0)
    class_out = jax.nn.log_softmax(c @ p["c_fc3_w"] + p["c_fc3_b"], axis=-1)
    d = jnp.maximum(bn1d(feat @ p["d_fc1_w"] + p["d_fc1_b"],
                         p["d_bn1_g"], p["d_bn1_b"]), 0.0)
    domain_out = jax.nn.log_softmax(d @ p["d_fc2_w"] + p["d_fc2_b"], axis=-1)
    return class_out, domain_out


def init_params(key):
    keys = jax.random.split(key, 24)
    n = lambda k, shape, s=0.05: jax.random.normal(k, shape, jnp.float32) * s
    p = {}
    p["f_conv1_w"] = n(keys[0], (64, 3, 5, 5))
    p["f_conv1_b"] = n(keys[1], (64,))
    p["f_bn1_g"] = 1.0 + n(keys[2], (64,))
    p["f_bn1_b"] = n(keys[3], (64,))
    p["f_conv2_w"] = n(keys[4], (50, 64, 5, 5))
    p["f_conv2_b"] = n(keys[5], (50,))
    p["f_bn2_g"] = 1.0 + n(keys[6], (50,))
    p["f_bn2_b"] = n(keys[7], (50,))
    p["c_fc1_w"] = n(keys[8], (800, 100))
    p["c_fc1_b"] = n(keys[9], (100,))
    p["c_bn1_g"] = 1.0 + n(keys[10], (100,))
    p["c_bn1_b"] = n(keys[11], (100,))
    p["c_fc2_w"] = n(keys[12], (100, 100))
    p["c_fc2_b"] = n(keys[13], (100,))
    p["c_bn2_g"] = 1.0 + n(keys[14], (100,))
    p["c_bn2_b"] = n(keys[15], (100,))
    p["c_fc3_w"] = n(keys[16], (100, 10))
    p["c_fc3_b"] = n(keys[17], (10,))
    p["d_fc1_w"] = n(keys[18], (800, 100))
    p["d_fc1_b"] = n(keys[19], (100,))
    p["d_bn1_g"] = 1.0 + n(keys[20], (100,))
    p["d_bn1_b"] = n(keys[21], (100,))
    p["d_fc2_w"] = n(keys[22], (100, 2))
    p["d_fc2_b"] = n(keys[23], (2,))
    return p


if __name__ == "__main__":
    key = jax.random.PRNGKey(0)
    pkey, xkey = jax.random.split(key)
    params = init_params(pkey)
    x = jax.random.normal(xkey, (2, 1, 28, 28), jnp.float32)
    epsilon = 0.1

    hp = prepare_params(params)          # one-time BN fold / layout permutation
    class_out, domain_out = jax.jit(dann_forward_pallas)(hp, x, epsilon)
    jax.block_until_ready((class_out, domain_out))

    class_ref, domain_ref = dann_forward_ref(params, x, epsilon)

    assert class_out.shape == (2, 10) and domain_out.shape == (2, 2)
    # bf16-MXU kernel vs f32 reference: loose-but-meaningful tolerance.
    assert jnp.allclose(class_out, class_ref, atol=5e-2, rtol=5e-2)
    assert jnp.allclose(domain_out, domain_ref, atol=5e-2, rtol=5e-2)

    print("KERNEL_OK")
</pallas_src>

<mosaic_0001>
module attributes {stable_mosaic.version = 11 : i64} {
  func.func @_conv_kernel(%arg0: i32, %arg1: memref<1x672x15xbf16, #tpu.memory_space<vmem>>, %arg2: memref<5x15x64xbf16, #tpu.memory_space<vmem>>, %arg3: memref<1x64xf32, #tpu.memory_space<vmem>>, %arg4: memref<1x576x64xf32, #tpu.memory_space<vmem>>) attributes {dimension_semantics = [#tpu.dimension_semantics<parallel>], iteration_bounds = array<i64: 2>, scalar_prefetch = 0 : i64, scratch_operands = 0 : i64, tpu.core_type = #tpu.core_type<tc>, window_params = [{transform_indices = @transform_0, window_bounds = array<i64: 1, 672, 15>}, {pipeline_mode = #tpu.pipeline_mode<synchronous>, transform_indices = @transform_1, window_bounds = array<i64: 5, 15, 64>}, {pipeline_mode = #tpu.pipeline_mode<synchronous>, transform_indices = @transform_2, window_bounds = array<i64: 1, 64>}, {transform_indices = @transform_3, window_bounds = array<i64: 1, 576, 64>}]} {
    %c0 = arith.constant 0 : index
    %c0_0 = arith.constant 0 : index
    %c0_1 = arith.constant 0 : index
    %0 = vector.load %arg1[%c0, %c0_0, %c0_1] : memref<1x672x15xbf16, #tpu.memory_space<vmem>>, vector<1x576x15xbf16>
    %1 = vector.shape_cast %0 : vector<1x576x15xbf16> to vector<576x15xbf16>
    %c0_2 = arith.constant 0 : index
    %c0_3 = arith.constant 0 : index
    %c0_4 = arith.constant 0 : index
    %2 = vector.load %arg2[%c0_2, %c0_3, %c0_4] : memref<5x15x64xbf16, #tpu.memory_space<vmem>>, vector<1x15x64xbf16>
    %3 = vector.shape_cast %2 : vector<1x15x64xbf16> to vector<15x64xbf16>
    %cst = arith.constant dense<0.000000e+00> : vector<576x64xf32>
    %4 = tpu.matmul %1, %3, %cst {dimension_numbers = #tpu.dot_dimension_numbers<[1], [0], [0], [1], [0, 0, 1, 1], [], []>} : vector<576x15xbf16>, vector<15x64xbf16>, vector<576x64xf32> -> vector<576x64xf32>
    %c0_5 = arith.constant 0 : index
    %c24 = arith.constant 24 : index
    %c0_6 = arith.constant 0 : index
    %5 = vector.load %arg1[%c0_5, %c24, %c0_6] : memref<1x672x15xbf16, #tpu.memory_space<vmem>>, vector<1x576x15xbf16>
    %6 = vector.shape_cast %5 : vector<1x576x15xbf16> to vector<576x15xbf16>
    %c1 = arith.constant 1 : index
    %c0_7 = arith.constant 0 : index
    %c0_8 = arith.constant 0 : index
    %7 = vector.load %arg2[%c1, %c0_7, %c0_8] : memref<5x15x64xbf16, #tpu.memory_space<vmem>>, vector<1x15x64xbf16>
    %8 = vector.shape_cast %7 : vector<1x15x64xbf16> to vector<15x64xbf16>
    %cst_9 = arith.constant dense<0.000000e+00> : vector<576x64xf32>
    %9 = tpu.matmul %6, %8, %cst_9 {dimension_numbers = #tpu.dot_dimension_numbers<[1], [0], [0], [1], [0, 0, 1, 1], [], []>} : vector<576x15xbf16>, vector<15x64xbf16>, vector<576x64xf32> -> vector<576x64xf32>
    %10 = arith.addf %4, %9 : vector<576x64xf32>
    %c0_10 = arith.constant 0 : index
    %c48 = arith.constant 48 : index
    %c0_11 = arith.constant 0 : index
    %11 = vector.load %arg1[%c0_10, %c48, %c0_11] : memref<1x672x15xbf16, #tpu.memory_space<vmem>>, vector<1x576x15xbf16>
    %12 = vector.shape_cast %11 : vector<1x576x15xbf16> to vector<576x15xbf16>
    %c2 = arith.constant 2 : index
    %c0_12 = arith.constant 0 : index
    %c0_13 = arith.constant 0 : index
    %13 = vector.load %arg2[%c2, %c0_12, %c0_13] : memref<5x15x64xbf16, #tpu.memory_space<vmem>>, vector<1x15x64xbf16>
    %14 = vector.shape_cast %13 : vector<1x15x64xbf16> to vector<15x64xbf16>
    %cst_14 = arith.constant dense<0.000000e+00> : vector<576x64xf32>
    %15 = tpu.matmul %12, %14, %cst_14 {dimension_numbers = #tpu.dot_dimension_numbers<[1], [0], [0], [1], [0, 0, 1, 1], [], []>} : vector<576x15xbf16>, vector<15x64xbf16>, vector<576x64xf32> -> vector<576x64xf32>
    %16 = arith.addf %10, %15 : vector<576x64xf32>
    %c0_15 = arith.constant 0 : index
    %c72 = arith.constant 72 : index
    %c0_16 = arith.constant 0 : index
    %17 = vector.load %arg1[%c0_15, %c72, %c0_16] : memref<1x672x15xbf16, #tpu.memory_space<vmem>>, vector<1x576x15xbf16>
    %18 = vector.shape_cast %17 : vector<1x576x15xbf16> to vector<576x15xbf16>
    %c3 = arith.constant 3 : index
    %c0_17 = arith.constant 0 : index
    %c0_18 = arith.constant 0 : index
    %19 = vector.load %arg2[%c3, %c0_17, %c0_18] : memref<5x15x64xbf16, #tpu.memory_space<vmem>>, vector<1x15x64xbf16>
    %20 = vector.shape_cast %19 : vector<1x15x64xbf16> to vector<15x64xbf16>
    %cst_19 = arith.constant dense<0.000000e+00> : vector<576x64xf32>
    %21 = tpu.matmul %18, %20, %cst_19 {dimension_numbers = #tpu.dot_dimension_numbers<[1], [0], [0], [1], [0, 0, 1, 1], [], []>} : vector<576x15xbf16>, vector<15x64xbf16>, vector<576x64xf32> -> vector<576x64xf32>
    %22 = arith.addf %16, %21 : vector<576x64xf32>
    %c0_20 = arith.constant 0 : index
    %c96 = arith.constant 96 : index
    %c0_21 = arith.constant 0 : index
    %23 = vector.load %arg1[%c0_20, %c96, %c0_21] : memref<1x672x15xbf16, #tpu.memory_space<vmem>>, vector<1x576x15xbf16>
    %24 = vector.shape_cast %23 : vector<1x576x15xbf16> to vector<576x15xbf16>
    %c4 = arith.constant 4 : index
    %c0_22 = arith.constant 0 : index
    %c0_23 = arith.constant 0 : index
    %25 = vector.load %arg2[%c4, %c0_22, %c0_23] : memref<5x15x64xbf16, #tpu.memory_space<vmem>>, vector<1x15x64xbf16>
    %26 = vector.shape_cast %25 : vector<1x15x64xbf16> to vector<15x64xbf16>
    %cst_24 = arith.constant dense<0.000000e+00> : vector<576x64xf32>
    %27 = tpu.matmul %24, %26, %cst_24 {dimension_numbers = #tpu.dot_dimension_numbers<[1], [0], [0], [1], [0, 0, 1, 1], [], []>} : vector<576x15xbf16>, vector<15x64xbf16>, vector<576x64xf32> -> vector<576x64xf32>
    %28 = arith.addf %22, %27 : vector<576x64xf32>
    %c0_25 = arith.constant 0 : index
    %c0_26 = arith.constant 0 : index
    %29 = vector.load %arg3[%c0_25, %c0_26] : memref<1x64xf32, #tpu.memory_space<vmem>>, vector<1x64xf32>
    %30 = vector.broadcast %29 : vector<1x64xf32> to vector<576x64xf32>
    %31 = arith.addf %28, %30 : vector<576x64xf32>
    %cst_27 = arith.constant 0.000000e+00 : f32
    %32 = vector.broadcast %cst_27 : f32 to vector<576x64xf32>
    %33 = arith.maximumf %31, %32 : vector<576x64xf32>
    %c0_28 = arith.constant 0 : index
    %c0_29 = arith.constant 0 : index
    %c0_30 = arith.constant 0 : index
    %34 = vector.load %arg4[%c0_28, %c0_29, %c0_30] : memref<1x576x64xf32, #tpu.memory_space<vmem>>, vector<1x576x64xf32>
    %35 = vector.shape_cast %34 : vector<1x576x64xf32> to vector<576x64xf32>
    %36 = vector.shape_cast %33 : vector<576x64xf32> to vector<1x576x64xf32>
    tpu.vector_store %arg4[%c0_28, %c0_29, %c0_30], %36 {strides = array<i32>} : memref<1x576x64xf32, #tpu.memory_space<vmem>>, vector<1x576x64xf32>,
    return
  }
  func.func @transform_0(%arg0: i32) -> (i32, i32, i32) {
    %c0_i32 = arith.constant 0 : i32
    %c0_i32_0 = arith.constant 0 : i32
    %c0_i32_1 = arith.constant 0 : i32
    return %arg0, %c0_i32, %c0_i32_0 : i32, i32, i32
  }
  func.func @transform_1(%arg0: i32) -> (i32, i32, i32) {
    %c0_i32 = arith.constant 0 : i32
    %c0_i32_0 = arith.constant 0 : i32
    %c0_i32_1 = arith.constant 0 : i32
    %c0_i32_2 = arith.constant 0 : i32
    return %c0_i32, %c0_i32_0, %c0_i32_1 : i32, i32, i32
  }
  func.func @transform_2(%arg0: i32) -> (i32, i32) {
    %c0_i32 = arith.constant 0 : i32
    %c0_i32_0 = arith.constant 0 : i32
    %c0_i32_1 = arith.constant 0 : i32
    return %c0_i32, %c0_i32_0 : i32, i32
  }
  func.func @transform_3(%arg0: i32) -> (i32, i32, i32) {
    %c0_i32 = arith.constant 0 : i32
    %c0_i32_0 = arith.constant 0 : i32
    %c0_i32_1 = arith.constant 0 : i32
    return %arg0, %c0_i32, %c0_i32_0 : i32, i32, i32
  }
}

module attributes {stable_mosaic.version = 11 : i64} {
  func.func @_conv_kernel(%arg0: i32, %arg1: memref<1x96x320xbf16, #tpu.memory_space<vmem>>, %arg2: memref<5x320x50xbf16, #tpu.memory_space<vmem>>, %arg3: memref<1x50xf32, #tpu.memory_space<vmem>>, %arg4: memref<1x64x50xf32, #tpu.memory_space<vmem>>) attributes {dimension_semantics = [#tpu.dimension_semantics<parallel>], iteration_bounds = array<i64: 2>, scalar_prefetch = 0 : i64, scratch_operands = 0 : i64, tpu.core_type = #tpu.core_type<tc>, window_params = [{transform_indices = @transform_0, window_bounds = array<i64: 1, 96, 320>}, {pipeline_mode = #tpu.pipeline_mode<synchronous>, transform_indices = @transform_1, window_bounds = array<i64: 5, 320, 50>}, {pipeline_mode = #tpu.pipeline_mode<synchronous>, transform_indices = @transform_2, window_bounds = array<i64: 1, 50>}, {transform_indices = @transform_3, window_bounds = array<i64: 1, 64, 50>}]} {
    %c0 = arith.constant 0 : index
    %c0_0 = arith.constant 0 : index
    %c0_1 = arith.constant 0 : index
    %0 = vector.load %arg1[%c0, %c0_0, %c0_1] : memref<1x96x320xbf16, #tpu.memory_space<vmem>>, vector<1x64x320xbf16>
    %1 = vector.shape_cast %0 : vector<1x64x320xbf16> to vector<64x320xbf16>
    %c0_2 = arith.constant 0 : index
    %c0_3 = arith.constant 0 : index
    %c0_4 = arith.constant 0 : index
    %2 = vector.load %arg2[%c0_2, %c0_3, %c0_4] : memref<5x320x50xbf16, #tpu.memory_space<vmem>>, vector<1x320x50xbf16>
    %3 = vector.shape_cast %2 : vector<1x320x50xbf16> to vector<320x50xbf16>
    %cst = arith.constant dense<0.000000e+00> : vector<64x50xf32>
    %4 = tpu.matmul %1, %3, %cst {dimension_numbers = #tpu.dot_dimension_numbers<[1], [0], [0], [1], [0, 0, 1, 1], [], []>} : vector<64x320xbf16>, vector<320x50xbf16>, vector<64x50xf32> -> vector<64x50xf32>
    %c0_5 = arith.constant 0 : index
    %c8 = arith.constant 8 : index
    %c0_6 = arith.constant 0 : index
    %5 = vector.load %arg1[%c0_5, %c8, %c0_6] : memref<1x96x320xbf16, #tpu.memory_space<vmem>>, vector<1x64x320xbf16>
    %6 = vector.shape_cast %5 : vector<1x64x320xbf16> to vector<64x320xbf16>
    %c1 = arith.constant 1 : index
    %c0_7 = arith.constant 0 : index
    %c0_8 = arith.constant 0 : index
    %7 = vector.load %arg2[%c1, %c0_7, %c0_8] : memref<5x320x50xbf16, #tpu.memory_space<vmem>>, vector<1x320x50xbf16>
    %8 = vector.shape_cast %7 : vector<1x320x50xbf16> to vector<320x50xbf16>
    %cst_9 = arith.constant dense<0.000000e+00> : vector<64x50xf32>
    %9 = tpu.matmul %6, %8, %cst_9 {dimension_numbers = #tpu.dot_dimension_numbers<[1], [0], [0], [1], [0, 0, 1, 1], [], []>} : vector<64x320xbf16>, vector<320x50xbf16>, vector<64x50xf32> -> vector<64x50xf32>
    %10 = arith.addf %4, %9 : vector<64x50xf32>
    %c0_10 = arith.constant 0 : index
    %c16 = arith.constant 16 : index
    %c0_11 = arith.constant 0 : index
    %11 = vector.load %arg1[%c0_10, %c16, %c0_11] : memref<1x96x320xbf16, #tpu.memory_space<vmem>>, vector<1x64x320xbf16>
    %12 = vector.shape_cast %11 : vector<1x64x320xbf16> to vector<64x320xbf16>
    %c2 = arith.constant 2 : index
    %c0_12 = arith.constant 0 : index
    %c0_13 = arith.constant 0 : index
    %13 = vector.load %arg2[%c2, %c0_12, %c0_13] : memref<5x320x50xbf16, #tpu.memory_space<vmem>>, vector<1x320x50xbf16>
    %14 = vector.shape_cast %13 : vector<1x320x50xbf16> to vector<320x50xbf16>
    %cst_14 = arith.constant dense<0.000000e+00> : vector<64x50xf32>
    %15 = tpu.matmul %12, %14, %cst_14 {dimension_numbers = #tpu.dot_dimension_numbers<[1], [0], [0], [1], [0, 0, 1, 1], [], []>} : vector<64x320xbf16>, vector<320x50xbf16>, vector<64x50xf32> -> vector<64x50xf32>
    %16 = arith.addf %10, %15 : vector<64x50xf32>
    %c0_15 = arith.constant 0 : index
    %c24 = arith.constant 24 : index
    %c0_16 = arith.constant 0 : index
    %17 = vector.load %arg1[%c0_15, %c24, %c0_16] : memref<1x96x320xbf16, #tpu.memory_space<vmem>>, vector<1x64x320xbf16>
    %18 = vector.shape_cast %17 : vector<1x64x320xbf16> to vector<64x320xbf16>
    %c3 = arith.constant 3 : index
    %c0_17 = arith.constant 0 : index
    %c0_18 = arith.constant 0 : index
    %19 = vector.load %arg2[%c3, %c0_17, %c0_18] : memref<5x320x50xbf16, #tpu.memory_space<vmem>>, vector<1x320x50xbf16>
    %20 = vector.shape_cast %19 : vector<1x320x50xbf16> to vector<320x50xbf16>
    %cst_19 = arith.constant dense<0.000000e+00> : vector<64x50xf32>
    %21 = tpu.matmul %18, %20, %cst_19 {dimension_numbers = #tpu.dot_dimension_numbers<[1], [0], [0], [1], [0, 0, 1, 1], [], []>} : vector<64x320xbf16>, vector<320x50xbf16>, vector<64x50xf32> -> vector<64x50xf32>
    %22 = arith.addf %16, %21 : vector<64x50xf32>
    %c0_20 = arith.constant 0 : index
    %c32 = arith.constant 32 : index
    %c0_21 = arith.constant 0 : index
    %23 = vector.load %arg1[%c0_20, %c32, %c0_21] : memref<1x96x320xbf16, #tpu.memory_space<vmem>>, vector<1x64x320xbf16>
    %24 = vector.shape_cast %23 : vector<1x64x320xbf16> to vector<64x320xbf16>
    %c4 = arith.constant 4 : index
    %c0_22 = arith.constant 0 : index
    %c0_23 = arith.constant 0 : index
    %25 = vector.load %arg2[%c4, %c0_22, %c0_23] : memref<5x320x50xbf16, #tpu.memory_space<vmem>>, vector<1x320x50xbf16>
    %26 = vector.shape_cast %25 : vector<1x320x50xbf16> to vector<320x50xbf16>
    %cst_24 = arith.constant dense<0.000000e+00> : vector<64x50xf32>
    %27 = tpu.matmul %24, %26, %cst_24 {dimension_numbers = #tpu.dot_dimension_numbers<[1], [0], [0], [1], [0, 0, 1, 1], [], []>} : vector<64x320xbf16>, vector<320x50xbf16>, vector<64x50xf32> -> vector<64x50xf32>
    %28 = arith.addf %22, %27 : vector<64x50xf32>
    %c0_25 = arith.constant 0 : index
    %c0_26 = arith.constant 0 : index
    %29 = vector.load %arg3[%c0_25, %c0_26] : memref<1x50xf32, #tpu.memory_space<vmem>>, vector<1x50xf32>
    %30 = vector.broadcast %29 : vector<1x50xf32> to vector<64x50xf32>
    %31 = arith.addf %28, %30 : vector<64x50xf32>
    %cst_27 = arith.constant 0.000000e+00 : f32
    %32 = vector.broadcast %cst_27 : f32 to vector<64x50xf32>
    %33 = arith.maximumf %31, %32 : vector<64x50xf32>
    %c0_28 = arith.constant 0 : index
    %c0_29 = arith.constant 0 : index
    %c0_30 = arith.constant 0 : index
    %34 = vector.load %arg4[%c0_28, %c0_29, %c0_30] : memref<1x64x50xf32, #tpu.memory_space<vmem>>, vector<1x64x50xf32>
    %35 = vector.shape_cast %34 : vector<1x64x50xf32> to vector<64x50xf32>
    %36 = vector.shape_cast %33 : vector<64x50xf32> to vector<1x64x50xf32>
    tpu.vector_store %arg4[%c0_28, %c0_29, %c0_30], %36 {strides = array<i32>} : memref<1x64x50xf32, #tpu.memory_space<vmem>>, vector<1x64x50xf32>,
    return
  }
  func.func @transform_0(%arg0: i32) -> (i32, i32, i32) {
    %c0_i32 = arith.constant 0 : i32
    %c0_i32_0 = arith.constant 0 : i32
    %c0_i32_1 = arith.constant 0 : i32
    return %arg0, %c0_i32, %c0_i32_0 : i32, i32, i32
  }
  func.func @transform_1(%arg0: i32) -> (i32, i32, i32) {
    %c0_i32 = arith.constant 0 : i32
    %c0_i32_0 = arith.constant 0 : i32
    %c0_i32_1 = arith.constant 0 : i32
    %c0_i32_2 = arith.constant 0 : i32
    return %c0_i32, %c0_i32_0, %c0_i32_1 : i32, i32, i32
  }
  func.func @transform_2(%arg0: i32) -> (i32, i32) {
    %c0_i32 = arith.constant 0 : i32
    %c0_i32_0 = arith.constant 0 : i32
    %c0_i32_1 = arith.constant 0 : i32
    return %c0_i32, %c0_i32_0 : i32, i32
  }
  func.func @transform_3(%arg0: i32) -> (i32, i32, i32) {
    %c0_i32 = arith.constant 0 : i32
    %c0_i32_0 = arith.constant 0 : i32
    %c0_i32_1 = arith.constant 0 : i32
    return %arg0, %c0_i32, %c0_i32_0 : i32, i32, i32
  }
}

module attributes {stable_mosaic.version = 11 : i64} {
  func.func @_head_kernel(%arg0: i32, %arg1: memref<2x800xbf16, #tpu.memory_space<vmem>>, %arg2: memref<800x256xbf16, #tpu.memory_space<vmem>>, %arg3: memref<1x256xf32, #tpu.memory_space<vmem>>, %arg4: memref<128x100xbf16, #tpu.memory_space<vmem>>, %arg5: memref<1x100xf32, #tpu.memory_space<vmem>>, %arg6: memref<100x10xbf16, #tpu.memory_space<vmem>>, %arg7: memref<1x10xf32, #tpu.memory_space<vmem>>, %arg8: memref<128x2xbf16, #tpu.memory_space<vmem>>, %arg9: memref<1x2xf32, #tpu.memory_space<vmem>>, %arg10: memref<2x10xf32, #tpu.memory_space<vmem>>, %arg11: memref<2x2xf32, #tpu.memory_space<vmem>>) attributes {dimension_semantics = [#tpu.dimension_semantics<parallel>], iteration_bounds = array<i64: 1>, scalar_prefetch = 0 : i64, scratch_operands = 0 : i64, tpu.core_type = #tpu.core_type<tc>, window_params = [{transform_indices = @transform_0, window_bounds = array<i64: 2, 800>}, {pipeline_mode = #tpu.pipeline_mode<synchronous>, transform_indices = @transform_1, window_bounds = array<i64: 800, 256>}, {pipeline_mode = #tpu.pipeline_mode<synchronous>, transform_indices = @transform_2, window_bounds = array<i64: 1, 256>}, {pipeline_mode = #tpu.pipeline_mode<synchronous>, transform_indices = @transform_3, window_bounds = array<i64: 128, 100>}, {pipeline_mode = #tpu.pipeline_mode<synchronous>, transform_indices = @transform_4, window_bounds = array<i64: 1, 100>}, {pipeline_mode = #tpu.pipeline_mode<synchronous>, transform_indices = @transform_5, window_bounds = array<i64: 100, 10>}, {pipeline_mode = #tpu.pipeline_mode<synchronous>, transform_indices = @transform_6, window_bounds = array<i64: 1, 10>}, {pipeline_mode = #tpu.pipeline_mode<synchronous>, transform_indices = @transform_7, window_bounds = array<i64: 128, 2>}, {pipeline_mode = #tpu.pipeline_mode<synchronous>, transform_indices = @transform_8, window_bounds = array<i64: 1, 2>}, {transform_indices = @transform_9, window_bounds = array<i64: 2, 10>}, {transform_indices = @transform_10, window_bounds = array<i64: 2, 2>}]} {
    %c0 = arith.constant 0 : index
    %c0_0 = arith.constant 0 : index
    %0 = vector.load %arg1[%c0, %c0_0] : memref<2x800xbf16, #tpu.memory_space<vmem>>, vector<2x800xbf16>
    %c0_1 = arith.constant 0 : index
    %c0_2 = arith.constant 0 : index
    %1 = vector.load %arg2[%c0_1, %c0_2] : memref<800x256xbf16, #tpu.memory_space<vmem>>, vector<800x256xbf16>
    %cst = arith.constant dense<0.000000e+00> : vector<2x256xf32>
    %2 = tpu.matmul %0, %1, %cst {dimension_numbers = #tpu.dot_dimension_numbers<[1], [0], [0], [1], [0, 0, 1, 1], [], []>} : vector<2x800xbf16>, vector<800x256xbf16>, vector<2x256xf32> -> vector<2x256xf32>
    %c0_3 = arith.constant 0 : index
    %c0_4 = arith.constant 0 : index
    %3 = vector.load %arg3[%c0_3, %c0_4] : memref<1x256xf32, #tpu.memory_space<vmem>>, vector<1x256xf32>
    %4 = vector.broadcast %3 : vector<1x256xf32> to vector<2x256xf32>
    %5 = arith.addf %2, %4 : vector<2x256xf32>
    %cst_5 = arith.constant 0.000000e+00 : f32
    %6 = vector.broadcast %cst_5 : f32 to vector<2x256xf32>
    %7 = arith.maximumf %5, %6 : vector<2x256xf32>
    %8 = vector.extract_strided_slice %7 {offsets = [0, 0], sizes = [2, 128], strides = [1, 1]} : vector<2x256xf32> to vector<2x128xf32>
    %9 = arith.truncf %8 : vector<2x128xf32> to vector<2x128xbf16>
    %10 = vector.extract_strided_slice %7 {offsets = [0, 128], sizes = [2, 128], strides = [1, 1]} : vector<2x256xf32> to vector<2x128xf32>
    %11 = arith.truncf %10 : vector<2x128xf32> to vector<2x128xbf16>
    %c0_6 = arith.constant 0 : index
    %c0_7 = arith.constant 0 : index
    %12 = vector.load %arg4[%c0_6, %c0_7] : memref<128x100xbf16, #tpu.memory_space<vmem>>, vector<128x100xbf16>
    %cst_8 = arith.constant dense<0.000000e+00> : vector<2x100xf32>
    %13 = tpu.matmul %9, %12, %cst_8 {dimension_numbers = #tpu.dot_dimension_numbers<[1], [0], [0], [1], [0, 0, 1, 1], [], []>} : vector<2x128xbf16>, vector<128x100xbf16>, vector<2x100xf32> -> vector<2x100xf32>
    %c0_9 = arith.constant 0 : index
    %c0_10 = arith.constant 0 : index
    %14 = vector.load %arg5[%c0_9, %c0_10] : memref<1x100xf32, #tpu.memory_space<vmem>>, vector<1x100xf32>
    %15 = vector.broadcast %14 : vector<1x100xf32> to vector<2x100xf32>
    %16 = arith.addf %13, %15 : vector<2x100xf32>
    %cst_11 = arith.constant 0.000000e+00 : f32
    %17 = vector.broadcast %cst_11 : f32 to vector<2x100xf32>
    %18 = arith.maximumf %16, %17 : vector<2x100xf32>
    %19 = arith.truncf %18 : vector<2x100xf32> to vector<2x100xbf16>
    %c0_12 = arith.constant 0 : index
    %c0_13 = arith.constant 0 : index
    %20 = vector.load %arg6[%c0_12, %c0_13] : memref<100x10xbf16, #tpu.memory_space<vmem>>, vector<100x10xbf16>
    %cst_14 = arith.constant dense<0.000000e+00> : vector<2x10xf32>
    %21 = tpu.matmul %19, %20, %cst_14 {dimension_numbers = #tpu.dot_dimension_numbers<[1], [0], [0], [1], [0, 0, 1, 1], [], []>} : vector<2x100xbf16>, vector<100x10xbf16>, vector<2x10xf32> -> vector<2x10xf32>
    %c0_15 = arith.constant 0 : index
    %c0_16 = arith.constant 0 : index
    %22 = vector.load %arg7[%c0_15, %c0_16] : memref<1x10xf32, #tpu.memory_space<vmem>>, vector<1x10xf32>
    %23 = vector.broadcast %22 : vector<1x10xf32> to vector<2x10xf32>
    %24 = arith.addf %21, %23 : vector<2x10xf32>
    %c0_17 = arith.constant 0 : index
    %c0_18 = arith.constant 0 : index
    %25 = vector.load %arg8[%c0_17, %c0_18] : memref<128x2xbf16, #tpu.memory_space<vmem>>, vector<128x2xbf16>
    %cst_19 = arith.constant dense<0.000000e+00> : vector<2x2xf32>
    %26 = tpu.matmul %11, %25, %cst_19 {dimension_numbers = #tpu.dot_dimension_numbers<[1], [0], [0], [1], [0, 0, 1, 1], [], []>} : vector<2x128xbf16>, vector<128x2xbf16>, vector<2x2xf32> -> vector<2x2xf32>
    %c0_20 = arith.constant 0 : index
    %c0_21 = arith.constant 0 : index
    %27 = vector.load %arg9[%c0_20, %c0_21] : memref<1x2xf32, #tpu.memory_space<vmem>>, vector<1x2xf32>
    %28 = vector.broadcast %27 : vector<1x2xf32> to vector<2x2xf32>
    %29 = arith.addf %26, %28 : vector<2x2xf32>
    %cst_22 = arith.constant dense<0xFF800000> : vector<2xf32>
    %30 = vector.multi_reduction <maximumf>, %24, %cst_22 [1] : vector<2x10xf32> to vector<2xf32>
    %31 = vector.shape_cast %30 : vector<2xf32> to vector<2x1xf32>
    %32 = vector.broadcast %31 : vector<2x1xf32> to vector<2x10xf32>
    %33 = arith.subf %24, %32 : vector<2x10xf32>
    %34 = math.exp %33 : vector<2x10xf32>
    %cst_23 = arith.constant dense<0.000000e+00> : vector<2xf32>
    %35 = vector.multi_reduction <add>, %34, %cst_23 [1] : vector<2x10xf32> to vector<2xf32>
    %36 = vector.shape_cast %35 : vector<2xf32> to vector<2x1xf32>
    %37 = math.log %36 : vector<2x1xf32>
    %38 = vector.broadcast %37 : vector<2x1xf32> to vector<2x10xf32>
    %39 = arith.subf %33, %38 : vector<2x10xf32>
    %c0_24 = arith.constant 0 : index
    %c0_25 = arith.constant 0 : index
    %40 = vector.load %arg10[%c0_24, %c0_25] : memref<2x10xf32, #tpu.memory_space<vmem>>, vector<2x10xf32>
    tpu.vector_store %arg10[%c0_24, %c0_25], %39 {strides = array<i32>} : memref<2x10xf32, #tpu.memory_space<vmem>>, vector<2x10xf32>,
    %cst_26 = arith.constant dense<0xFF800000> : vector<2xf32>
    %41 = vector.multi_reduction <maximumf>, %29, %cst_26 [1] : vector<2x2xf32> to vector<2xf32>
    %42 = vector.shape_cast %41 : vector<2xf32> to vector<2x1xf32>
    %43 = vector.broadcast %42 : vector<2x1xf32> to vector<2x2xf32>
    %44 = arith.subf %29, %43 : vector<2x2xf32>
    %45 = math.exp %44 : vector<2x2xf32>
    %cst_27 = arith.constant dense<0.000000e+00> : vector<2xf32>
    %46 = vector.multi_reduction <add>, %45, %cst_27 [1] : vector<2x2xf32> to vector<2xf32>
    %47 = vector.shape_cast %46 : vector<2xf32> to vector<2x1xf32>
    %48 = math.log %47 : vector<2x1xf32>
    %49 = vector.broadcast %48 : vector<2x1xf32> to vector<2x2xf32>
    %50 = arith.subf %44, %49 : vector<2x2xf32>
    %c0_28 = arith.constant 0 : index
    %c0_29 = arith.constant 0 : index
    %51 = vector.load %arg11[%c0_28, %c0_29] : memref<2x2xf32, #tpu.memory_space<vmem>>, vector<2x2xf32>
    tpu.vector_store %arg11[%c0_28, %c0_29], %50 {strides = array<i32>} : memref<2x2xf32, #tpu.memory_space<vmem>>, vector<2x2xf32>,
    return
  }
  func.func @transform_0(%arg0: i32) -> (i32, i32) {
    %c0_i32 = arith.constant 0 : i32
    %c0_i32_0 = arith.constant 0 : i32
    return %arg0, %c0_i32 : i32, i32
  }
  func.func @transform_1(%arg0: i32) -> (i32, i32) {
    %c0_i32 = arith.constant 0 : i32
    %c0_i32_0 = arith.constant 0 : i32
    %c0_i32_1 = arith.constant 0 : i32
    return %c0_i32, %c0_i32_0 : i32, i32
  }
  func.func @transform_2(%arg0: i32) -> (i32, i32) {
    %c0_i32 = arith.constant 0 : i32
    %c0_i32_0 = arith.constant 0 : i32
    %c0_i32_1 = arith.constant 0 : i32
    return %c0_i32, %c0_i32_0 : i32, i32
  }
  func.func @transform_3(%arg0: i32) -> (i32, i32) {
    %c0_i32 = arith.constant 0 : i32
    %c0_i32_0 = arith.constant 0 : i32
    %c0_i32_1 = arith.constant 0 : i32
    return %c0_i32, %c0_i32_0 : i32, i32
  }
  func.func @transform_4(%arg0: i32) -> (i32, i32) {
    %c0_i32 = arith.constant 0 : i32
    %c0_i32_0 = arith.constant 0 : i32
    %c0_i32_1 = arith.constant 0 : i32
    return %c0_i32, %c0_i32_0 : i32, i32
  }
  func.func @transform_5(%arg0: i32) -> (i32, i32) {
    %c0_i32 = arith.constant 0 : i32
    %c0_i32_0 = arith.constant 0 : i32
    %c0_i32_1 = arith.constant 0 : i32
    return %c0_i32, %c0_i32_0 : i32, i32
  }
  func.func @transform_6(%arg0: i32) -> (i32, i32) {
    %c0_i32 = arith.constant 0 : i32
    %c0_i32_0 = arith.constant 0 : i32
    %c0_i32_1 = arith.constant 0 : i32
    return %c0_i32, %c0_i32_0 : i32, i32
  }
  func.func @transform_7(%arg0: i32) -> (i32, i32) {
    %c0_i32 = arith.constant 0 : i32
    %c0_i32_0 = arith.constant 0 : i32
    %c0_i32_1 = arith.constant 0 : i32
    return %c0_i32, %c0_i32_0 : i32, i32
  }
  func.func @transform_8(%arg0: i32) -> (i32, i32) {
    %c0_i32 = arith.constant 0 : i32
    %c0_i32_0 = arith.constant 0 : i32
    %c0_i32_1 = arith.constant 0 : i32
    return %c0_i32, %c0_i32_0 : i32, i32
  }
  func.func @transform_9(%arg0: i32) -> (i32, i32) {
    %c0_i32 = arith.constant 0 : i32
    %c0_i32_0 = arith.constant 0 : i32
    return %arg0, %c0_i32 : i32, i32
  }
  func.func @transform_10(%arg0: i32) -> (i32, i32) {
    %c0_i32 = arith.constant 0 : i32
    %c0_i32_0 = arith.constant 0 : i32
    return %arg0, %c0_i32 : i32, i32
  }
}

</mosaic_0001>

<bundles_post_ra>
// kernel: dann_forward_pallas.3
= control target key start
LH: loop header
LB: loop body
LE: loop exit
PB: predicated region body
PF: predicated region fallthrough
CT: control target
= control target key end

     0   :  { %s5377_s12 = smov 0   ;;  %s6429_s0 = inlined_call_operand.vmem [shape: bf16[2,672,15], index: 0, kind: input, shape index: {}]   ;;  %s6430_s1 = inlined_call_operand.vmem [shape: bf16[5,15,64], index: 1, kind: input, shape index: {}]   ;;  %s6431_s2 = inlined_call_operand.vmem [shape: f32[1,64], index: 2, kind: input, shape index: {}]   ;;  %s6432_s3 = inlined_call_operand.vmem [shape: f32[2,576,64], index: 3, kind: output, shape index: {}]  }
   0x1 LB: > { %s3924_s13 = sadd.s32 4294967295, %s5354_s12   ;;  %p3928_p0 = scmp.ge.s32.totalorder %s5354_s12, 1  ;;  %s5354_s12 = sphi %s5377_s12, %s13_s12  }
   0x2   : > { %p137_p1 = scmp.lt.s32.totalorder %s5354_s12, 3 }
   0x4   : > { %p138_p2 = pnand %p3928_p0, %p137_p1 }
   0x6   : > { %141 = sbr.rel (%p138_p2) target bundleno = 597 (0x255), region = 32 }
   0xd   : > { %v5163_v0 = vld [vmem:[%s6430_s1 + $0x8] sm:$0xff]   ;;  %vm546_vm0 = vcmask 1046528   ;;  %vm547_vm1 = vcmask 1047552   ;;  %v5356_v1 = vmov 65535   ;;  %v5164_v3 = vld [vmem:[%s6430_s1 + $0x10] sm:$0xff]   ;;  %p161_p3 = scmp.lt.s32.totalorder %s3924_s13, 1 }
   0xe   : > { %v548_v2 = vsel %vm546_vm0, 4294967295, %v5356_v1  ;;  %v5169_v5 = vld [vmem:[%s6430_s1] sm:$0xff]   ;;  %v5171_v8 = vld [vmem:[%s6430_s1 + $0x18] sm:$0xff]   ;;  %vm437_vm2 = vcmask 121856   ;;  %vm3796_vm3 = vcmask 523264  }
   0xf   : > { %v549_v4 = vsel %vm547_vm1, %v548_v2, 0  ;;  %s6499_s13 = smov (!%p161_p3, %s3924_s13), 1  ;;  %v5207_v13 = vld [vmem:[%s6430_s1 + $0x20] sm:$0xff]  }
  0x10   : > { %v551_v6 = vand.u32 %v5163_v0, %v549_v4  ;;  %v5394_v7 = vand.u32 %v5164_v3, %v549_v4  ;;  %v1030_v9 = vand.u32 %v5169_v5, %v549_v4  ;;  %s5152_s22 = smul.u32 336, %s6499_s13  ;;  %v2486_v10 = vand.u32 %v5171_v8, %v549_v4 }
  0x11   : > { %v5441_v23 = vand.u32 %v5207_v13, %v549_v4  ;;  %s5153_s28 = smul.u32 576, %s6499_s13 }
  0x12   : > { %4492 = vmatprep.subr.bf16.mxu1 %v551_v6  ;;  %4640 = vmatprep.subr.bf16.mxu0 %v5394_v7  ;;  %s5407_s25 = scalar_lea.vmem %s6429_s0, %s5152_s22 }
  0x13   : > { %4493 = vmatpush3.bf16.msra.mxu1 %v551_v6  ;;  %4641 = vmatpush3.bf16.msra.mxu0 %v5394_v7  ;;  %v5410_v11 = vld [vmem:[%s5407_s25 + $0xc] sm:$0xf]  ;;  %v5413_v12 = vld [vmem:[%s5407_s25 + $0x10] sm:$0xf]  ;;  %v5419_v14 = vld [vmem:[%s5407_s25 + $0x14] sm:$0xf]  ;;  %s6181_s6 = scalar_lea.vmem %s6432_s3, %s5153_s28 }
  0x14   : > { %4566 = vmatprep.subr.bf16.mxu1 %v1030_v9  ;;  %4714 = vmatprep.subr.bf16.mxu0 %v2486_v10  ;;  %v5422_v15 = vld [vmem:[%s5407_s25 + $0x18] sm:$0xf]  ;;  %v3933_v16 = vcombine.low %v5410_v11, %v5413_v12  ;;  %v5172_v20 = vld [vmem:[%s5407_s25 + $0x20] sm:$0xff]   ;;  %v5434_v21 = vld [vmem:[%s5407_s25 + $0x1c] sm:$0xf] }
  0x15   : > { %v3934_v17 = vcombine.low %v5419_v14, %v5422_v15  ;;  %v5170_v19 = vld [vmem:[%s5407_s25 + $0x18] sm:$0xff]   ;;  %v5439_v22 = vld [vmem:[%s5407_s25 + $0x20] sm:$0xf]  ;;  %v5174_v25 = vld [vmem:[%s5407_s25 + $0x28] sm:$0xff]  }
  0x16   : > { %4494 = vmatprep.mubr.msk.bf16.mxu1 %vm437_vm2, %v3933_v16  ;;  %4642 = vmatprep.mubr.msk.bf16.mxu0 %vm437_vm2, %v5170_v19  ;;  %v3935_v24 = vcombine.low %v5434_v21, %v5439_v22  ;;  %v5448_v26 = vld [vmem:[%s5407_s25 + $0x24] sm:$0xf]  ;;  %v5451_v27 = vld [vmem:[%s5407_s25 + $0x28] sm:$0xf]  ;;  %v5457_v28 = vld [vmem:[%s5407_s25 + $0x2c] sm:$0xf] }
  0x17   : > { %4495 = vmatmul.mubr.msk.bf16.vlgmr.msra.gmra.mrb[0].mxu1 %vm437_vm2, %v3934_v17  ;;  %4643 = vmatmul.mubr.msk.bf16.vlgmr.msra.gmra.mrb[0].mxu0 %vm437_vm2, %v5172_v20  ;;  %v5460_v29 = vld [vmem:[%s5407_s25 + $0x30] sm:$0xf]  ;;  %v3936_v30 = vcombine.low %v5448_v26, %v5451_v27  ;;  %v5178_v33 = vld [vmem:[%s5407_s25 + $0x38] sm:$0xff]   ;;  %v5471_v34 = vld [vmem:[%s5407_s25 + $0x34] sm:$0xf] }
  0x18   : > { %4567 = vmatpush3.bf16.msra.mxu1 %v1030_v9  ;;  %4715 = vmatpush3.bf16.msra.mxu0 %v2486_v10  ;;  %v5176_v31 = vld [vmem:[%s5407_s25 + $0x30] sm:$0xff]   ;;  %v3937_v32 = vcombine.low %v5457_v28, %v5460_v29  ;;  %v5476_v35 = vld [vmem:[%s5407_s25 + $0x38] sm:$0xf]  ;;  %v5479_v36 = vld [vmem:[%s5407_s25 + $0x3c] sm:$0xf] }
  0x19   : > { %4862 = vmatprep.subr.bf16.mxu1 %v5394_v7  ;;  %4498 = vmatprep.mubr.msk.bf16.mxu1 %vm437_vm2, %v3935_v24  ;;  %v5483_v37 = vld [vmem:[%s5407_s25 + $0x40] sm:$0xf]  ;;  %v3938_v38 = vcombine.low %v5471_v34, %v5476_v35  ;;  %v5182_v41 = vld [vmem:[%s5407_s25 + $0x48] sm:$0xff]   ;;  %v5493_v42 = vld [vmem:[%s5407_s25 + $0x44] sm:$0xf] }
  0x1a   : > { %4646 = vmatprep.mubr.msk.bf16.mxu0 %vm437_vm2, %v5174_v25  ;;  %4788 = vmatprep.subr.bf16.mxu0 %v5441_v23  ;;  %v5180_v39 = vld [vmem:[%s5407_s25 + $0x40] sm:$0xff]   ;;  %v3939_v40 = vcombine.low %v5479_v36, %v5483_v37  ;;  %v5498_v43 = vld [vmem:[%s5407_s25 + $0x48] sm:$0xf]  ;;  %v5502_v44 = vld [vmem:[%s5407_s25 + $0x4c] sm:$0xf] }
  0x1b   : > { %v5505_v45 = vld [vmem:[%s5407_s25 + $0x50] sm:$0xf]  ;;  %v3940_v47 = vcombine.low %v5493_v42, %v5498_v43  ;;  %v5186_v50 = vld [vmem:[%s5407_s25 + $0x58] sm:$0xff]   ;;  %v5517_v51 = vld [vmem:[%s5407_s25 + $0x54] sm:$0xf] }
  0x1c   : > { %v5184_v48 = vld [vmem:[%s5407_s25 + $0x50] sm:$0xff]   ;;  %v3941_v49 = vcombine.low %v5502_v44, %v5505_v45  ;;  %v5522_v52 = vld [vmem:[%s5407_s25 + $0x58] sm:$0xf]  ;;  %v5528_v54 = vld [vmem:[%s5407_s25 + $0x5c] sm:$0xf] }
  0x1d   : > { %v5531_v55 = vld [vmem:[%s5407_s25 + $0x60] sm:$0xf]  ;;  %v3942_v57 = vcombine.low %v5517_v51, %v5522_v52  ;;  %v5190_v60 = vld [vmem:[%s5407_s25 + $0x68] sm:$0xff]   ;;  %v5545_v61 = vld [vmem:[%s5407_s25 + $0x64] sm:$0xf] }
  0x1e   : > { %v5188_v58 = vld [vmem:[%s5407_s25 + $0x60] sm:$0xff]   ;;  %v3943_v59 = vcombine.low %v5528_v54, %v5531_v55  ;;  %v5548_v62 = vld [vmem:[%s5407_s25 + $0x68] sm:$0xf]  ;;  %v5554_v0 = vld [vmem:[%s5407_s25 + $0x6c] sm:$0xf] }
  0x1f   : > { %4499 = vmatmul.mubr.msk.bf16.gmra.mrb[4].mxu1 %vm437_vm2, %v3936_v30  ;;  %4647 = vmatmul.mubr.msk.bf16.gmra.mrb[4].mxu0 %vm437_vm2, %v5176_v31  ;;  %v5557_v1 = vld [vmem:[%s5407_s25 + $0x70] sm:$0xf]  ;;  %v3944_v3 = vcombine.low %v5545_v61, %v5548_v62  ;;  %v5194_v6 = vld [vmem:[%s5407_s25 + $0x78] sm:$0xff]   ;;  %v5571_v8 = vld [vmem:[%s5407_s25 + $0x74] sm:$0xf] }
  0x20   : > { %4502 = vmatprep.mubr.msk.bf16.mxu1 %vm437_vm2, %v3937_v32  ;;  %4650 = vmatprep.mubr.msk.bf16.mxu0 %vm437_vm2, %v5178_v33  ;;  %v5192_v4 = vld [vmem:[%s5407_s25 + $0x70] sm:$0xff]   ;;  %v3945_v5 = vcombine.low %v5554_v0, %v5557_v1  ;;  %v5574_v9 = vld [vmem:[%s5407_s25 + $0x78] sm:$0xf]  ;;  %v5577_v10 = vld [vmem:[%s5407_s25 + $0x7c] sm:$0xf] }
  0x21   : > { %v5583_v16 = vld [vmem:[%s5407_s25 + $0x80] sm:$0xf]  ;;  %v3946_v19 = vcombine.low %v5571_v8, %v5574_v9  ;;  %v5198_v25 = vld [vmem:[%s5407_s25 + $0x88] sm:$0xff]   ;;  %v5595_v30 = vld [vmem:[%s5407_s25 + $0x84] sm:$0xf] }
  0x22   : > { %v5196_v20 = vld [vmem:[%s5407_s25 + $0x80] sm:$0xff]   ;;  %v3947_v24 = vcombine.low %v5577_v10, %v5583_v16  ;;  %v5600_v31 = vld [vmem:[%s5407_s25 + $0x88] sm:$0xf]  ;;  %v5603_v32 = vld [vmem:[%s5407_s25 + $0x8c] sm:$0xf] }
  0x23   : > { %v5217_v13 = vld [vmem:[%s5407_s25 + $0x4c] sm:$0xff]   ;;  %v5725_v2 = vld [vmem:[%s5407_s25 + $0xd4] sm:$0xf]  ;;  %v5728_v33 = vld [vmem:[%s5407_s25 + $0xd8] sm:$0xf] }
  0x24   : > { %6448 = vst [vmem:[#allocation2_spill] sm:$0xff] %v5728_v33  ;;  %v5737_v17 = vld [vmem:[%s5407_s25 + $0xe0] sm:$0xf]  ;;  %v5223_v53 = vld [vmem:[%s5407_s25 + $0x64] sm:$0xff]   ;;  %v5763_v56 = vld [vmem:[%s5407_s25 + $0xf0] sm:$0xf] }
  0x25   : > { %6450 = vst [vmem:[#allocation4_spill] sm:$0xff] %v5737_v17  ;;  %v5751_v46 = vld [vmem:[%s5407_s25 + $0xe4] sm:$0xf]  ;;  %v5754_v63 = vld [vmem:[%s5407_s25 + $0xe8] sm:$0xf]  ;;  %6454 = vst [vmem:[#allocation8_spill] sm:$0xff] %v5763_v56 }
  0x26   : > { %6451 = vst [vmem:[#allocation5_spill] sm:$0xff] %v5751_v46  ;;  %6452 = vst [vmem:[#allocation6_spill] sm:$0xff] %v5754_v63  ;;  %v5225_v18 = vld [vmem:[%s5407_s25 + $0x6c] sm:$0xff]  }
  0x27   : > { %4503 = vmatmul.mubr.msk.bf16.gmra.mrb[8].mxu1 %vm437_vm2, %v3938_v38  ;;  %4651 = vmatmul.mubr.msk.bf16.gmra.mrb[8].mxu0 %vm437_vm2, %v5180_v39  ;;  %v5609_v38 = vld [vmem:[%s5407_s25 + $0x90] sm:$0xf]  ;;  %v5706_v39 = vld [vmem:[%s5407_s25 + $0xcc] sm:$0xf] }
  0x28   : > { %4506 = vmatprep.mubr.msk.bf16.mxu1 %vm437_vm2, %v3939_v40  ;;  %4654 = vmatprep.mubr.msk.bf16.mxu0 %vm437_vm2, %v5182_v41  ;;  %v3948_v40 = vcombine.low %v5595_v30, %v5600_v31  ;;  %v5200_v41 = vld [vmem:[%s5407_s25 + $0x90] sm:$0xff]  }
  0x2f   : > { %4507 = vmatmul.mubr.msk.bf16.gmra.mrb[12].mxu1 %vm437_vm2, %v3940_v47  ;;  %4655 = vmatmul.mubr.msk.bf16.gmra.mrb[12].mxu0 %vm437_vm2, %v5184_v48  ;;  %v3949_v47 = vcombine.low %v5603_v32, %v5609_v38  ;;  %v5202_v48 = vld [vmem:[%s5407_s25 + $0x98] sm:$0xff]  }
  0x30   : > { %4510 = vmatprep.mubr.msk.bf16.mxu1 %vm437_vm2, %v3941_v49  ;;  %4658 = vmatprep.mubr.msk.bf16.mxu0 %vm437_vm2, %v5186_v50  ;;  %v5620_v49 = vld [vmem:[%s5407_s25 + $0x94] sm:$0xf]  ;;  %v5624_v50 = vld [vmem:[%s5407_s25 + $0x98] sm:$0xf] }
  0x37   : > { %4511 = vmatmul.mubr.msk.bf16.gmra.mrb[16].mxu1 %vm437_vm2, %v3942_v57  ;;  %4659 = vmatmul.mubr.msk.bf16.gmra.mrb[16].mxu0 %vm437_vm2, %v5188_v58  ;;  %v5629_v57 = vld [vmem:[%s5407_s25 + $0x9c] sm:$0xf] }
  0x38   : > { %4514 = vmatprep.mubr.msk.bf16.mxu1 %vm437_vm2, %v3943_v59  ;;  %4662 = vmatprep.mubr.msk.bf16.mxu0 %vm437_vm2, %v5190_v60  ;;  %v5635_v59 = vld [vmem:[%s5407_s25 + $0xa0] sm:$0xf] }
  0x39   : > { %v5688_v60 = vld [vmem:[%s5407_s25 + $0xc0] sm:$0xf] }
  0x3a   : > { %v5213_v58 = vld [vmem:[%s5407_s25 + $0x3c] sm:$0xff]  }
  0x3f   : > { %4515 = vmatmul.mubr.msk.bf16.gmra.mrb[20].mxu1 %vm437_vm2, %v3944_v3  ;;  %4663 = vmatmul.mubr.msk.bf16.gmra.mrb[20].mxu0 %vm437_vm2, %v5192_v4  ;;  %v3950_v3 = vcombine.low %v5620_v49, %v5624_v50  ;;  %v5204_v4 = vld [vmem:[%s5407_s25 + $0xa0] sm:$0xff]  }
  0x40   : > { %4518 = vmatprep.mubr.msk.bf16.mxu1 %vm437_vm2, %v3945_v5  ;;  %4666 = vmatprep.mubr.msk.bf16.mxu0 %vm437_vm2, %v5194_v6  ;;  %v3951_v5 = vcombine.low %v5629_v57, %v5635_v59  ;;  %v5206_v6 = vld [vmem:[%s5407_s25 + $0x24] sm:$0xff]  }
  0x47   : > { %4519 = vmatmul.mubr.msk.bf16.gmra.mrb[24].mxu1 %vm437_vm2, %v3946_v19  ;;  %4667 = vmatmul.mubr.msk.bf16.gmra.mrb[24].mxu0 %vm437_vm2, %v5196_v20  ;;  %v5646_v19 = vld [vmem:[%s5407_s25 + $0xa4] sm:$0xf]  ;;  %v5650_v20 = vld [vmem:[%s5407_s25 + $0xa8] sm:$0xf] }
  0x48   : > { %4522 = vmatprep.mubr.msk.bf16.mxu1 %vm437_vm2, %v3947_v24  ;;  %4670 = vmatprep.mubr.msk.bf16.mxu0 %vm437_vm2, %v5198_v25  ;;  %v5655_v24 = vld [vmem:[%s5407_s25 + $0xac] sm:$0xf] }
  0x4f   : > { %4523 = vmatmul.mubr.msk.bf16.gmra.mrb[28].mxu1 %vm437_vm2, %v3948_v40  ;;  %4671 = vmatmul.mubr.msk.bf16.gmra.mrb[28].mxu0 %vm437_vm2, %v5200_v41  ;;  %v5661_v40 = vld [vmem:[%s5407_s25 + $0xb0] sm:$0xf]  ;;  %v5681_v41 = vld [vmem:[%s5407_s25 + $0xbc] sm:$0xf] }
  0x50   : > { %4526 = vmatprep.mubr.msk.bf16.mxu1 %vm437_vm2, %v3949_v47  ;;  %4674 = vmatprep.mubr.msk.bf16.mxu0 %vm437_vm2, %v5202_v48  ;;  %v3952_v47 = vcombine.low %v5646_v19, %v5650_v20  ;;  %v5209_v48 = vld [vmem:[%s5407_s25 + $0x2c] sm:$0xff]   ;;  %v3955_v25 = vcombine.low %v5681_v41, %v5688_v60 }
  0x57   : > { %4527 = vmatmul.mubr.msk.bf16.gmra.mrb[32].mxu1 %vm437_vm2, %v3950_v3  ;;  %4675 = vmatmul.mubr.msk.bf16.gmra.mrb[32].mxu0 %vm437_vm2, %v5204_v4  ;;  %v3953_v3 = vcombine.low %v5655_v24, %v5661_v40  ;;  %v5211_v4 = vld [vmem:[%s5407_s25 + $0x34] sm:$0xff]  }
  0x58   : > { %4530 = vmatprep.mubr.msk.bf16.mxu1 %vm437_vm2, %v3951_v5  ;;  %4716 = vmatprep.mubr.msk.bf16.mxu0 %vm437_vm2, %v5206_v6  ;;  %v5672_v5 = vld [vmem:[%s5407_s25 + $0xb4] sm:$0xf]  ;;  %v5676_v6 = vld [vmem:[%s5407_s25 + $0xb8] sm:$0xf] }
  0x5f   : > { %4531 = vmatmul.mubr.msk.bf16.gmra.mrb[36].mxu1 %vm437_vm2, %v3952_v47  ;;  %4717 = vmatmul.mubr.msk.bf16.vlgmr.msra.gmra.mrb[0].mxu0 %vm437_vm2, %v5209_v48  ;;  %v3954_v48 = vcombine.low %v5672_v5, %v5676_v6  ;;  %v5711_v47 = vld [vmem:[%s5407_s25 + $0xd0] sm:$0xf] }
  0x60   : > { %4534 = vmatprep.mubr.msk.bf16.mxu1 %vm437_vm2, %v3953_v3  ;;  %4789 = vmatpush3.bf16.msra.mxu0 %v5441_v23  ;;  %v5215_v3 = vld [vmem:[%s5407_s25 + $0x44] sm:$0xff]  }
  0x61   : > { %4720 = vmatprep.mubr.msk.bf16.mxu0 %vm437_vm2, %v5211_v4  ;;  %v5699_v23 = vld [vmem:[%s5407_s25 + $0xc4] sm:$0xf]  ;;  %v5702_v4 = vld [vmem:[%s5407_s25 + $0xc8] sm:$0xf] }
  0x67   : > { %4535 = vmatmul.mubr.msk.bf16.gmra.mrb[40].mxu1 %vm437_vm2, %v3954_v48  ;;  %4721 = vmatmul.mubr.msk.bf16.gmra.mrb[4].mxu0 %vm437_vm2, %v5213_v58  ;;  %v3956_v48 = vcombine.low %v5699_v23, %v5702_v4  ;;  %v5219_v58 = vld [vmem:[%s5407_s25 + $0x54] sm:$0xff]  }
  0x68   : > { %4538 = vmatprep.mubr.msk.bf16.mxu1 %vm437_vm2, %v3955_v25  ;;  %4724 = vmatprep.mubr.msk.bf16.mxu0 %vm437_vm2, %v5215_v3  ;;  %v3957_v25 = vcombine.low %v5706_v39, %v5711_v47  ;;  %v5732_v3 = vld [vmem:[%s5407_s25 + $0xdc] sm:$0xf] }
  0x69   : > { %6449 = vst [vmem:[#allocation3_spill] sm:$0xff] %v5732_v3 }
  0x6f   : > { %4539 = vmatmul.mubr.msk.bf16.gmra.mrb[44].mxu1 %vm437_vm2, %v3956_v48  ;;  %4725 = vmatmul.mubr.msk.bf16.gmra.mrb[8].mxu0 %vm437_vm2, %v5217_v13  ;;  %v5221_v48 = vld [vmem:[%s5407_s25 + $0x5c] sm:$0xff]   ;;  %v3958_v13 = vcombine.low %v5725_v2, %v5728_v33 }
  0x70   : > { %4542 = vmatprep.mubr.msk.bf16.mxu1 %vm437_vm2, %v3957_v25  ;;  %4728 = vmatprep.mubr.msk.bf16.mxu0 %vm437_vm2, %v5219_v58  ;;  %v3959_v25 = vcombine.low %v5732_v3, %v5737_v17  ;;  %v5758_v58 = vld [vmem:[%s5407_s25 + $0xec] sm:$0xf]  ;;  %v3960_v17 = vcombine.low %v5751_v46, %v5754_v63  ;;  %v5773_v3 = vld [vmem:[%s5407_s25 + $0xf4] sm:$0xf]  ;;  %v5795_v46 = vld [vmem:[%s5407_s25 + $0x104] sm:$0xf] }
  0x71   : > { %6453 = vst [vmem:[#allocation7_spill] sm:$0xff] %v5758_v58  ;;  %v3961_v33 = vcombine.low %v5758_v58, %v5763_v56  ;;  %v5229_v56 = vld [vmem:[%s5407_s25 + $0x7c] sm:$0xff]   ;;  %v5231_v58 = vld [vmem:[%s5407_s25 + $0x84] sm:$0xff]   ;;  %6458 = vst [vmem:[#allocation12_spill] sm:$0xff] %v5795_v46 }
  0x77   : > { %4543 = vmatmul.mubr.msk.bf16.gmra.mrb[48].mxu1 %vm437_vm2, %v3958_v13  ;;  %4729 = vmatmul.mubr.msk.bf16.gmra.mrb[12].mxu0 %vm437_vm2, %v5221_v48  ;;  %v5227_v13 = vld [vmem:[%s5407_s25 + $0x74] sm:$0xff]  }
  0x78   : > { %4546 = vmatprep.mubr.msk.bf16.mxu1 %vm437_vm2, %v3959_v25  ;;  %4732 = vmatprep.mubr.msk.bf16.mxu0 %vm437_vm2, %v5223_v53  ;;  %v5776_v48 = vld [vmem:[%s5407_s25 + $0xf8] sm:$0xf]  ;;  %v5780_v25 = vld [vmem:[%s5407_s25 + $0xfc] sm:$0xf]  ;;  %v5785_v53 = vld [vmem:[%s5407_s25 + $0x100] sm:$0xf] }
  0x79   : > { %6455 = vst [vmem:[#allocation9_spill] sm:$0xff] %v5776_v48  ;;  %6456 = vst [vmem:[#allocation10_spill] sm:$0xff] %v5780_v25  ;;  %v3962_v63 = vcombine.low %v5773_v3, %v5776_v48  ;;  %v5233_v48 = vld [vmem:[%s5407_s25 + $0x8c] sm:$0xff]  }
  0x7a   : > { %6457 = vst [vmem:[#allocation11_spill] sm:$0xff] %v5785_v53 }
  0x7f   : > { %4547 = vmatmul.mubr.msk.bf16.gmra.mrb[52].mxu1 %vm437_vm2, %v3960_v17  ;;  %4733 = vmatmul.mubr.msk.bf16.gmra.mrb[16].mxu0 %vm437_vm2, %v5225_v18  ;;  %v3963_v17 = vcombine.low %v5780_v25, %v5785_v53  ;;  %v5798_v18 = vld [vmem:[%s5407_s25 + $0x108] sm:$0xf]  ;;  %v5235_v25 = vld [vmem:[%s5407_s25 + $0x94] sm:$0xff]  }
  0x80   : > { %4550 = vmatprep.mubr.msk.bf16.mxu1 %vm437_vm2, %v3961_v33  ;;  %4736 = vmatprep.mubr.msk.bf16.mxu0 %vm437_vm2, %v5227_v13  ;;  %6459 = vst [vmem:[#allocation13_spill] sm:$0xff] %v5798_v18  ;;  %v5804_v33 = vld [vmem:[%s5407_s25 + $0x10c] sm:$0xf]  ;;  %v5808_v13 = vld [vmem:[%s5407_s25 + $0x110] sm:$0xf]  ;;  %v3964_v53 = vcombine.low %v5795_v46, %v5798_v18  ;;  %v5237_v18 = vld [vmem:[%s5407_s25 + $0x9c] sm:$0xff]  }
  0x81   : > { %6460 = vst [vmem:[#allocation14_spill] sm:$0xff] %v5804_v33  ;;  %6461 = vst [vmem:[#allocation15_spill] sm:$0xff] %v5808_v13  ;;  %v5242_v46 = vld [vmem:[%s5407_s25] sm:$0xff]  }
  0x87   : > { %4551 = vmatmul.mubr.msk.bf16.gmra.mrb[56].mxu1 %vm437_vm2, %v3962_v63  ;;  %4737 = vmatmul.mubr.msk.bf16.gmra.mrb[20].mxu0 %vm437_vm2, %v5229_v56  ;;  %v3965_v63 = vcombine.low %v5804_v33, %v5808_v13  ;;  %v5820_v56 = vld [vmem:[%s5407_s25 + $0x114] sm:$0xf]  ;;  %v246_v13 = vld [vmem:[%s5407_s25 + $0x120] sm:$0xf]  ;;  %v5241_v33 = vld [vmem:[%s5407_s25 + $0xac] sm:$0xff]  }
  0x88   : > { %4554 = vmatprep.mubr.msk.bf16.mxu1 %vm437_vm2, %v3963_v17  ;;  %4740 = vmatprep.mubr.msk.bf16.mxu0 %vm437_vm2, %v5231_v58  ;;  %v5823_v58 = vld [vmem:[%s5407_s25 + $0x118] sm:$0xf]  ;;  %v5827_v17 = vld [vmem:[%s5407_s25 + $0x11c] sm:$0xf] }
  0x89   : > { %6462 = vst [vmem:[#allocation16_spill] sm:$0xff] %v5823_v58 }
  0x8f   : > { %4555 = vmatmul.mubr.msk.bf16.gmra.mrb[60].mxu1 %vm437_vm2, %v3964_v53  ;;  %4741 = vmatmul.mubr.msk.bf16.gmra.mrb[24].mxu0 %vm437_vm2, %v5233_v48  ;;  %v3966_v53 = vcombine.low %v5820_v56, %v5823_v58  ;;  %v3967_v48 = vcombine.low %v5827_v17, %v246_v13  ;;  %v5243_v58 = vld [vmem:[%s5407_s25 + $0xb4] sm:$0xff]   ;;  %v174_v13 = vld [vmem:[%s5407_s25 + $0x8] sm:$0xf] }
  0x90   : > { %4558 = vmatprep.mubr.msk.bf16.mxu1 %vm437_vm2, %v3965_v63  ;;  %4744 = vmatprep.mubr.msk.bf16.mxu0 %vm437_vm2, %v5235_v25  ;;  %v5239_v63 = vld [vmem:[%s5407_s25 + $0xa4] sm:$0xff]  }
  0x91   : > { %v5240_v25 = vld [vmem:[%s5407_s25 + $0x124] sm:$0xff]  }
  0x97   : > { %4559 = vmatmul.mubr.msk.bf16.gmra.mrb[64].mxu1 %vm437_vm2, %v3966_v53  ;;  %4745 = vmatmul.mubr.msk.bf16.gmra.mrb[28].mxu0 %vm437_vm2, %v5237_v18  ;;  %v4007_v18 = vcombine.low %v174_v13, %v5410_v11  ;;  %v5244_v53 = vld [vmem:[%s5407_s25 + $0xbc] sm:$0xff]   ;;  %v6464_v11 = vcombine.low %v5422_v15, %v5434_v21  ;;  %v6467_v15 = vcombine.low %v5460_v29, %v5471_v34  ;;  %v5255_v21 = vld [vmem:[%s5407_s25 + $0xec] sm:$0xff]   ;;  %v5261_v29 = vld [vmem:[%s5407_s25 + $0x104] sm:$0xff]  }
  0x98   : > { %4562 = vmatprep.mubr.msk.bf16.mxu1 %vm437_vm2, %v3967_v48  ;;  %4748 = vmatprep.mubr.msk.bf16.mxu0 %vm437_vm2, %v5239_v63  ;;  %v5245_v48 = vld [vmem:[%s5407_s25 + $0xc4] sm:$0xff]   ;;  %v6466_v63 = vcombine.low %v5451_v27, %v5457_v28  ;;  %v6469_v27 = vcombine.low %v5483_v37, %v5493_v42  ;;  %v5259_v28 = vld [vmem:[%s5407_s25 + $0xfc] sm:$0xff]   ;;  %v6470_v34 = vcombine.low %v5498_v43, %v5502_v44  ;;  %v5265_v37 = vld [vmem:[%s5407_s25 + $0x114] sm:$0xff]  }
  0x99   : > { %v6472_v42 = vcombine.low %v5522_v52, %v5528_v54  ;;  %v6473_v43 = vcombine.low %v5531_v55, %v5545_v61  ;;  %v5267_v44 = vld [vmem:[%s5407_s25 + $0x11c] sm:$0xff]   ;;  %v6475_v52 = vcombine.low %v5557_v1, %v5571_v8  ;;  %v5271_v54 = vld [vmem:[%s5407_s25 + $0x12c] sm:$0xff]   ;;  %v5273_v55 = vld [vmem:[%s5407_s25 + $0x134] sm:$0xff]   ;;  %v6476_v61 = vcombine.low %v5574_v9, %v5577_v10 }
  0x9a   : > { %v5277_v1 = vld [vmem:[%s5407_s25 + $0x30] sm:$0xff]   ;;  %v6478_v8 = vcombine.low %v5600_v31, %v5603_v32  ;;  %v6479_v9 = vcombine.low %v5609_v38, %v5620_v49  ;;  %v5279_v10 = vld [vmem:[%s5407_s25 + $0x38] sm:$0xff]   ;;  %v6481_v31 = vcombine.low %v5635_v59, %v5646_v19  ;;  %v5283_v32 = vld [vmem:[%s5407_s25 + $0x48] sm:$0xff]   ;;  %v4028_v38 = vcombine.low %v5661_v40, %v5672_v5 }
  0x9b   : > { %v5285_v49 = vld [vmem:[%s5407_s25 + $0x50] sm:$0xff]   ;;  %v5287_v59 = vld [vmem:[%s5407_s25 + $0x58] sm:$0xff]   ;;  %v4030_v19 = vcombine.low %v5688_v60, %v5699_v23  ;;  %v5289_v40 = vld [vmem:[%s5407_s25 + $0x60] sm:$0xff]  }
  0x9c   : > { %v5293_v5 = vld [vmem:[%s5407_s25 + $0x70] sm:$0xff]   ;;  %v6483_v60 = vld [vmem:[#allocation3_spill] sm:$0xff] }
  0x9f   : > { %4563 = vmatmul.mubr.msk.bf16.gmra.mrb[68].mxu1 %vm437_vm2, %v5240_v25  ;;  %4749 = vmatmul.mubr.msk.bf16.gmra.mrb[32].mxu0 %vm437_vm2, %v5241_v33  ;;  %v6463_v33 = vcombine.low %v5413_v12, %v5419_v14  ;;  %v5251_v12 = vld [vmem:[%s5407_s25 + $0xdc] sm:$0xff]   ;;  %v5253_v14 = vld [vmem:[%s5407_s25 + $0xe4] sm:$0xff]  }
  0xa0   : > { %4568 = vmatprep.mubr.msk.bf16.mxu1 %vm437_vm2, %v5242_v46  ;;  %4752 = vmatprep.mubr.msk.bf16.mxu0 %vm437_vm2, %v5243_v58  ;;  %v5247_v46 = vld [vmem:[%s5407_s25 + $0xcc] sm:$0xff]   ;;  %v5249_v58 = vld [vmem:[%s5407_s25 + $0xd4] sm:$0xff]  }
  0xa1   : > { %v5295_v25 = vld [vmem:[%s5407_s25 + $0x78] sm:$0xff]  }
  0xa7   : > { %4569 = vmatmul.mubr.msk.bf16.vlgmr.msra.gmra.mrb[0].mxu1 %vm437_vm2, %v4007_v18  ;;  %4753 = vmatmul.mubr.msk.bf16.gmra.mrb[36].mxu0 %vm437_vm2, %v5244_v53  ;;  %v5297_v18 = vld [vmem:[%s5407_s25 + $0x80] sm:$0xff]  }
  0xa8   : > { %4863 = vmatpush3.bf16.msra.mxu1 %v5394_v7  ;;  %4572 = vmatprep.mubr.msk.bf16.mxu1 %vm437_vm2, %v6463_v33  ;;  %v6465_v7 = vcombine.low %v5439_v22, %v5448_v26  ;;  %v5257_v22 = vld [vmem:[%s5407_s25 + $0xf4] sm:$0xff]   ;;  %v6468_v26 = vcombine.low %v5476_v35, %v5479_v36  ;;  %v6471_v35 = vcombine.low %v5505_v45, %v5517_v51  ;;  %v5263_v36 = vld [vmem:[%s5407_s25 + $0x10c] sm:$0xff]   ;;  %v5269_v45 = vld [vmem:[%s5407_s25 + $0x124] sm:$0xff]  }
  0xa9   : > { %4756 = vmatprep.mubr.msk.bf16.mxu0 %vm437_vm2, %v5245_v48  ;;  %v6474_v51 = vcombine.low %v5548_v62, %v5554_v0  ;;  %v6477_v62 = vcombine.low %v5583_v16, %v5595_v30  ;;  %v5275_v0 = vld [vmem:[%s5407_s25 + $0x13c] sm:$0xff]   ;;  %v6480_v30 = vcombine.low %v5624_v50, %v5629_v57  ;;  %v6482_v50 = vcombine.low %v5650_v20, %v5655_v24  ;;  %v5291_v24 = vld [vmem:[%s5407_s25 + $0x68] sm:$0xff]   ;;  %v6489_v33 = vld [vmem:[#allocation8_spill] sm:$0xff] }
  0xaa   : > { %v5281_v16 = vld [vmem:[%s5407_s25 + $0x40] sm:$0xff]   ;;  %v4029_v57 = vcombine.low %v5676_v6, %v5681_v41  ;;  %v4031_v20 = vcombine.low %v5702_v4, %v5706_v39  ;;  %v4032_v41 = vcombine.low %v5711_v47, %v5725_v2  ;;  %v6485_v39 = vld [vmem:[#allocation5_spill] sm:$0xff]  ;;  %v6486_v4 = vld [vmem:[#allocation4_spill] sm:$0xff] }
  0xab   : > { %v6484_v6 = vld [vmem:[#allocation2_spill] sm:$0xff]  ;;  %v4034_v13 = vcombine.low %v6486_v4, %v6485_v39  ;;  %v6487_v2 = vld [vmem:[#allocation7_spill] sm:$0xff] }
  0xac   : > { %v4033_v23 = vcombine.low %v6484_v6, %v6483_v60  ;;  %v6488_v47 = vld [vmem:[#allocation6_spill] sm:$0xff]  ;;  %v5299_v48 = vld [vmem:[%s5407_s25 + $0x88] sm:$0xff]   ;;  %v5343_v60 = vld [vmem:[%s5407_s25 + $0x138] sm:$0xff]  }
  0xad   : > { %v4035_v53 = vcombine.low %v6488_v47, %v6487_v2  ;;  %v5344_v6 = vld [vmem:[%s5407_s25 + $0x128] sm:$0xff]  }
  0xae   : > { %v5347_v39 = vld [vmem:[%s5407_s25 + $0x148] sm:$0xff]  }
  0xaf   : > { %4573 = vmatmul.mubr.msk.bf16.gmra.mrb[4].mxu1 %vm437_vm2, %v6464_v11  ;;  %4757 = vmatmul.mubr.msk.bf16.gmra.mrb[40].mxu0 %vm437_vm2, %v5247_v46  ;;  %v4036_v46 = vcombine.low %v6489_v33, %v5773_v3  ;;  %v6490_v11 = vld [vmem:[#allocation10_spill] sm:$0xff] }
  0xb0   : > { %4576 = vmatprep.mubr.msk.bf16.mxu1 %vm437_vm2, %v6465_v7  ;;  %4760 = vmatprep.mubr.msk.bf16.mxu0 %vm437_vm2, %v5249_v58  ;;  %v5301_v58 = vld [vmem:[%s5407_s25 + $0x90] sm:$0xff]   ;;  %v6491_v7 = vld [vmem:[#allocation9_spill] sm:$0xff]  ;;  %v5305_v3 = vld [vmem:[%s5407_s25 + $0xa0] sm:$0xff]  }
  0xb7   : > { %4577 = vmatmul.mubr.msk.bf16.gmra.mrb[8].mxu1 %vm437_vm2, %v6466_v63  ;;  %4761 = vmatmul.mubr.msk.bf16.gmra.mrb[44].mxu0 %vm437_vm2, %v5251_v12  ;;  %v4037_v12 = vcombine.low %v6491_v7, %v6490_v11  ;;  %v6492_v63 = vld [vmem:[#allocation12_spill] sm:$0xff] }
  0xb8   : > { %4580 = vmatprep.mubr.msk.bf16.mxu1 %vm437_vm2, %v6467_v15  ;;  %4764 = vmatprep.mubr.msk.bf16.mxu0 %vm437_vm2, %v5253_v14  ;;  %v5303_v14 = vld [vmem:[%s5407_s25 + $0x98] sm:$0xff]   ;;  %v6493_v15 = vld [vmem:[#allocation11_spill] sm:$0xff] }
  0xbf   : > { %4581 = vmatmul.mubr.msk.bf16.gmra.mrb[12].mxu1 %vm437_vm2, %v6468_v26  ;;  %4765 = vmatmul.mubr.msk.bf16.gmra.mrb[48].mxu0 %vm437_vm2, %v5255_v21  ;;  %v4038_v21 = vcombine.low %v6493_v15, %v6492_v63  ;;  %v6495_v26 = vld [vmem:[#allocation13_spill] sm:$0xff] }
  0xc0   : > { %4584 = vmatprep.mubr.msk.bf16.mxu1 %vm437_vm2, %v6469_v27  ;;  %4768 = vmatprep.mubr.msk.bf16.mxu0 %vm437_vm2, %v5257_v22  ;;  %v6494_v22 = vld [vmem:[#allocation14_spill] sm:$0xff] }
  0xc1   : > { %v4039_v27 = vcombine.low %v6495_v26, %v6494_v22 }
  0xc7   : > { %4585 = vmatmul.mubr.msk.bf16.gmra.mrb[16].mxu1 %vm437_vm2, %v6470_v34  ;;  %4769 = vmatmul.mubr.msk.bf16.gmra.mrb[52].mxu0 %vm437_vm2, %v5259_v28  ;;  %v5307_v28 = vld [vmem:[%s5407_s25 + $0xa8] sm:$0xff]  }
  0xc8   : > { %4588 = vmatprep.mubr.msk.bf16.mxu1 %vm437_vm2, %v6471_v35  ;;  %4772 = vmatprep.mubr.msk.bf16.mxu0 %vm437_vm2, %v5261_v29  ;;  %v6496_v29 = vld [vmem:[#allocation15_spill] sm:$0xff]  ;;  %v5309_v35 = vld [vmem:[%s5407_s25 + $0xb0] sm:$0xff]  }
  0xc9   : > { %v4040_v34 = vcombine.low %v6496_v29, %v5820_v56  ;;  %v5313_v56 = vld [vmem:[%s5407_s25 + $0xc0] sm:$0xff]  }
  0xcf   : > { %4589 = vmatmul.mubr.msk.bf16.gmra.mrb[20].mxu1 %vm437_vm2, %v6472_v42  ;;  %4773 = vmatmul.mubr.msk.bf16.gmra.mrb[56].mxu0 %vm437_vm2, %v5263_v36  ;;  %v6497_v36 = vld [vmem:[#allocation16_spill] sm:$0xff]  ;;  %v5311_v42 = vld [vmem:[%s5407_s25 + $0xb8] sm:$0xff]  }
  0xd0   : > { %4592 = vmatprep.mubr.msk.bf16.mxu1 %vm437_vm2, %v6473_v43  ;;  %4776 = vmatprep.mubr.msk.bf16.mxu0 %vm437_vm2, %v5265_v37  ;;  %v4041_v37 = vcombine.low %v6497_v36, %v5827_v17  ;;  %v5312_v43 = vld [vmem:[%s5407_s25 + $0xa8] sm:$0xff]   ;;  %v5316_v17 = vld [vmem:[%s5407_s25 + $0xb8] sm:$0xff]  }
  0xd7   : > { %4593 = vmatmul.mubr.msk.bf16.gmra.mrb[24].mxu1 %vm437_vm2, %v6474_v51  ;;  %4777 = vmatmul.mubr.msk.bf16.gmra.mrb[60].mxu0 %vm437_vm2, %v5267_v44  ;;  %v5314_v44 = vld [vmem:[%s5407_s25 + $0xb0] sm:$0xff]  }
  0xd8   : > { %4596 = vmatprep.mubr.msk.bf16.mxu1 %vm437_vm2, %v6475_v52  ;;  %4780 = vmatprep.mubr.msk.bf16.mxu0 %vm437_vm2, %v5269_v45  ;;  %v5315_v45 = vld [vmem:[%s5407_s25 + $0xc8] sm:$0xff]   ;;  %v5317_v51 = vld [vmem:[%s5407_s25 + $0xd0] sm:$0xff]   ;;  %v5318_v52 = vld [vmem:[%s5407_s25 + $0xc0] sm:$0xff]  }
  0xdf   : > { %4597 = vmatmul.mubr.msk.bf16.gmra.mrb[28].mxu1 %vm437_vm2, %v6476_v61  ;;  %4781 = vmatmul.mubr.msk.bf16.gmra.mrb[64].mxu0 %vm437_vm2, %v5271_v54  ;;  %v5319_v54 = vld [vmem:[%s5407_s25 + $0xd8] sm:$0xff]   ;;  %v5321_v61 = vld [vmem:[%s5407_s25 + $0xe0] sm:$0xff]  }
  0xe0   : > { %4600 = vmatprep.mubr.msk.bf16.mxu1 %vm437_vm2, %v6477_v62  ;;  %4784 = vmatprep.mubr.msk.bf16.mxu0 %vm437_vm2, %v5273_v55  ;;  %v5320_v55 = vld [vmem:[%s5407_s25 + $0xc8] sm:$0xff]   ;;  %v5322_v62 = vld [vmem:[%s5407_s25 + $0xd0] sm:$0xff]  }
  0xe7   : > { %4601 = vmatmul.mubr.msk.bf16.gmra.mrb[32].mxu1 %vm437_vm2, %v6478_v8  ;;  %4785 = vmatmul.mubr.msk.bf16.gmra.mrb[68].mxu0 %vm437_vm2, %v5275_v0  ;;  %v5323_v0 = vld [vmem:[%s5407_s25 + $0xe8] sm:$0xff]   ;;  %v5325_v8 = vld [vmem:[%s5407_s25 + $0xf0] sm:$0xff]  }
  0xe8   : > { %4604 = vmatprep.mubr.msk.bf16.mxu1 %vm437_vm2, %v6479_v9  ;;  %4790 = vmatprep.mubr.msk.bf16.mxu0 %vm437_vm2, %v5277_v1  ;;  %v5324_v1 = vld [vmem:[%s5407_s25 + $0xd8] sm:$0xff]   ;;  %v5326_v9 = vld [vmem:[%s5407_s25 + $0xe0] sm:$0xff]  }
  0xef   : > { %4605 = vmatmul.mubr.msk.bf16.gmra.mrb[36].mxu1 %vm437_vm2, %v6480_v30  ;;  %4791 = vmatmul.mubr.msk.bf16.vlgmr.msra.gmra.mrb[0].mxu0 %vm437_vm2, %v5279_v10  ;;  %v5327_v10 = vld [vmem:[%s5407_s25 + $0xf8] sm:$0xff]   ;;  %v5329_v30 = vld [vmem:[%s5407_s25 + $0x100] sm:$0xff]  }
  0xf0   : > { %4608 = vmatprep.mubr.msk.bf16.mxu1 %vm437_vm2, %v6481_v31  ;;  %4794 = vmatprep.mubr.msk.bf16.mxu0 %vm437_vm2, %v5281_v16  ;;  %v5328_v16 = vld [vmem:[%s5407_s25 + $0xe8] sm:$0xff]   ;;  %v5330_v31 = vld [vmem:[%s5407_s25 + $0xf0] sm:$0xff]  }
  0xf7   : > { %4609 = vmatmul.mubr.msk.bf16.gmra.mrb[40].mxu1 %vm437_vm2, %v6482_v50  ;;  %4795 = vmatmul.mubr.msk.bf16.gmra.mrb[4].mxu0 %vm437_vm2, %v5283_v32  ;;  %v5331_v32 = vld [vmem:[%s5407_s25 + $0x108] sm:$0xff]   ;;  %v5334_v50 = vld [vmem:[%s5407_s25 + $0x100] sm:$0xff]  }
  0xf8   : > { %4612 = vmatprep.mubr.msk.bf16.mxu1 %vm437_vm2, %v4028_v38  ;;  %4798 = vmatprep.mubr.msk.bf16.mxu0 %vm437_vm2, %v5285_v49  ;;  %v5332_v38 = vld [vmem:[%s5407_s25 + $0xf8] sm:$0xff]   ;;  %v5333_v49 = vld [vmem:[%s5407_s25 + $0x110] sm:$0xff]  }
  0xff   : > { %4613 = vmatmul.mubr.msk.bf16.gmra.mrb[44].mxu1 %vm437_vm2, %v4029_v57  ;;  %4799 = vmatmul.mubr.msk.bf16.gmra.mrb[8].mxu0 %vm437_vm2, %v5287_v59  ;;  %v5335_v57 = vld [vmem:[%s5407_s25 + $0x118] sm:$0xff]   ;;  %v5336_v59 = vld [vmem:[%s5407_s25 + $0x108] sm:$0xff]  }
 0x100   : > { %4616 = vmatprep.mubr.msk.bf16.mxu1 %vm437_vm2, %v4030_v19  ;;  %4802 = vmatprep.mubr.msk.bf16.mxu0 %vm437_vm2, %v5289_v40  ;;  %v5337_v19 = vld [vmem:[%s5407_s25 + $0x120] sm:$0xff]   ;;  %v5338_v40 = vld [vmem:[%s5407_s25 + $0x110] sm:$0xff]  }
 0x107   : > { %4617 = vmatmul.mubr.msk.bf16.gmra.mrb[48].mxu1 %vm437_vm2, %v4031_v20  ;;  %4803 = vmatmul.mubr.msk.bf16.gmra.mrb[12].mxu0 %vm437_vm2, %v5291_v24  ;;  %v5339_v20 = vld [vmem:[%s5407_s25 + $0x128] sm:$0xff]   ;;  %v5340_v24 = vld [vmem:[%s5407_s25 + $0x118] sm:$0xff]  }
 0x108   : > { %4620 = vmatprep.mubr.msk.bf16.mxu1 %vm437_vm2, %v4032_v41  ;;  %4806 = vmatprep.mubr.msk.bf16.mxu0 %vm437_vm2, %v5293_v5  ;;  %v5341_v41 = vld [vmem:[%s5407_s25 + $0x130] sm:$0xff]   ;;  %v5342_v5 = vld [vmem:[%s5407_s25 + $0x120] sm:$0xff]  }
 0x10f   : > { %4621 = vmatmul.mubr.msk.bf16.gmra.mrb[52].mxu1 %vm437_vm2, %v4033_v23  ;;  %4807 = vmatmul.mubr.msk.bf16.gmra.mrb[16].mxu0 %vm437_vm2, %v5295_v25  ;;  %v5345_v23 = vld [vmem:[%s5407_s25 + $0x140] sm:$0xff]   ;;  %v5346_v25 = vld [vmem:[%s5407_s25 + $0x130] sm:$0xff]  }
 0x110   : > { %4624 = vmatprep.mubr.msk.bf16.mxu1 %vm437_vm2, %v4034_v13  ;;  %4810 = vmatprep.mubr.msk.bf16.mxu0 %vm437_vm2, %v5297_v18 }
 0x117   : > { %4625 = vmatmul.mubr.msk.bf16.gmra.mrb[56].mxu1 %vm437_vm2, %v4035_v53  ;;  %4811 = vmatmul.mubr.msk.bf16.gmra.mrb[20].mxu0 %vm437_vm2, %v5299_v48 }
 0x118   : > { %4628 = vmatprep.mubr.msk.bf16.mxu1 %vm437_vm2, %v4036_v46  ;;  %4814 = vmatprep.mubr.msk.bf16.mxu0 %vm437_vm2, %v5301_v58 }
 0x11f   : > { %4629 = vmatmul.mubr.msk.bf16.gmra.mrb[60].mxu1 %vm437_vm2, %v4037_v12  ;;  %4815 = vmatmul.mubr.msk.bf16.gmra.mrb[24].mxu0 %vm437_vm2, %v5303_v14 }
 0x120   : > { %4632 = vmatprep.mubr.msk.bf16.mxu1 %vm437_vm2, %v4038_v21  ;;  %4818 = vmatprep.mubr.msk.bf16.mxu0 %vm437_vm2, %v5305_v3 }
 0x127   : > { %4633 = vmatmul.mubr.msk.bf16.gmra.mrb[64].mxu1 %vm437_vm2, %v4039_v27  ;;  %4819 = vmatmul.mubr.msk.bf16.gmra.mrb[28].mxu0 %vm437_vm2, %v5307_v28 }
 0x128   : > { %4636 = vmatprep.mubr.msk.bf16.mxu1 %vm437_vm2, %v4040_v34  ;;  %4822 = vmatprep.mubr.msk.bf16.mxu0 %vm437_vm2, %v5309_v35 }
 0x12f   : > { %4637 = vmatmul.mubr.msk.bf16.gmra.mrb[68].mxu1 %vm437_vm2, %v4041_v37  ;;  %4823 = vmatmul.mubr.msk.bf16.gmra.mrb[32].mxu0 %vm437_vm2, %v5311_v42 }
 0x130   : > { %4678 = vmatprep.mubr.msk.bf16.mxu1 %vm437_vm2, %v5312_v43  ;;  %4826 = vmatprep.mubr.msk.bf16.mxu0 %vm437_vm2, %v5313_v56 }
 0x137   : > { %4679 = vmatmul.mubr.msk.bf16.vlgmr.msra.gmra.mrb[36].mxu1 %vm437_vm2, %v5314_v44  ;;  %4827 = vmatmul.mubr.msk.bf16.gmra.mrb[36].mxu0 %vm437_vm2, %v5315_v45 }
 0x138   : > { %4682 = vmatprep.mubr.msk.bf16.mxu1 %vm437_vm2, %v5316_v17  ;;  %4830 = vmatprep.mubr.msk.bf16.mxu0 %vm437_vm2, %v5317_v51 }
 0x13f   : > { %4683 = vmatmul.mubr.msk.bf16.gmra.mrb[40].mxu1 %vm437_vm2, %v5318_v52  ;;  %4831 = vmatmul.mubr.msk.bf16.gmra.mrb[40].mxu0 %vm437_vm2, %v5319_v54 }
 0x140   : > { %4686 = vmatprep.mubr.msk.bf16.mxu1 %vm437_vm2, %v5320_v55  ;;  %4834 = vmatprep.mubr.msk.bf16.mxu0 %vm437_vm2, %v5321_v61  ;;  %v6175_v61 = vld [vmem:[%s6431_s2] ss:$0 sm:$0xff] }
 0x147   : > { %4687 = vmatmul.mubr.msk.bf16.gmra.mrb[44].mxu1 %vm437_vm2, %v5322_v62  ;;  %4835 = vmatmul.mubr.msk.bf16.gmra.mrb[44].mxu0 %vm437_vm2, %v5323_v0 }
 0x148   : > { %4690 = vmatprep.mubr.msk.bf16.mxu1 %vm437_vm2, %v5324_v1  ;;  %4838 = vmatprep.mubr.msk.bf16.mxu0 %vm437_vm2, %v5325_v8 }
 0x14f   : > { %4691 = vmatmul.mubr.msk.bf16.gmra.mrb[48].mxu1 %vm437_vm2, %v5326_v9  ;;  %4839 = vmatmul.mubr.msk.bf16.gmra.mrb[48].mxu0 %vm437_vm2, %v5327_v10 }
 0x150   : > { %4694 = vmatprep.mubr.msk.bf16.mxu1 %vm437_vm2, %v5328_v16  ;;  %4842 = vmatprep.mubr.msk.bf16.mxu0 %vm437_vm2, %v5329_v30 }
 0x157   : > { %4695 = vmatmul.mubr.msk.bf16.gmra.mrb[52].mxu1 %vm437_vm2, %v5330_v31  ;;  %4843 = vmatmul.mubr.msk.bf16.gmra.mrb[52].mxu0 %vm437_vm2, %v5331_v32 }
 0x158   : > { %4698 = vmatprep.mubr.msk.bf16.mxu1 %vm437_vm2, %v5332_v38  ;;  %4846 = vmatprep.mubr.msk.bf16.mxu0 %vm437_vm2, %v5333_v49 }
 0x15f   : > { %4699 = vmatmul.mubr.msk.bf16.gmra.mrb[56].mxu1 %vm437_vm2, %v5334_v50  ;;  %4847 = vmatmul.mubr.msk.bf16.gmra.mrb[56].mxu0 %vm437_vm2, %v5335_v57 }
 0x160   : > { %4702 = vmatprep.mubr.msk.bf16.mxu1 %vm437_vm2, %v5336_v59  ;;  %4850 = vmatprep.mubr.msk.bf16.mxu0 %vm437_vm2, %v5337_v19 }
 0x167   : > { %4703 = vmatmul.mubr.msk.bf16.gmra.mrb[60].mxu1 %vm437_vm2, %v5338_v40  ;;  %4851 = vmatmul.mubr.msk.bf16.gmra.mrb[60].mxu0 %vm437_vm2, %v5339_v20 }
 0x168   : > { %4706 = vmatprep.mubr.msk.bf16.mxu1 %vm437_vm2, %v5340_v24  ;;  %4854 = vmatprep.mubr.msk.bf16.mxu0 %vm437_vm2, %v5341_v41 }
 0x16f   : > { %4707 = vmatmul.mubr.msk.bf16.gmra.mrb[64].mxu1 %vm437_vm2, %v5342_v5  ;;  %4855 = vmatmul.mubr.msk.bf16.gmra.mrb[64].mxu0 %vm437_vm2, %v5343_v60 }
 0x170   : > { %4710 = vmatprep.mubr.msk.bf16.mxu1 %vm437_vm2, %v5344_v6  ;;  %4858 = vmatprep.mubr.msk.bf16.mxu0 %vm437_vm2, %v5345_v23 }
 0x177   : > { %4711 = vmatmul.mubr.msk.bf16.gmra.mrb[68].mxu1 %vm437_vm2, %v5346_v25  ;;  %4859 = vmatmul.mubr.msk.bf16.gmra.mrb[68].mxu0 %vm437_vm2, %v5347_v39 }
 0x17a   : > { %v4570_v4 = vpop.f32.mrb[0].mxu1 }
 0x17b   : > { %v1066_v13 = vpop.f32.mrb[1].mxu1 }
 0x17c   : > { %v4571_v18 = vpop.f32.mrb[2].mxu1 }
 0x17d   : > { %v1069_v2 = vpop.f32.mrb[3].mxu1 }
 0x182   : > { %v4574_v47 = vpop.f32.mrb[4].mxu1 }
 0x183   : > { %v1082_v53 = vpop.f32.mrb[5].mxu1 }
 0x184   : > { %v4575_v48 = vpop.f32.mrb[6].mxu1 }
 0x185   : > { %v1085_v33 = vpop.f32.mrb[7].mxu1 }
 0x18a   : > { %v6115_v46 = vpop.f32.mrb[8].mxu1 }
 0x18b   : > { %v6117_v58 = vpop.f32.mrb[9].mxu1 }
 0x18c   : > { %v6119_v11 = vpop.f32.mrb[10].mxu1 }
 0x18d   : > { %v6121_v7 = vpop.f32.mrb[11].mxu1 }
 0x192   : > { %v6123_v12 = vpop.f32.mrb[12].mxu1 }
 0x193   : > { %v6125_v14 = vpop.f32.mrb[13].mxu1 }
 0x194   : > { %v6127_v63 = vpop.f32.mrb[14].mxu1 }
 0x195   : > { %v6129_v15 = vpop.f32.mrb[15].mxu1 }
 0x19a   : > { %v6131_v21 = vpop.f32.mrb[16].mxu1 }
 0x19b   : > { %v6133_v3 = vpop.f32.mrb[17].mxu1 }
 0x19c   : > { %v6135_v22 = vpop.f32.mrb[18].mxu1 }
 0x19d   : > { %v6137_v26 = vpop.f32.mrb[19].mxu1 }
 0x1a2   : > { %v6139_v27 = vpop.f32.mrb[20].mxu1 }
 0x1a3   : > { %v6141_v28 = vpop.f32.mrb[21].mxu1 }
 0x1a4   : > { %v6143_v29 = vpop.f32.mrb[22].mxu1 }
 0x1a5   : > { %v6145_v34 = vpop.f32.mrb[23].mxu1 }
 0x1aa   : > { %v6147_v35 = vpop.f32.mrb[24].mxu1 }
 0x1ab   : > { %v6149_v36 = vpop.f32.mrb[25].mxu1 }
 0x1ac   : > { %v6151_v37 = vpop.f32.mrb[26].mxu1 }
 0x1ad   : > { %v6153_v42 = vpop.f32.mrb[27].mxu1 }
 0x1b2   : > { %v6155_v43 = vpop.f32.mrb[28].mxu1 }
 0x1b3   : > { %v6157_v56 = vpop.f32.mrb[29].mxu1 }
 0x1b4   : > { %v6159_v44 = vpop.f32.mrb[30].mxu1 }
 0x1b5   : > { %v6161_v45 = vpop.f32.mrb[31].mxu1 }
 0x1ba   : > { %v6163_v17 = vpop.f32.mrb[32].mxu1 }
 0x1bb   : > { %v6165_v51 = vpop.f32.mrb[33].mxu1 }
 0x1bc   : > { %v6167_v52 = vpop.f32.mrb[34].mxu1 }
 0x1bd   : > { %v6169_v54 = vpop.f32.mrb[35].mxu1 }
 0x1c2   : > { %v4792_v55 = vpop.f32.mrb[0].mxu0 }
 0x1c3   : > { %v4864_v62 = vadd.f32 %v4792_v55, %v4570_v4  ;;  %v3286_v0 = vpop.f32.mrb[1].mxu0 }
 0x1c4   : > { %v4865_v1 = vadd.f32 %v3286_v0, %v1066_v13  ;;  %v4793_v8 = vpop.f32.mrb[2].mxu0 }
 0x1c5   : > { %v3654_v9 = vadd.f32 %v4864_v62, %v6175_v61  ;;  %v4866_v10 = vadd.f32 %v4793_v8, %v4571_v18  ;;  %v3289_v16 = vpop.f32.mrb[3].mxu0 }
 0x1c6   : > { %v3652_v30 = vadd.f32 %v4865_v1, %v6175_v61  ;;  %v4867_v31 = vadd.f32 %v3289_v16, %v1069_v2 }
 0x1c7   : > { %v3726_v32 = vmax.f32 %v3654_v9, 0.0  ;;  %v3655_v38 = vadd.f32 %v4866_v10, %v6175_v61 }
 0x1c8   : > { %v3724_v49 = vmax.f32 %v3652_v30, 0.0  ;;  %v3653_v50 = vadd.f32 %v4867_v31, %v6175_v61 }
 0x1c9   : > { %3799 = vst.msk [vmem:[%s6181_s6 + $0x10] sm:$0xff] %vm3796_vm3, %v3726_v32  ;;  %v3727_v57 = vmax.f32 %v3655_v38, 0.0 }
 0x1ca   : > { %3797 = vst.msk [vmem:[%s6181_s6] sm:$0xff] %vm3796_vm3, %v3724_v49  ;;  %v3725_v59 = vmax.f32 %v3653_v50, 0.0  ;;  %v4796_v19 = vpop.f32.mrb[4].mxu0 }
 0x1cb   : > { %3800 = vst.msk [vmem:[%s6181_s6 + $0x18] sm:$0xff] %vm3796_vm3, %v3727_v57  ;;  %v4868_v40 = vadd.f32 %v4796_v19, %v4574_v47  ;;  %v3302_v20 = vpop.f32.mrb[5].mxu0 }
 0x1cc   : > { %3798 = vst.msk [vmem:[%s6181_s6 + $0x8] sm:$0xff] %vm3796_vm3, %v3725_v59  ;;  %v4869_v24 = vadd.f32 %v3302_v20, %v1082_v53  ;;  %v4797_v41 = vpop.f32.mrb[6].mxu0 }
 0x1cd   : > { %v3658_v5 = vadd.f32 %v4868_v40, %v6175_v61  ;;  %v4870_v60 = vadd.f32 %v4797_v41, %v4575_v48  ;;  %v3305_v6 = vpop.f32.mrb[7].mxu0 }
 0x1ce   : > { %v3656_v23 = vadd.f32 %v4869_v24, %v6175_v61  ;;  %v4871_v25 = vadd.f32 %v3305_v6, %v1085_v33 }
 0x1cf   : > { %v3730_v39 = vmax.f32 %v3658_v5, 0.0  ;;  %v3659_v4 = vadd.f32 %v4870_v60, %v6175_v61 }
 0x1d0   : > { %v3728_v13 = vmax.f32 %v3656_v23, 0.0  ;;  %v3657_v18 = vadd.f32 %v4871_v25, %v6175_v61 }
 0x1d1   : > { %3803 = vst.msk [vmem:[%s6181_s6 + $0x30] sm:$0xff] %vm3796_vm3, %v3730_v39  ;;  %v3731_v2 = vmax.f32 %v3659_v4, 0.0 }
 0x1d2   : > { %3801 = vst.msk [vmem:[%s6181_s6 + $0x20] sm:$0xff] %vm3796_vm3, %v3728_v13  ;;  %v3729_v47 = vmax.f32 %v3657_v18, 0.0  ;;  %v4800_v53 = vpop.f32.mrb[8].mxu0 }
 0x1d3   : > { %3804 = vst.msk [vmem:[%s6181_s6 + $0x38] sm:$0xff] %vm3796_vm3, %v3731_v2  ;;  %v4872_v48 = vadd.f32 %v4800_v53, %v6115_v46  ;;  %v3318_v33 = vpop.f32.mrb[9].mxu0 }
 0x1d4   : > { %3802 = vst.msk [vmem:[%s6181_s6 + $0x28] sm:$0xff] %vm3796_vm3, %v3729_v47  ;;  %v4873_v55 = vadd.f32 %v3318_v33, %v6117_v58  ;;  %v4801_v62 = vpop.f32.mrb[10].mxu0 }
 0x1d5   : > { %v3662_v0 = vadd.f32 %v4872_v48, %v6175_v61  ;;  %v4874_v1 = vadd.f32 %v4801_v62, %v6119_v11  ;;  %v3321_v8 = vpop.f32.mrb[11].mxu0 }
 0x1d6   : > { %v3660_v9 = vadd.f32 %v4873_v55, %v6175_v61  ;;  %v4875_v10 = vadd.f32 %v3321_v8, %v6121_v7 }
 0x1d7   : > { %v3734_v16 = vmax.f32 %v3662_v0, 0.0  ;;  %v3663_v46 = vadd.f32 %v4874_v1, %v6175_v61 }
 0x1d8   : > { %v3732_v30 = vmax.f32 %v3660_v9, 0.0  ;;  %v3661_v31 = vadd.f32 %v4875_v10, %v6175_v61 }
 0x1d9   : > { %3807 = vst.msk [vmem:[%s6181_s6 + $0x50] sm:$0xff] %vm3796_vm3, %v3734_v16  ;;  %v3735_v58 = vmax.f32 %v3663_v46, 0.0 }
 0x1da   : > { %3805 = vst.msk [vmem:[%s6181_s6 + $0x40] sm:$0xff] %vm3796_vm3, %v3732_v30  ;;  %v3733_v32 = vmax.f32 %v3661_v31, 0.0  ;;  %v4804_v38 = vpop.f32.mrb[12].mxu0 }
 0x1db   : > { %3808 = vst.msk [vmem:[%s6181_s6 + $0x58] sm:$0xff] %vm3796_vm3, %v3735_v58  ;;  %v4876_v11 = vadd.f32 %v4804_v38, %v6123_v12  ;;  %v3334_v7 = vpop.f32.mrb[13].mxu0 }
 0x1dc   : > { %3806 = vst.msk [vmem:[%s6181_s6 + $0x48] sm:$0xff] %vm3796_vm3, %v3733_v32  ;;  %v4877_v49 = vadd.f32 %v3334_v7, %v6125_v14  ;;  %v4805_v50 = vpop.f32.mrb[14].mxu0 }
 0x1dd   : > { %v3666_v57 = vadd.f32 %v4876_v11, %v6175_v61  ;;  %v4878_v59 = vadd.f32 %v4805_v50, %v6127_v63  ;;  %v3337_v19 = vpop.f32.mrb[15].mxu0 }
 0x1de   : > { %v3664_v40 = vadd.f32 %v4877_v49, %v6175_v61  ;;  %v4879_v20 = vadd.f32 %v3337_v19, %v6129_v15 }
 0x1df   : > { %v3738_v24 = vmax.f32 %v3666_v57, 0.0  ;;  %v3667_v12 = vadd.f32 %v4878_v59, %v6175_v61 }
 0x1e0   : > { %v3736_v41 = vmax.f32 %v3664_v40, 0.0  ;;  %v3665_v5 = vadd.f32 %v4879_v20, %v6175_v61 }
 0x1e1   : > { %3811 = vst.msk [vmem:[%s6181_s6 + $0x70] sm:$0xff] %vm3796_vm3, %v3738_v24  ;;  %v3739_v14 = vmax.f32 %v3667_v12, 0.0 }
 0x1e2   : > { %3809 = vst.msk [vmem:[%s6181_s6 + $0x60] sm:$0xff] %vm3796_vm3, %v3736_v41  ;;  %v3737_v60 = vmax.f32 %v3665_v5, 0.0  ;;  %v4808_v6 = vpop.f32.mrb[16].mxu0 }
 0x1e3   : > { %3812 = vst.msk [vmem:[%s6181_s6 + $0x78] sm:$0xff] %vm3796_vm3, %v3739_v14  ;;  %v4880_v63 = vadd.f32 %v4808_v6, %v6131_v21  ;;  %v3350_v15 = vpop.f32.mrb[17].mxu0 }
 0x1e4   : > { %3810 = vst.msk [vmem:[%s6181_s6 + $0x68] sm:$0xff] %vm3796_vm3, %v3737_v60  ;;  %v4881_v23 = vadd.f32 %v3350_v15, %v6133_v3  ;;  %v4809_v25 = vpop.f32.mrb[18].mxu0 }
 0x1e5   : > { %v3670_v39 = vadd.f32 %v4880_v63, %v6175_v61  ;;  %v4882_v4 = vadd.f32 %v4809_v25, %v6135_v22  ;;  %v3353_v13 = vpop.f32.mrb[19].mxu0 }
 0x1e6   : > { %v3668_v18 = vadd.f32 %v4881_v23, %v6175_v61  ;;  %v4883_v2 = vadd.f32 %v3353_v13, %v6137_v26 }
 0x1e7   : > { %v3742_v47 = vmax.f32 %v3670_v39, 0.0  ;;  %v3671_v21 = vadd.f32 %v4882_v4, %v6175_v61 }
 0x1e8   : > { %v3740_v53 = vmax.f32 %v3668_v18, 0.0  ;;  %v3669_v48 = vadd.f32 %v4883_v2, %v6175_v61 }
 0x1e9   : > { %3815 = vst.msk [vmem:[%s6181_s6 + $0x90] sm:$0xff] %vm3796_vm3, %v3742_v47  ;;  %v3743_v3 = vmax.f32 %v3671_v21, 0.0 }
 0x1ea   : > { %3813 = vst.msk [vmem:[%s6181_s6 + $0x80] sm:$0xff] %vm3796_vm3, %v3740_v53  ;;  %v3741_v33 = vmax.f32 %v3669_v48, 0.0  ;;  %v4812_v55 = vpop.f32.mrb[20].mxu0 }
 0x1eb   : > { %3816 = vst.msk [vmem:[%s6181_s6 + $0x98] sm:$0xff] %vm3796_vm3, %v3743_v3  ;;  %v4884_v22 = vadd.f32 %v4812_v55, %v6139_v27  ;;  %v3366_v26 = vpop.f32.mrb[21].mxu0 }
 0x1ec   : > { %3814 = vst.msk [vmem:[%s6181_s6 + $0x88] sm:$0xff] %vm3796_vm3, %v3741_v33  ;;  %v4885_v62 = vadd.f32 %v3366_v26, %v6141_v28  ;;  %v4813_v0 = vpop.f32.mrb[22].mxu0 }
 0x1ed   : > { %v3674_v1 = vadd.f32 %v4884_v22, %v6175_v61  ;;  %v4886_v8 = vadd.f32 %v4813_v0, %v6143_v29  ;;  %v3369_v9 = vpop.f32.mrb[23].mxu0 }
 0x1ee   : > { %v3672_v10 = vadd.f32 %v4885_v62, %v6175_v61  ;;  %v4887_v16 = vadd.f32 %v3369_v9, %v6145_v34 }
 0x1ef   : > { %v3746_v46 = vmax.f32 %v3674_v1, 0.0  ;;  %v3675_v27 = vadd.f32 %v4886_v8, %v6175_v61 }
 0x1f0   : > { %v3744_v30 = vmax.f32 %v3672_v10, 0.0  ;;  %v3673_v31 = vadd.f32 %v4887_v16, %v6175_v61 }
 0x1f1   : > { %3819 = vst.msk [vmem:[%s6181_s6 + $0xb0] sm:$0xff] %vm3796_vm3, %v3746_v46  ;;  %v3747_v28 = vmax.f32 %v3675_v27, 0.0 }
 0x1f2   : > { %3817 = vst.msk [vmem:[%s6181_s6 + $0xa0] sm:$0xff] %vm3796_vm3, %v3744_v30  ;;  %v3745_v58 = vmax.f32 %v3673_v31, 0.0  ;;  %v4816_v32 = vpop.f32.mrb[24].mxu0 }
 0x1f3   : > { %3820 = vst.msk [vmem:[%s6181_s6 + $0xb8] sm:$0xff] %vm3796_vm3, %v3747_v28  ;;  %v4888_v29 = vadd.f32 %v4816_v32, %v6147_v35  ;;  %v3382_v34 = vpop.f32.mrb[25].mxu0 }
 0x1f4   : > { %3818 = vst.msk [vmem:[%s6181_s6 + $0xa8] sm:$0xff] %vm3796_vm3, %v3745_v58  ;;  %v4889_v38 = vadd.f32 %v3382_v34, %v6149_v36  ;;  %v4817_v11 = vpop.f32.mrb[26].mxu0 }
 0x1f5   : > { %v3678_v7 = vadd.f32 %v4888_v29, %v6175_v61  ;;  %v4890_v49 = vadd.f32 %v4817_v11, %v6151_v37  ;;  %v3385_v50 = vpop.f32.mrb[27].mxu0 }
 0x1f6   : > { %v3676_v57 = vadd.f32 %v4889_v38, %v6175_v61  ;;  %v4891_v59 = vadd.f32 %v3385_v50, %v6153_v42 }
 0x1f7   : > { %v3750_v19 = vmax.f32 %v3678_v7, 0.0  ;;  %v3679_v35 = vadd.f32 %v4890_v49, %v6175_v61 }
 0x1f8   : > { %v3748_v40 = vmax.f32 %v3676_v57, 0.0  ;;  %v3677_v20 = vadd.f32 %v4891_v59, %v6175_v61 }
 0x1f9   : > { %3823 = vst.msk [vmem:[%s6181_s6 + $0xd0] sm:$0xff] %vm3796_vm3, %v3750_v19  ;;  %v3751_v36 = vmax.f32 %v3679_v35, 0.0 }
 0x1fa   : > { %3821 = vst.msk [vmem:[%s6181_s6 + $0xc0] sm:$0xff] %vm3796_vm3, %v3748_v40  ;;  %v3749_v24 = vmax.f32 %v3677_v20, 0.0  ;;  %v4820_v12 = vpop.f32.mrb[28].mxu0 }
 0x1fb   : > { %3824 = vst.msk [vmem:[%s6181_s6 + $0xd8] sm:$0xff] %vm3796_vm3, %v3751_v36  ;;  %v4892_v37 = vadd.f32 %v4820_v12, %v6155_v43  ;;  %v3398_v42 = vpop.f32.mrb[29].mxu0 }
 0x1fc   : > { %3822 = vst.msk [vmem:[%s6181_s6 + $0xc8] sm:$0xff] %vm3796_vm3, %v3749_v24  ;;  %v4893_v41 = vadd.f32 %v3398_v42, %v6157_v56  ;;  %v4821_v5 = vpop.f32.mrb[30].mxu0 }
 0x1fd   : > { %v3682_v14 = vadd.f32 %v4892_v37, %v6175_v61  ;;  %v4894_v60 = vadd.f32 %v4821_v5, %v6159_v44  ;;  %v3401_v6 = vpop.f32.mrb[31].mxu0 }
 0x1fe   : > { %v3680_v63 = vadd.f32 %v4893_v41, %v6175_v61  ;;  %v4895_v15 = vadd.f32 %v3401_v6, %v6161_v45 }
 0x1ff   : > { %v3754_v23 = vmax.f32 %v3682_v14, 0.0  ;;  %v3683_v43 = vadd.f32 %v4894_v60, %v6175_v61 }
 0x200   : > { %v3752_v25 = vmax.f32 %v3680_v63, 0.0  ;;  %v3681_v39 = vadd.f32 %v4895_v15, %v6175_v61 }
 0x201   : > { %3827 = vst.msk [vmem:[%s6181_s6 + $0xf0] sm:$0xff] %vm3796_vm3, %v3754_v23  ;;  %v3755_v56 = vmax.f32 %v3683_v43, 0.0 }
 0x202   : > { %3825 = vst.msk [vmem:[%s6181_s6 + $0xe0] sm:$0xff] %vm3796_vm3, %v3752_v25  ;;  %v3753_v4 = vmax.f32 %v3681_v39, 0.0  ;;  %v4824_v13 = vpop.f32.mrb[32].mxu0 }
 0x203   : > { %3828 = vst.msk [vmem:[%s6181_s6 + $0xf8] sm:$0xff] %vm3796_vm3, %v3755_v56  ;;  %v4896_v44 = vadd.f32 %v4824_v13, %v6163_v17  ;;  %v3414_v18 = vpop.f32.mrb[33].mxu0 }
 0x204   : > { %3826 = vst.msk [vmem:[%s6181_s6 + $0xe8] sm:$0xff] %vm3796_vm3, %v3753_v4  ;;  %v4897_v45 = vadd.f32 %v3414_v18, %v6165_v51  ;;  %v4825_v2 = vpop.f32.mrb[34].mxu0 }
 0x205   : > { %v3686_v47 = vadd.f32 %v4896_v44, %v6175_v61  ;;  %v4898_v21 = vadd.f32 %v4825_v2, %v6167_v52  ;;  %v3417_v53 = vpop.f32.mrb[35].mxu0 }
 0x206   : > { %v3684_v48 = vadd.f32 %v4897_v45, %v6175_v61  ;;  %v4899_v3 = vadd.f32 %v3417_v53, %v6169_v54 }
 0x207   : > { %v3758_v33 = vmax.f32 %v3686_v47, 0.0  ;;  %v3687_v17 = vadd.f32 %v4898_v21, %v6175_v61 }
 0x208   : > { %v3756_v55 = vmax.f32 %v3684_v48, 0.0  ;;  %v3685_v22 = vadd.f32 %v4899_v3, %v6175_v61 }
 0x209   : > { %3831 = vst.msk [vmem:[%s6181_s6 + $0x110] sm:$0xff] %vm3796_vm3, %v3758_v33  ;;  %v3759_v51 = vmax.f32 %v3687_v17, 0.0 }
 0x20a   : > { %v4680_v26 = vpop.f32.mrb[36].mxu1  ;;  %3829 = vst.msk [vmem:[%s6181_s6 + $0x100] sm:$0xff] %vm3796_vm3, %v3756_v55  ;;  %v3757_v62 = vmax.f32 %v3685_v22, 0.0  ;;  %v4828_v52 = vpop.f32.mrb[36].mxu0 }
 0x20b   : > { %v1902_v0 = vpop.f32.mrb[37].mxu1  ;;  %3832 = vst.msk [vmem:[%s6181_s6 + $0x118] sm:$0xff] %vm3796_vm3, %v3759_v51  ;;  %v4900_v1 = vadd.f32 %v4828_v52, %v4680_v26  ;;  %v3430_v54 = vpop.f32.mrb[37].mxu0 }
 0x20c   : > { %v4681_v8 = vpop.f32.mrb[38].mxu1  ;;  %3830 = vst.msk [vmem:[%s6181_s6 + $0x108] sm:$0xff] %vm3796_vm3, %v3757_v62  ;;  %v4901_v9 = vadd.f32 %v3430_v54, %v1902_v0  ;;  %v4829_v10 = vpop.f32.mrb[38].mxu0 }
 0x20d   : > { %v1905_v16 = vpop.f32.mrb[39].mxu1  ;;  %v3690_v46 = vadd.f32 %v4900_v1, %v6175_v61  ;;  %v4902_v27 = vadd.f32 %v4829_v10, %v4681_v8  ;;  %v3433_v30 = vpop.f32.mrb[39].mxu0 }
 0x20e   : > { %v3688_v31 = vadd.f32 %v4901_v9, %v6175_v61  ;;  %v4903_v28 = vadd.f32 %v3433_v30, %v1905_v16 }
 0x20f   : > { %v3762_v58 = vmax.f32 %v3690_v46, 0.0  ;;  %v3691_v32 = vadd.f32 %v4902_v27, %v6175_v61 }
 0x210   : > { %v3760_v29 = vmax.f32 %v3688_v31, 0.0  ;;  %v3689_v34 = vadd.f32 %v4903_v28, %v6175_v61 }
 0x211   : > { %3835 = vst.msk [vmem:[%s6181_s6 + $0x130] sm:$0xff] %vm3796_vm3, %v3762_v58  ;;  %v3763_v38 = vmax.f32 %v3691_v32, 0.0 }
 0x212   : > { %v4684_v11 = vpop.f32.mrb[40].mxu1  ;;  %3833 = vst.msk [vmem:[%s6181_s6 + $0x120] sm:$0xff] %vm3796_vm3, %v3760_v29  ;;  %v3761_v7 = vmax.f32 %v3689_v34, 0.0  ;;  %v4832_v49 = vpop.f32.mrb[40].mxu0 }
 0x213   : > { %v1918_v50 = vpop.f32.mrb[41].mxu1  ;;  %3836 = vst.msk [vmem:[%s6181_s6 + $0x138] sm:$0xff] %vm3796_vm3, %v3763_v38  ;;  %v4904_v57 = vadd.f32 %v4832_v49, %v4684_v11  ;;  %v3446_v59 = vpop.f32.mrb[41].mxu0 }
 0x214   : > { %v4685_v19 = vpop.f32.mrb[42].mxu1  ;;  %3834 = vst.msk [vmem:[%s6181_s6 + $0x128] sm:$0xff] %vm3796_vm3, %v3761_v7  ;;  %v4905_v35 = vadd.f32 %v3446_v59, %v1918_v50  ;;  %v4833_v40 = vpop.f32.mrb[42].mxu0 }
 0x215   : > { %v1921_v20 = vpop.f32.mrb[43].mxu1  ;;  %v3694_v36 = vadd.f32 %v4904_v57, %v6175_v61  ;;  %v4906_v24 = vadd.f32 %v4833_v40, %v4685_v19  ;;  %v3449_v12 = vpop.f32.mrb[43].mxu0 }
 0x216   : > { %v3692_v37 = vadd.f32 %v4905_v35, %v6175_v61  ;;  %v4907_v42 = vadd.f32 %v3449_v12, %v1921_v20 }
 0x217   : > { %v3766_v41 = vmax.f32 %v3694_v36, 0.0  ;;  %v3695_v5 = vadd.f32 %v4906_v24, %v6175_v61 }
 0x218   : > { %v3764_v14 = vmax.f32 %v3692_v37, 0.0  ;;  %v3693_v60 = vadd.f32 %v4907_v42, %v6175_v61 }
 0x219   : > { %3839 = vst.msk [vmem:[%s6181_s6 + $0x150] sm:$0xff] %vm3796_vm3, %v3766_v41  ;;  %v3767_v6 = vmax.f32 %v3695_v5, 0.0 }
 0x21a   : > { %v4688_v63 = vpop.f32.mrb[44].mxu1  ;;  %3837 = vst.msk [vmem:[%s6181_s6 + $0x140] sm:$0xff] %vm3796_vm3, %v3764_v14  ;;  %v3765_v15 = vmax.f32 %v3693_v60, 0.0  ;;  %v4836_v23 = vpop.f32.mrb[44].mxu0 }
 0x21b   : > { %v1934_v43 = vpop.f32.mrb[45].mxu1  ;;  %3840 = vst.msk [vmem:[%s6181_s6 + $0x158] sm:$0xff] %vm3796_vm3, %v3767_v6  ;;  %v4908_v25 = vadd.f32 %v4836_v23, %v4688_v63  ;;  %v3462_v39 = vpop.f32.mrb[45].mxu0 }
 0x21c   : > { %v4689_v56 = vpop.f32.mrb[46].mxu1  ;;  %3838 = vst.msk [vmem:[%s6181_s6 + $0x148] sm:$0xff] %vm3796_vm3, %v3765_v15  ;;  %v4909_v4 = vadd.f32 %v3462_v39, %v1934_v43  ;;  %v4837_v13 = vpop.f32.mrb[46].mxu0 }
 0x21d   : > { %v1937_v44 = vpop.f32.mrb[47].mxu1  ;;  %v3698_v18 = vadd.f32 %v4908_v25, %v6175_v61  ;;  %v4910_v45 = vadd.f32 %v4837_v13, %v4689_v56  ;;  %v3465_v2 = vpop.f32.mrb[47].mxu0 }
 0x21e   : > { %v3696_v47 = vadd.f32 %v4909_v4, %v6175_v61  ;;  %v4911_v21 = vadd.f32 %v3465_v2, %v1937_v44 }
 0x21f   : > { %v3770_v53 = vmax.f32 %v3698_v18, 0.0  ;;  %v3699_v48 = vadd.f32 %v4910_v45, %v6175_v61 }
 0x220   : > { %v3768_v3 = vmax.f32 %v3696_v47, 0.0  ;;  %v3697_v33 = vadd.f32 %v4911_v21, %v6175_v61 }
 0x221   : > { %3843 = vst.msk [vmem:[%s6181_s6 + $0x170] sm:$0xff] %vm3796_vm3, %v3770_v53  ;;  %v3771_v17 = vmax.f32 %v3699_v48, 0.0 }
 0x222   : > { %v4692_v55 = vpop.f32.mrb[48].mxu1  ;;  %3841 = vst.msk [vmem:[%s6181_s6 + $0x160] sm:$0xff] %vm3796_vm3, %v3768_v3  ;;  %v3769_v22 = vmax.f32 %v3697_v33, 0.0  ;;  %v4840_v51 = vpop.f32.mrb[48].mxu0 }
 0x223   : > { %v1950_v26 = vpop.f32.mrb[49].mxu1  ;;  %3844 = vst.msk [vmem:[%s6181_s6 + $0x178] sm:$0xff] %vm3796_vm3, %v3771_v17  ;;  %v4912_v62 = vadd.f32 %v4840_v51, %v4692_v55  ;;  %v3478_v52 = vpop.f32.mrb[49].mxu0 }
 0x224   : > { %v4693_v0 = vpop.f32.mrb[50].mxu1  ;;  %3842 = vst.msk [vmem:[%s6181_s6 + $0x168] sm:$0xff] %vm3796_vm3, %v3769_v22  ;;  %v4913_v1 = vadd.f32 %v3478_v52, %v1950_v26  ;;  %v4841_v54 = vpop.f32.mrb[50].mxu0 }
 0x225   : > { %v1953_v8 = vpop.f32.mrb[51].mxu1  ;;  %v3702_v9 = vadd.f32 %v4912_v62, %v6175_v61  ;;  %v4914_v10 = vadd.f32 %v4841_v54, %v4693_v0  ;;  %v3481_v16 = vpop.f32.mrb[51].mxu0 }
 0x226   : > { %v3700_v46 = vadd.f32 %v4913_v1, %v6175_v61  ;;  %v4915_v27 = vadd.f32 %v3481_v16, %v1953_v8 }
 0x227   : > { %v3774_v30 = vmax.f32 %v3702_v9, 0.0  ;;  %v3703_v31 = vadd.f32 %v4914_v10, %v6175_v61 }
 0x228   : > { %v3772_v28 = vmax.f32 %v3700_v46, 0.0  ;;  %v3701_v58 = vadd.f32 %v4915_v27, %v6175_v61 }
 0x229   : > { %3847 = vst.msk [vmem:[%s6181_s6 + $0x190] sm:$0xff] %vm3796_vm3, %v3774_v30  ;;  %v3775_v32 = vmax.f32 %v3703_v31, 0.0 }
 0x22a   : > { %v4696_v29 = vpop.f32.mrb[52].mxu1  ;;  %3845 = vst.msk [vmem:[%s6181_s6 + $0x180] sm:$0xff] %vm3796_vm3, %v3772_v28  ;;  %v3773_v34 = vmax.f32 %v3701_v58, 0.0  ;;  %v4844_v38 = vpop.f32.mrb[52].mxu0 }
 0x22b   : > { %v1966_v11 = vpop.f32.mrb[53].mxu1  ;;  %3848 = vst.msk [vmem:[%s6181_s6 + $0x198] sm:$0xff] %vm3796_vm3, %v3775_v32  ;;  %v4916_v7 = vadd.f32 %v4844_v38, %v4696_v29  ;;  %v3494_v49 = vpop.f32.mrb[53].mxu0 }
 0x22c   : > { %v4697_v50 = vpop.f32.mrb[54].mxu1  ;;  %3846 = vst.msk [vmem:[%s6181_s6 + $0x188] sm:$0xff] %vm3796_vm3, %v3773_v34  ;;  %v4917_v57 = vadd.f32 %v3494_v49, %v1966_v11  ;;  %v4845_v59 = vpop.f32.mrb[54].mxu0 }
 0x22d   : > { %v1969_v19 = vpop.f32.mrb[55].mxu1  ;;  %v3706_v35 = vadd.f32 %v4916_v7, %v6175_v61  ;;  %v4918_v40 = vadd.f32 %v4845_v59, %v4697_v50  ;;  %v3497_v20 = vpop.f32.mrb[55].mxu0 }
 0x22e   : > { %v3704_v36 = vadd.f32 %v4917_v57, %v6175_v61  ;;  %v4919_v24 = vadd.f32 %v3497_v20, %v1969_v19 }
 0x22f   : > { %v3778_v12 = vmax.f32 %v3706_v35, 0.0  ;;  %v3707_v37 = vadd.f32 %v4918_v40, %v6175_v61 }
 0x230   : > { %v3776_v42 = vmax.f32 %v3704_v36, 0.0  ;;  %v3705_v41 = vadd.f32 %v4919_v24, %v6175_v61 }
 0x231   : > { %3851 = vst.msk [vmem:[%s6181_s6 + $0x1b0] sm:$0xff] %vm3796_vm3, %v3778_v12  ;;  %v3779_v5 = vmax.f32 %v3707_v37, 0.0 }
 0x232   : > { %v4700_v14 = vpop.f32.mrb[56].mxu1  ;;  %3849 = vst.msk [vmem:[%s6181_s6 + $0x1a0] sm:$0xff] %vm3796_vm3, %v3776_v42  ;;  %v3777_v60 = vmax.f32 %v3705_v41, 0.0  ;;  %v4848_v6 = vpop.f32.mrb[56].mxu0 }
 0x233   : > { %v1982_v63 = vpop.f32.mrb[57].mxu1  ;;  %3852 = vst.msk [vmem:[%s6181_s6 + $0x1b8] sm:$0xff] %vm3796_vm3, %v3779_v5  ;;  %v4920_v15 = vadd.f32 %v4848_v6, %v4700_v14  ;;  %v3510_v23 = vpop.f32.mrb[57].mxu0 }
 0x234   : > { %v4701_v43 = vpop.f32.mrb[58].mxu1  ;;  %3850 = vst.msk [vmem:[%s6181_s6 + $0x1a8] sm:$0xff] %vm3796_vm3, %v3777_v60  ;;  %v4921_v25 = vadd.f32 %v3510_v23, %v1982_v63  ;;  %v4849_v39 = vpop.f32.mrb[58].mxu0 }
 0x235   : > { %v1985_v56 = vpop.f32.mrb[59].mxu1  ;;  %v3710_v4 = vadd.f32 %v4920_v15, %v6175_v61  ;;  %v4922_v13 = vadd.f32 %v4849_v39, %v4701_v43  ;;  %v3513_v44 = vpop.f32.mrb[59].mxu0 }
 0x236   : > { %v3708_v18 = vadd.f32 %v4921_v25, %v6175_v61  ;;  %v4923_v45 = vadd.f32 %v3513_v44, %v1985_v56 }
 0x237   : > { %v3782_v2 = vmax.f32 %v3710_v4, 0.0  ;;  %v3711_v47 = vadd.f32 %v4922_v13, %v6175_v61 }
 0x238   : > { %v3780_v21 = vmax.f32 %v3708_v18, 0.0  ;;  %v3709_v53 = vadd.f32 %v4923_v45, %v6175_v61 }
 0x239   : > { %3855 = vst.msk [vmem:[%s6181_s6 + $0x1d0] sm:$0xff] %vm3796_vm3, %v3782_v2  ;;  %v3783_v48 = vmax.f32 %v3711_v47, 0.0 }
 0x23a   : > { %v4704_v3 = vpop.f32.mrb[60].mxu1  ;;  %3853 = vst.msk [vmem:[%s6181_s6 + $0x1c0] sm:$0xff] %vm3796_vm3, %v3780_v21  ;;  %v3781_v33 = vmax.f32 %v3709_v53, 0.0  ;;  %v4852_v17 = vpop.f32.mrb[60].mxu0 }
 0x23b   : > { %v1998_v55 = vpop.f32.mrb[61].mxu1  ;;  %3856 = vst.msk [vmem:[%s6181_s6 + $0x1d8] sm:$0xff] %vm3796_vm3, %v3783_v48  ;;  %v4924_v22 = vadd.f32 %v4852_v17, %v4704_v3  ;;  %v3526_v51 = vpop.f32.mrb[61].mxu0 }
 0x23c   : > { %v4705_v26 = vpop.f32.mrb[62].mxu1  ;;  %3854 = vst.msk [vmem:[%s6181_s6 + $0x1c8] sm:$0xff] %vm3796_vm3, %v3781_v33  ;;  %v4925_v62 = vadd.f32 %v3526_v51, %v1998_v55  ;;  %v4853_v52 = vpop.f32.mrb[62].mxu0 }
 0x23d   : > { %v2001_v0 = vpop.f32.mrb[63].mxu1  ;;  %v3714_v1 = vadd.f32 %v4924_v22, %v6175_v61  ;;  %v4926_v54 = vadd.f32 %v4853_v52, %v4705_v26  ;;  %v3529_v8 = vpop.f32.mrb[63].mxu0 }
 0x23e   : > { %v3712_v9 = vadd.f32 %v4925_v62, %v6175_v61  ;;  %v4927_v10 = vadd.f32 %v3529_v8, %v2001_v0 }
 0x23f   : > { %v3786_v16 = vmax.f32 %v3714_v1, 0.0  ;;  %v3715_v46 = vadd.f32 %v4926_v54, %v6175_v61 }
 0x240   : > { %v3784_v27 = vmax.f32 %v3712_v9, 0.0  ;;  %v3713_v30 = vadd.f32 %v4927_v10, %v6175_v61 }
 0x241   : > { %3859 = vst.msk [vmem:[%s6181_s6 + $0x1f0] sm:$0xff] %vm3796_vm3, %v3786_v16  ;;  %v3787_v31 = vmax.f32 %v3715_v46, 0.0 }
 0x242   : > { %v4708_v28 = vpop.f32.mrb[64].mxu1  ;;  %3857 = vst.msk [vmem:[%s6181_s6 + $0x1e0] sm:$0xff] %vm3796_vm3, %v3784_v27  ;;  %v3785_v58 = vmax.f32 %v3713_v30, 0.0  ;;  %v4856_v32 = vpop.f32.mrb[64].mxu0 }
 0x243   : > { %v2014_v29 = vpop.f32.mrb[65].mxu1  ;;  %3860 = vst.msk [vmem:[%s6181_s6 + $0x1f8] sm:$0xff] %vm3796_vm3, %v3787_v31  ;;  %v4928_v34 = vadd.f32 %v4856_v32, %v4708_v28  ;;  %v3542_v38 = vpop.f32.mrb[65].mxu0 }
 0x244   : > { %v4709_v11 = vpop.f32.mrb[66].mxu1  ;;  %3858 = vst.msk [vmem:[%s6181_s6 + $0x1e8] sm:$0xff] %vm3796_vm3, %v3785_v58  ;;  %v4929_v7 = vadd.f32 %v3542_v38, %v2014_v29  ;;  %v4857_v49 = vpop.f32.mrb[66].mxu0 }
 0x245   : > { %v2017_v50 = vpop.f32.mrb[67].mxu1  ;;  %v3718_v57 = vadd.f32 %v4928_v34, %v6175_v61  ;;  %v4930_v59 = vadd.f32 %v4857_v49, %v4709_v11  ;;  %v3545_v19 = vpop.f32.mrb[67].mxu0 }
 0x246   : > { %v3716_v35 = vadd.f32 %v4929_v7, %v6175_v61  ;;  %v4931_v40 = vadd.f32 %v3545_v19, %v2017_v50 }
 0x247   : > { %v3790_v20 = vmax.f32 %v3718_v57, 0.0  ;;  %v3719_v36 = vadd.f32 %v4930_v59, %v6175_v61 }
 0x248   : > { %v3788_v24 = vmax.f32 %v3716_v35, 0.0  ;;  %v3717_v12 = vadd.f32 %v4931_v40, %v6175_v61 }
 0x249   : > { %3863 = vst.msk [vmem:[%s6181_s6 + $0x210] sm:$0xff] %vm3796_vm3, %v3790_v20  ;;  %v3791_v37 = vmax.f32 %v3719_v36, 0.0 }
 0x24a   : > { %v4712_v42 = vpop.f32.mrb[68].mxu1  ;;  %3861 = vst.msk [vmem:[%s6181_s6 + $0x200] sm:$0xff] %vm3796_vm3, %v3788_v24  ;;  %v3789_v41 = vmax.f32 %v3717_v12, 0.0  ;;  %v4860_v5 = vpop.f32.mrb[68].mxu0 }
 0x24b   : > { %v2030_v14 = vpop.f32.mrb[69].mxu1  ;;  %3864 = vst.msk [vmem:[%s6181_s6 + $0x218] sm:$0xff] %vm3796_vm3, %v3791_v37  ;;  %v4932_v60 = vadd.f32 %v4860_v5, %v4712_v42  ;;  %v3558_v6 = vpop.f32.mrb[69].mxu0 }
 0x24c   : > { %v4713_v63 = vpop.f32.mrb[70].mxu1  ;;  %3862 = vst.msk [vmem:[%s6181_s6 + $0x208] sm:$0xff] %vm3796_vm3, %v3789_v41  ;;  %v4933_v15 = vadd.f32 %v3558_v6, %v2030_v14  ;;  %v4861_v23 = vpop.f32.mrb[70].mxu0 }
 0x24d   : > { %v2033_v43 = vpop.f32.mrb[71].mxu1  ;;  %v3722_v25 = vadd.f32 %v4932_v60, %v6175_v61  ;;  %v4934_v39 = vadd.f32 %v4861_v23, %v4713_v63  ;;  %v3561_v56 = vpop.f32.mrb[71].mxu0 }
 0x24e   : > { %v3720_v4 = vadd.f32 %v4933_v15, %v6175_v61  ;;  %v4935_v13 = vadd.f32 %v3561_v56, %v2033_v43 }
 0x24f   : > { %v3794_v44 = vmax.f32 %v3722_v25, 0.0  ;;  %v3723_v18 = vadd.f32 %v4934_v39, %v6175_v61 }
 0x250   : > { %v3792_v45 = vmax.f32 %v3720_v4, 0.0  ;;  %v3721_v2 = vadd.f32 %v4935_v13, %v6175_v61 }
 0x251   : > { %3867 = vst.msk [vmem:[%s6181_s6 + $0x230] sm:$0xff] %vm3796_vm3, %v3794_v44  ;;  %v3795_v47 = vmax.f32 %v3723_v18, 0.0 }
 0x252   : > { %3865 = vst.msk [vmem:[%s6181_s6 + $0x220] sm:$0xff] %vm3796_vm3, %v3792_v45  ;;  %v3793_v21 = vmax.f32 %v3721_v2, 0.0 }
 0x253   : > { %3868 = vst.msk [vmem:[%s6181_s6 + $0x238] sm:$0xff] %vm3796_vm3, %v3795_v47 }
 0x254   : > { %3866 = vst.msk [vmem:[%s6181_s6 + $0x228] sm:$0xff] %vm3796_vm3, %v3793_v21 }
 0x255 PF: > { %s13_s12 = sadd.s32 1, %s5354_s12  }
 0x256   : > { %p10_p4 = scmp.ge.s32.totalorder %s13_s12, 4  }
 0x258   :  { %12 = sbr.rel (!%p10_p4) target bundleno = 1 (0x1), region = 66 }

// kernel: dann_forward_pallas.4
= control target key start
LH: loop header
LB: loop body
LE: loop exit
PB: predicated region body
PF: predicated region fallthrough
CT: control target
= control target key end

     0   :  { %s3052_s12 = smov 0   ;;  %s3574_s0 = inlined_call_operand.vmem [shape: bf16[2,96,320], index: 0, kind: input, shape index: {}]   ;;  %s3575_s1 = inlined_call_operand.vmem [shape: bf16[5,320,50], index: 1, kind: input, shape index: {}]   ;;  %s3576_s2 = inlined_call_operand.vmem [shape: f32[1,50], index: 2, kind: input, shape index: {}]   ;;  %s3577_s3 = inlined_call_operand.vmem [shape: f32[2,64,50], index: 3, kind: output, shape index: {}]  }
   0x1 LB: > { %s2129_s13 = sadd.s32 4294967295, %s3030_s12   ;;  %p2133_p0 = scmp.ge.s32.totalorder %s3030_s12, 1  ;;  %s3030_s12 = sphi %s3052_s12, %s13_s12  }
   0x2   : > { %p137_p1 = scmp.lt.s32.totalorder %s3030_s12, 3 }
   0x4   : > { %p138_p2 = pnand %p2133_p0, %p137_p1 }
   0x5   : > { %v2882_v0 = vld [vmem:[%s3575_s1 + $0xe0] sm:$0xff] (!%p138_p2)   ;;  %p161_p3 = scmp.lt.s32.totalorder (!%p138_p2), %s2129_s13, 1  ;;  %v2885_v3 = vld [vmem:[%s3575_s1 + $0xe8] sm:$0xff] (!%p138_p2)   ;;  %v2888_v6 = vld [vmem:[%s3575_s1 + $0xf0] sm:$0xff] (!%p138_p2)   ;;  %vm451_vm0 = vcmask (!%p138_p2), 523264   ;;  %vm2065_vm1 = vcmask (!%p138_p2), 408576  }
   0x6   : > { %141 = sbr.rel (%p138_p2) target bundleno = 385 (0x181), region = 32  ;;  %v2883_v1 = vld [vmem:[%s3575_s1 + $0x120] sm:$0xff] (!%p138_p2)   ;;  %2481 = vmatprep.subr.bf16.mxu0 (!%p138_p2), %v2882_v0  ;;  %v2886_v4 = vld [vmem:[%s3575_s1 + $0x128] sm:$0xff] (!%p138_p2)   ;;  %v2889_v7 = vld [vmem:[%s3575_s1 + $0x130] sm:$0xff] (!%p138_p2)  }
   0x7   : > { %v2884_v2 = vld [vmem:[%s3575_s1 + $0xa0] sm:$0xff] (!%p138_p2)   ;;  %2721 = vmatprep.subr.bf16.mxu1 (!%p138_p2), %v2883_v1  ;;  %v2887_v5 = vld [vmem:[%s3575_s1 + $0xa8] sm:$0xff] (!%p138_p2)   ;;  %v2890_v8 = vld [vmem:[%s3575_s1 + $0xb0] sm:$0xff] (!%p138_p2)  }
   0x8   : > { %2482 = vmatpush3.bf16.msra.mxu0 (!%p138_p2), %v2884_v2  ;;  %2722 = vmatpush3.bf16.msra.mxu1 (!%p138_p2), %v2883_v1  ;;  %v2891_v9 = vld [vmem:[%s3575_s1 + $0xf8] sm:$0xff] (!%p138_p2)   ;;  %v2894_v12 = vld [vmem:[%s3575_s1 + $0x100] sm:$0xff] (!%p138_p2)   ;;  %v2902_v23 = vld [vmem:[%s3575_s1 + $0x108] sm:$0xff] (!%p138_p2)  }
   0x9   : > { %2483 = vmatprep.subr.bf16.mxu0 (!%p138_p2), %v2885_v3  ;;  %2723 = vmatprep.subr.bf16.mxu1 (!%p138_p2), %v2886_v4  ;;  %v2892_v10 = vld [vmem:[%s3575_s1 + $0x138] sm:$0xff] (!%p138_p2)   ;;  %v2899_v20 = vld [vmem:[%s3575_s1 + $0x40] sm:$0xff] (!%p138_p2)   ;;  %v2903_v24 = vld [vmem:[%s3575_s1 + $0x48] sm:$0xff] (!%p138_p2)  }
   0xa   : > { %v2893_v11 = vld [vmem:[%s3575_s1 + $0xb8] sm:$0xff] (!%p138_p2)   ;;  %v2900_v21 = vld [vmem:[%s3575_s1 + $0xc0] sm:$0xff] (!%p138_p2)   ;;  %v2904_v25 = vld [vmem:[%s3575_s1 + $0xc8] sm:$0xff] (!%p138_p2)  }
   0xb   : > { %v2901_v22 = vld [vmem:[%s3575_s1] sm:$0xff] (!%p138_p2)   ;;  %v2905_v26 = vld [vmem:[%s3575_s1 + $0x8] sm:$0xff] (!%p138_p2)   ;;  %v2906_v27 = vld [vmem:[%s3575_s1 + $0x110] sm:$0xff] (!%p138_p2)  }
   0xc   : > { %2484 = vmatpush3.bf16.msra.mxu0 (!%p138_p2), %v2887_v5  ;;  %2724 = vmatpush3.bf16.msra.mxu1 (!%p138_p2), %v2886_v4  ;;  %v2907_v28 = vld [vmem:[%s3575_s1 + $0x50] sm:$0xff] (!%p138_p2)   ;;  %v2910_v31 = vld [vmem:[%s3575_s1 + $0x118] sm:$0xff] (!%p138_p2)   ;;  %v2916_v39 = vld [vmem:[%s3575_s1 + $0x60] sm:$0xff] (!%p138_p2)  }
   0xd   : > { %s3579_s13 = smov (!%p161_p3, %s2129_s13), 1  ;;  %2485 = vmatprep.subr.bf16.mxu0 %v2888_v6  ;;  %2725 = vmatprep.subr.bf16.mxu1 %v2889_v7  ;;  %v2908_v29 = vld [vmem:[%s3575_s1 + $0xd0] sm:$0xff]   ;;  %v2911_v32 = vld [vmem:[%s3575_s1 + $0x58] sm:$0xff]   ;;  %v2917_v40 = vld [vmem:[%s3575_s1 + $0x180] sm:$0xff]  }
   0xe   : > { %s2873_s28 = smul.u32 144, %s3579_s13  ;;  %v2909_v30 = vld [vmem:[%s3575_s1 + $0x10] sm:$0xff]   ;;  %v2912_v33 = vld [vmem:[%s3575_s1 + $0xd8] sm:$0xff]   ;;  %v2918_v41 = vld [vmem:[%s3575_s1 + $0x20] sm:$0xff]   ;;  %s2480_s26 = sshll.u32 %s3579_s13, 6 }
   0xf   : > { %v2913_v34 = vld [vmem:[%s3575_s1 + $0x18] sm:$0xff]   ;;  %v2919_v42 = vld [vmem:[%s3575_s1 + $0x140] sm:$0xff]   ;;  %v2920_v43 = vld [vmem:[%s3575_s1 + $0x68] sm:$0xff]   ;;  %s3551_s29 = scalar_lea.vmem %s3577_s3, %s2480_s26 }
  0x10   : > { %s3099_s14 = scalar_lea.vmem %s3574_s0, %s2873_s28  ;;  %2486 = vmatpush3.bf16.msra.mxu0 %v2890_v8  ;;  %2726 = vmatpush3.bf16.msra.mxu1 %v2889_v7  ;;  %v2921_v44 = vld [vmem:[%s3575_s1 + $0x188] sm:$0xff]   ;;  %v2928_v57 = vld [vmem:[%s3575_s1 + $0x70] sm:$0xff]   ;;  %v2932_v61 = vld [vmem:[%s3575_s1 + $0x78] sm:$0xff]  }
  0x11   : > { %2487 = vmatprep.subr.bf16.mxu0 %v2891_v9  ;;  %2727 = vmatprep.subr.bf16.mxu1 %v2892_v10  ;;  %v3108_v13 = vld [vmem:[%s3099_s14 + $0x14] sm:$0xf]  ;;  %v3111_v14 = vld [vmem:[%s3099_s14 + $0x20] sm:$0xf]  ;;  %v3114_v15 = vld [vmem:[%s3099_s14 + $0x2c] sm:$0xf] }
  0x12   : > { %v3117_v16 = vld [vmem:[%s3099_s14 + $0x38] sm:$0xf]  ;;  %v2179_v17 = vcombine.low %v3108_v13, %v3111_v14  ;;  %v2218_v19 = vcombine.low %v3111_v14, %v3114_v15  ;;  %v3173_v35 = vld [vmem:[%s3099_s14 + $0xc] sm:$0xff]  ;;  %v178_v47 = vld [vmem:[%s3099_s14 + $0x24] sm:$0xff] }
  0x13   : > { %v2182_v18 = vcombine.low %v3114_v15, %v3117_v16  ;;  %v3176_v36 = vld [vmem:[%s3099_s14 + $0x18] sm:$0xff]  ;;  %v2922_v45 = vld [vmem:[%s3575_s1 + $0x28] sm:$0xff]   ;;  %v3208_v48 = vld [vmem:[%s3099_s14 + $0x30] sm:$0xff] }
  0x14   : > { %2488 = vmatpush3.bf16.msra.mxu0 %v2893_v11  ;;  %2728 = vmatpush3.bf16.msra.mxu1 %v2892_v10  ;;  %v2178_v37 = vcombine.high %v3173_v35, %v3176_v36  ;;  %v2177_v38 = vcombine.low %v3173_v35, %v3176_v36  ;;  %v2923_v46 = vld [vmem:[%s3575_s1 + $0x148] sm:$0xff]   ;;  %v3211_v49 = vcombine.high %v178_v47, %v3208_v48  ;;  %v3214_v50 = vld [vmem:[%s3099_s14 + $0x44] sm:$0xf]  ;;  %v3217_v51 = vld [vmem:[%s3099_s14 + $0x50] sm:$0xf] }
  0x15   : > { %2489 = vmatprep.subr.bf16.mxu0 %v2894_v12  ;;  %2729 = vmatprep.mubr.msk.bf16.mxu1 %vm451_vm0, %v2179_v17  ;;  %v3220_v52 = vcombine.low %v178_v47, %v3208_v48  ;;  %v3223_v53 = vld [vmem:[%s3099_s14 + $0x5c] sm:$0xf]  ;;  %v2185_v54 = vcombine.low %v3214_v50, %v3217_v51  ;;  %v229_v55 = vld [vmem:[%s3099_s14 + $0x68] sm:$0xf]  ;;  %v2929_v58 = vld [vmem:[%s3575_s1 + $0x190] sm:$0xff]   ;;  %v2217_v9 = vcombine.high %v3176_v36, %v178_v47 }
  0x16   : > { %2529 = vmatprep.subr.bf16.mxu1 %v2899_v20  ;;  %496 = vmatprep.mubr.bf16.mxu0 %v2178_v37  ;;  %v2188_v56 = vcombine.low %v3223_v53, %v229_v55  ;;  %v2930_v59 = vld [vmem:[%s3575_s1 + $0x30] sm:$0xff]   ;;  %v2933_v62 = vld [vmem:[%s3575_s1 + $0x198] sm:$0xff]   ;;  %v3259_v2 = vld [vmem:[%s3099_s14 + $0x48] sm:$0xff]  ;;  %v2221_v55 = vcombine.low %v3117_v16, %v3214_v50  ;;  %v2224_v15 = vcombine.low %v3217_v51, %v3223_v53 }
  0x17   : > { %2730 = vmatmul.mubr.msk.bf16.vlgmr.msra.gmra.mrb[0].mxu1 %vm451_vm0, %v2182_v18  ;;  %v2931_v60 = vld [vmem:[%s3575_s1 + $0x150] sm:$0xff]   ;;  %v2934_v63 = vld [vmem:[%s3575_s1 + $0x38] sm:$0xff]   ;;  %v172_v4 = vld [vmem:[%s3099_s14] sm:$0xff] }
  0x18   : > { %2490 = vmatpush3.bf16.msra.mxu0 %v2900_v21  ;;  %2530 = vmatpush3.bf16.msra.mxu1 %v2901_v22  ;;  %v2935_v0 = vld [vmem:[%s3575_s1 + $0x158] sm:$0xff]   ;;  %v2213_v6 = vcombine.low %v172_v4, %v3173_v35  ;;  %v2214_v7 = vcombine.high %v172_v4, %v3173_v35  ;;  %v2940_v8 = vld [vmem:[%s3575_s1 + $0x1a0] sm:$0xff]   ;;  %v2942_v11 = vld [vmem:[%s3575_s1 + $0x1a8] sm:$0xff]  }
  0x19   : > { %2491 = vmatprep.subr.bf16.mxu0 %v2902_v23  ;;  %2531 = vmatprep.subr.bf16.mxu1 %v2903_v24  ;;  %v182_v1 = vld [vmem:[%s3099_s14 + $0x3c] sm:$0xff]  ;;  %v186_v12 = vld [vmem:[%s3099_s14 + $0x54] sm:$0xff]  ;;  %v2943_v18 = vld [vmem:[%s3575_s1 + $0x168] sm:$0xff]   ;;  %v2216_v23 = vcombine.low %v3176_v36, %v178_v47 }
  0x1a   : > { %2733 = vmatprep.mubr.msk.bf16.mxu1 %vm451_vm0, %v2185_v54  ;;  %v3262_v3 = vcombine.high %v182_v1, %v3259_v2  ;;  %v3266_v5 = vcombine.low %v182_v1, %v3259_v2  ;;  %v2941_v10 = vld [vmem:[%s3575_s1 + $0x160] sm:$0xff]   ;;  %v2948_v21 = vld [vmem:[%s3575_s1 + $0x1b0] sm:$0xff]   ;;  %v2958_v35 = vld [vmem:[%s3575_s1 + $0x228] sm:$0xff]  }
  0x1b   : > { %v3284_v17 = vld [vmem:[%s3099_s14 + $0x60] sm:$0xff]  ;;  %v2949_v24 = vld [vmem:[%s3575_s1 + $0x170] sm:$0xff]   ;;  %v173_v36 = vld [vmem:[%s3099_s14 + $0x8] sm:$0xf] }
  0x1c   : > { %2492 = vmatpush3.bf16.msra.mxu0 %v2904_v25  ;;  %2532 = vmatpush3.bf16.msra.mxu1 %v2905_v26  ;;  %v3290_v20 = vcombine.high %v186_v12, %v3284_v17  ;;  %v3297_v22 = vcombine.low %v186_v12, %v3284_v17  ;;  %v3304_v25 = vcombine.high %v3208_v48, %v182_v1  ;;  %v2954_v26 = vld [vmem:[%s3575_s1 + $0x80] sm:$0xff]   ;;  %v2965_v37 = vld [vmem:[%s3575_s1 + $0x98] sm:$0xff]   ;;  %v3378_v47 = vld [vmem:[%s3099_s14 + $0x6c] sm:$0xff] }
  0x1d   : > { %2493 = vmatprep.subr.bf16.mxu0 %v2906_v27  ;;  %2533 = vmatprep.subr.bf16.mxu1 %v2907_v28  ;;  %v2950_v27 = vld [vmem:[%s3575_s1 + $0x1b8] sm:$0xff]   ;;  %v2957_v28 = vld [vmem:[%s3575_s1 + $0x88] sm:$0xff]   ;;  %v2978_v16 = vld [vmem:[%s3575_s1 + $0x1d0] sm:$0xff]  }
  0x1e   : > { %v2972_v54 = vld [vmem:[%s3575_s1 + $0x248] sm:$0xff]   ;;  %v2979_v14 = vld [vmem:[%s3575_s1 + $0x250] sm:$0xff]   ;;  %v2982_v51 = vld [vmem:[%s3575_s1 + $0x258] sm:$0xff]  }
  0x1f   : > { %2734 = vmatmul.mubr.msk.bf16.gmra.mrb[4].mxu1 %vm451_vm0, %v2188_v56  ;;  %v3390_v56 = vcombine.high %v3284_v17, %v3378_v47  ;;  %v2980_v50 = vld [vmem:[%s3575_s1 + $0x210] sm:$0xff]   ;;  %v2984_v53 = vld [vmem:[%s3099_s14 + $0x20] ss:$12 sps:$4 sm:$0xff]  }
  0x20   : > { %2494 = vmatpush3.bf16.msra.mxu0 %v2908_v29  ;;  %2534 = vmatpush3.bf16.msra.mxu1 %v2909_v30  ;;  %v2951_v29 = vld [vmem:[%s3575_s1 + $0x178] sm:$0xff]   ;;  %v2955_v30 = vld [vmem:[%s3575_s1 + $0x220] sm:$0xff]   ;;  %v2994_v4 = vld [vmem:[%s3575_s1 + $0x270] sm:$0xff]  }
  0x21   : > { %2495 = vmatprep.subr.bf16.mxu0 %v2910_v31  ;;  %2535 = vmatprep.subr.bf16.mxu1 %v2911_v32  ;;  %v2962_v31 = vld [vmem:[%s3575_s1 + $0x90] sm:$0xff]   ;;  %v3327_v32 = vcombine.low %v3208_v48, %v182_v1  ;;  %v2971_v48 = vld [vmem:[%s3575_s1 + $0x1c8] sm:$0xff]  }
  0x22   : > { %783 = vmatprep.mubr.bf16.mxu1 %v2214_v7  ;;  %v2990_v1 = vld [vmem:[%s3575_s1 + $0x2c8] sm:$0xff]   ;;  %v2996_v7 = vld [vmem:[%s3575_s1 + $0x290] sm:$0xff]  }
  0x24   : > { %2496 = vmatpush3.bf16.msra.mxu0 %v2912_v33  ;;  %2536 = vmatpush3.bf16.msra.mxu1 %v2913_v34  ;;  %v2956_v33 = vld [vmem:[%s3575_s1 + $0x1e0] sm:$0xff]   ;;  %v3333_v34 = vcombine.high %v3259_v2, %v186_v12 }
  0x25   : > { %2537 = vmatprep.subr.bf16.mxu1 %v2916_v39  ;;  %2577 = vmatprep.subr.bf16.mxu0 %v2917_v40  ;;  %v2963_v39 = vld [vmem:[%s3575_s1 + $0x230] sm:$0xff]   ;;  %v3352_v40 = vcombine.low %v3259_v2, %v186_v12 }
  0x26   : > { %v2992_v2 = vld [vmem:[%s3099_s14 + $0x50] ss:$12 sps:$4 sm:$0xff]  }
  0x27   : > { %497 = vmatmul.mubr.bf16.vlgmr.msra.gmra.mrb[0].mxu0 %v2177_v38  ;;  %v2959_v38 = vld [vmem:[%s3575_s1 + $0x1e8] sm:$0xff]   ;;  %v3001_v12 = vld [vmem:[%s3099_s14 + $0x44] ss:$12 sps:$4 sm:$0xff]  }
  0x28   : > { %2538 = vmatpush3.bf16.msra.mxu1 %v2918_v41  ;;  %2578 = vmatpush3.bf16.msra.mxu0 %v2919_v42  ;;  %v2215_v41 = vcombine.low %v173_v36, %v3108_v13  ;;  %v2964_v42 = vld [vmem:[%s3575_s1 + $0x1f0] sm:$0xff]   ;;  %v2967_v13 = vld [vmem:[%s3575_s1 + $0x1f8] sm:$0xff]  }
  0x29   : > { %2539 = vmatprep.subr.bf16.mxu1 %v2920_v43  ;;  %2579 = vmatprep.subr.bf16.mxu0 %v2921_v44  ;;  %v2966_v43 = vld [vmem:[%s3575_s1 + $0x238] sm:$0xff]   ;;  %v2968_v44 = vld [vmem:[%s3575_s1 + $0x1c0] sm:$0xff]  }
  0x2a   : > { %504 = vmatprep.mubr.bf16.mxu0 %v3211_v49  ;;  %v3017_v36 = vld [vmem:[%s3575_s1 + $0x2b8] sm:$0xff]  }
  0x2c   : > { %2540 = vmatpush3.bf16.msra.mxu1 %v2922_v45  ;;  %2580 = vmatpush3.bf16.msra.mxu0 %v2923_v46  ;;  %v2969_v45 = vld [vmem:[%s3575_s1 + $0x240] sm:$0xff]  }
  0x2d   : > { %2541 = vmatprep.subr.bf16.mxu1 %v2928_v57  ;;  %2581 = vmatprep.subr.bf16.mxu0 %v2929_v58  ;;  %v2970_v46 = vld [vmem:[%s3575_s1 + $0x200] sm:$0xff]   ;;  %v2973_v57 = vld [vmem:[%s3575_s1 + $0x208] sm:$0xff]   ;;  %v2981_v58 = vld [vmem:[%s3575_s1 + $0x1d8] sm:$0xff]  }
  0x2f   : > { %505 = vmatmul.mubr.bf16.gmra.mrb[4].mxu0 %v3220_v52 }
  0x30   : > { %2542 = vmatpush3.bf16.msra.mxu1 %v2930_v59  ;;  %2582 = vmatpush3.bf16.msra.mxu0 %v2931_v60  ;;  %v2983_v59 = vld [vmem:[%s3575_s1 + $0x218] sm:$0xff]   ;;  %v2986_v60 = vld [vmem:[%s3575_s1 + $0x260] sm:$0xff]  }
  0x31   : > { %2543 = vmatprep.subr.bf16.mxu1 %v2932_v61  ;;  %2583 = vmatprep.subr.bf16.mxu0 %v2933_v62  ;;  %v2987_v61 = vld [vmem:[%s3575_s1 + $0x2c0] sm:$0xff]  }
  0x32   : > { %512 = vmatprep.mubr.bf16.mxu0 %v3262_v3  ;;  %v2985_v62 = vld [vmem:[%s3099_s14 + $0x38] ss:$12 sps:$4 sm:$0xff]  }
  0x34   : > { %2544 = vmatpush3.bf16.msra.mxu1 %v2934_v63  ;;  %2584 = vmatpush3.bf16.msra.mxu0 %v2935_v0  ;;  %v2988_v63 = vld [vmem:[%s3575_s1 + $0x280] sm:$0xff]   ;;  %v2989_v0 = vld [vmem:[%s3575_s1 + $0x268] sm:$0xff]  }
  0x35   : > { %2585 = vmatprep.subr.bf16.mxu0 %v2940_v8  ;;  %2737 = vmatprep.subr.bf16.mxu1 %v2954_v26  ;;  %v2997_v8 = vld [vmem:[%s3575_s1 + $0x278] sm:$0xff]  }
  0x37   : > { %513 = vmatmul.mubr.bf16.gmra.mrb[8].mxu0 %v3266_v5  ;;  %784 = vmatmul.mubr.bf16.vlgmr.msra.gmra.mrb[8].mxu1 %v2213_v6  ;;  %v2995_v6 = vld [vmem:[%s3575_s1 + $0x2d0] sm:$0xff]  }
  0x38   : > { %2586 = vmatpush3.bf16.msra.mxu0 %v2941_v10  ;;  %791 = vmatprep.mubr.bf16.mxu1 %v2217_v9  ;;  %v2999_v10 = vld [vmem:[%s3575_s1 + $0x298] sm:$0xff]  }
  0x39   : > { %2587 = vmatprep.subr.bf16.mxu0 %v2942_v11  ;;  %520 = vmatprep.mubr.bf16.mxu0 %v3290_v20  ;;  %v3002_v11 = vld [vmem:[%s3575_s1 + $0x2e0] sm:$0xff]  }
  0x3a   : > { %2738 = vmatpush3.bf16.msra.mxu1 %v2954_v26  ;;  %v3007_v26 = vld [vmem:[%s3575_s1 + $0x2a8] sm:$0xff]  }
  0x3b   : > { %2739 = vmatprep.subr.bf16.mxu1 %v2957_v28 }
  0x3c   : > { %2588 = vmatpush3.bf16.msra.mxu0 %v2943_v18  ;;  %v1282_v18 = vld [vmem:[%s3099_s14 + $0x78] sm:$0xff] }
  0x3d   : > { %2589 = vmatprep.subr.bf16.mxu0 %v2948_v21  ;;  %v3005_v21 = vld [vmem:[%s3575_s1 + $0x2e8] sm:$0xff]  }
  0x3e   : > { %2740 = vmatpush3.bf16.msra.mxu1 %v2957_v28  ;;  %v3013_v28 = vld [vmem:[%s3575_s1 + $0x310] sm:$0xff]  }
  0x3f   : > { %521 = vmatmul.mubr.bf16.gmra.mrb[12].mxu0 %v3297_v22  ;;  %792 = vmatmul.mubr.bf16.gmra.mrb[12].mxu1 %v2216_v23 }
  0x40   : > { %1162 = vmatprep.mubr.bf16.mxu0 %v2217_v9  ;;  %2590 = vmatpush3.bf16.msra.mxu0 %v2949_v24  ;;  %v2998_v9 = vld [vmem:[%s3575_s1 + $0x2d8] sm:$0xff]  }
  0x41   : > { %799 = vmatprep.mubr.bf16.mxu1 %v3304_v25  ;;  %2591 = vmatprep.subr.bf16.mxu0 %v2950_v27  ;;  %v3009_v24 = vld [vmem:[%s3099_s14 + $0x5c] ss:$12 sps:$4 sm:$0xff]   ;;  %v3012_v27 = vld [vmem:[%s3575_s1 + $0x2f0] sm:$0xff]  }
  0x42   : > { %2741 = vmatprep.subr.bf16.mxu1 %v2962_v31 }
  0x43   : > { %2742 = vmatpush3.bf16.msra.mxu1 %v2962_v31  ;;  %v3015_v31 = vld [vmem:[%s3575_s1 + $0x2f8] sm:$0xff]  }
  0x44   : > { %2592 = vmatpush3.bf16.msra.mxu0 %v2951_v29  ;;  %2743 = vmatprep.subr.bf16.mxu1 %v2965_v37  ;;  %v3011_v29 = vld [vmem:[%s3099_s14 + $0x74] ss:$12 sps:$4 sm:$0xff]  }
  0x45   : > { %2625 = vmatprep.subr.bf16.mxu0 %v2955_v30  ;;  %v3014_v30 = vld [vmem:[%s3575_s1 + $0x2b0] sm:$0xff]  }
  0x47   : > { %800 = vmatmul.mubr.bf16.gmra.mrb[16].mxu1 %v3327_v32  ;;  %1163 = vmatmul.mubr.bf16.vlgmr.msra.gmra.mrb[16].mxu0 %v2216_v23  ;;  %v2375_v23 = vcombine.high %v3378_v47, %v1282_v18 }
  0x48   : > { %2626 = vmatpush3.bf16.msra.mxu0 %v2956_v33  ;;  %807 = vmatprep.mubr.bf16.mxu1 %v3333_v34  ;;  %v3016_v33 = vld [vmem:[%s3575_s1 + $0x318] sm:$0xff]  }
  0x49   : > { %2627 = vmatprep.subr.bf16.mxu0 %v2958_v35  ;;  %1170 = vmatprep.mubr.bf16.mxu0 %v3304_v25  ;;  %v3018_v35 = vld [vmem:[%s3099_s14 + $0x38] ss:$12 sps:$4 sm:$0xff]  }
  0x4a   : > { %2744 = vmatpush3.bf16.msra.mxu1 %v2965_v37  ;;  %v3019_v37 = vld [vmem:[%s3099_s14 + $0x50] ss:$12 sps:$4 sm:$0xff]  }
  0x4b   : > { %2753 = vmatprep.subr.bf16.mxu1 %v2968_v44 }
  0x4c   : > { %2628 = vmatpush3.bf16.msra.mxu0 %v2959_v38  ;;  %v3020_v38 = vld [vmem:[%s3099_s14 + $0x68] ss:$12 sps:$4 sm:$0xff]  }
  0x4d   : > { %2629 = vmatprep.subr.bf16.mxu0 %v2963_v39  ;;  %v3021_v39 = vld [vmem:[%s3099_s14 + $0x80] ss:$12 sps:$4 sm:$0xff]  }
  0x4f   : > { %808 = vmatmul.mubr.bf16.gmra.mrb[20].mxu1 %v3352_v40  ;;  %1171 = vmatmul.mubr.bf16.gmra.mrb[20].mxu0 %v3327_v32 }
  0x50   : > { %2630 = vmatpush3.bf16.msra.mxu0 %v2964_v42  ;;  %2745 = vmatprep.mubr.msk.bf16.mxu1 %vm451_vm0, %v2215_v41 }
  0x51   : > { %2631 = vmatprep.subr.bf16.mxu0 %v2966_v43  ;;  %1178 = vmatprep.mubr.bf16.mxu0 %v3333_v34 }
  0x54   : > { %2632 = vmatpush3.bf16.msra.mxu0 %v2967_v13 }
  0x55   : > { %2633 = vmatprep.subr.bf16.mxu0 %v2969_v45 }
  0x57   : > { %2746 = vmatmul.mubr.msk.bf16.vlgmr.msra.gmra.mrb[0].mxu1 %vm451_vm0, %v2218_v19  ;;  %1179 = vmatmul.mubr.bf16.gmra.mrb[24].mxu0 %v3352_v40  ;;  %v3412_v19 = vcombine.low %v3284_v17, %v3378_v47  ;;  %v3003_v17 = vld [vmem:[%s3575_s1 + $0x300] sm:$0xff]  }
  0x58   : > { %2754 = vmatpush3.bf16.msra.mxu1 %v2968_v44  ;;  %2634 = vmatpush3.bf16.msra.mxu0 %v2970_v46 }
  0x59   : > { %2755 = vmatprep.subr.bf16.mxu1 %v2971_v48  ;;  %2635 = vmatprep.subr.bf16.mxu0 %v2972_v54 }
  0x5a   : > { %2749 = vmatprep.mubr.msk.bf16.mxu1 %vm451_vm0, %v2221_v55  ;;  %1186 = vmatprep.mubr.bf16.mxu0 %v3390_v56 }
  0x5c   : > { %2756 = vmatpush3.bf16.msra.mxu1 %v2971_v48  ;;  %2636 = vmatpush3.bf16.msra.mxu0 %v2973_v57 }
  0x5d   : > { %2757 = vmatprep.subr.bf16.mxu1 %v2978_v16  ;;  %2637 = vmatprep.subr.bf16.mxu0 %v2979_v14 }
  0x5f   : > { %2750 = vmatmul.mubr.msk.bf16.gmra.mrb[4].mxu1 %vm451_vm0, %v2224_v15  ;;  %1187 = vmatmul.mubr.bf16.gmra.mrb[28].mxu0 %v3412_v19 }
  0x60   : > { %2758 = vmatpush3.bf16.msra.mxu1 %v2978_v16  ;;  %2638 = vmatpush3.bf16.msra.mxu0 %v2980_v50 }
  0x61   : > { %2759 = vmatprep.subr.bf16.mxu1 %v2981_v58  ;;  %2639 = vmatprep.subr.bf16.mxu0 %v2982_v51 }
  0x62   : > { %2761 = vmatprep.mubr.msk.bf16.mxu1 %vm451_vm0, %v2984_v53  ;;  %1549 = vmatprep.mubr.bf16.mxu0 %v3211_v49  ;;  %v2991_v49 = vld [vmem:[%s3575_s1 + $0x288] sm:$0xff]  }
  0x64   : > { %2760 = vmatpush3.bf16.msra.mxu1 %v2981_v58  ;;  %2640 = vmatpush3.bf16.msra.mxu0 %v2983_v59 }
  0x65   : > { %2769 = vmatprep.subr.bf16.mxu1 %v2986_v60  ;;  %2673 = vmatprep.subr.bf16.mxu0 %v2987_v61 }
  0x67   : > { %2762 = vmatmul.mubr.msk.bf16.vlgmr.msra.gmra.mrb[0].mxu1 %vm451_vm0, %v2985_v62  ;;  %1550 = vmatmul.mubr.bf16.vlgmr.msra.gmra.mrb[32].mxu0 %v3220_v52  ;;  %v2993_v52 = vld [vmem:[%s3099_s14 + $0x68] ss:$12 sps:$4 sm:$0xff]  }
  0x68   : > { %2770 = vmatpush3.bf16.msra.mxu1 %v2986_v60  ;;  %2674 = vmatpush3.bf16.msra.mxu0 %v2988_v63 }
  0x69   : > { %2771 = vmatprep.subr.bf16.mxu1 %v2989_v0  ;;  %2675 = vmatprep.subr.bf16.mxu0 %v2990_v1 }
  0x6a   : > { %2765 = vmatprep.mubr.msk.bf16.mxu1 %vm451_vm0, %v2992_v2  ;;  %1557 = vmatprep.mubr.bf16.mxu0 %v3262_v3  ;;  %v3000_v3 = vld [vmem:[%s3099_s14 + $0x2c] ss:$12 sps:$4 sm:$0xff]  }
  0x6c   : > { %2772 = vmatpush3.bf16.msra.mxu1 %v2989_v0  ;;  %2676 = vmatpush3.bf16.msra.mxu0 %v2991_v49 }
  0x6d   : > { %2773 = vmatprep.subr.bf16.mxu1 %v2994_v4  ;;  %2677 = vmatprep.subr.bf16.mxu0 %v2995_v6 }
  0x6f   : > { %2766 = vmatmul.mubr.msk.bf16.gmra.mrb[4].mxu1 %vm451_vm0, %v2993_v52  ;;  %1558 = vmatmul.mubr.bf16.gmra.mrb[36].mxu0 %v3266_v5  ;;  %v3004_v5 = vld [vmem:[%s3575_s1 + $0x2a0] sm:$0xff]  }
  0x70   : > { %2774 = vmatpush3.bf16.msra.mxu1 %v2994_v4  ;;  %2678 = vmatpush3.bf16.msra.mxu0 %v2996_v7 }
  0x71   : > { %2775 = vmatprep.subr.bf16.mxu1 %v2997_v8  ;;  %2679 = vmatprep.subr.bf16.mxu0 %v2998_v9 }
  0x72   : > { %1565 = vmatprep.mubr.bf16.mxu0 %v3290_v20  ;;  %2777 = vmatprep.mubr.msk.bf16.mxu1 %vm451_vm0, %v3000_v3  ;;  %v3006_v20 = vld [vmem:[%s3575_s1 + $0x308] sm:$0xff]  }
  0x74   : > { %2776 = vmatpush3.bf16.msra.mxu1 %v2997_v8  ;;  %2680 = vmatpush3.bf16.msra.mxu0 %v2999_v10 }
  0x75   : > { %2681 = vmatprep.subr.bf16.mxu0 %v3002_v11  ;;  %2785 = vmatprep.subr.bf16.mxu1 %v3003_v17 }
  0x77   : > { %1566 = vmatmul.mubr.bf16.gmra.mrb[40].mxu0 %v3297_v22  ;;  %2778 = vmatmul.mubr.msk.bf16.vlgmr.msra.gmra.mrb[0].mxu1 %vm451_vm0, %v3001_v12  ;;  %v2374_v22 = vcombine.low %v3378_v47, %v1282_v18 }
  0x78   : > { %2682 = vmatpush3.bf16.msra.mxu0 %v3004_v5  ;;  %2786 = vmatpush3.bf16.msra.mxu1 %v3003_v17 }
  0x79   : > { %2683 = vmatprep.subr.bf16.mxu0 %v3005_v21  ;;  %2787 = vmatprep.subr.bf16.mxu1 %v3006_v20 }
  0x7a   : > { %1573 = vmatprep.mubr.bf16.mxu0 %v2375_v23  ;;  %2781 = vmatprep.mubr.msk.bf16.mxu1 %vm451_vm0, %v3009_v24 }
  0x7c   : > { %2684 = vmatpush3.bf16.msra.mxu0 %v3007_v26  ;;  %2788 = vmatpush3.bf16.msra.mxu1 %v3006_v20 }
  0x7d   : > { %2685 = vmatprep.subr.bf16.mxu0 %v3012_v27  ;;  %2789 = vmatprep.subr.bf16.mxu1 %v3013_v28 }
  0x7f   : > { %1574 = vmatmul.mubr.bf16.gmra.mrb[44].mxu0 %v2374_v22  ;;  %2782 = vmatmul.mubr.msk.bf16.gmra.mrb[4].mxu1 %vm451_vm0, %v3011_v29 }
  0x80   : > { %2686 = vmatpush3.bf16.msra.mxu0 %v3014_v30  ;;  %2790 = vmatpush3.bf16.msra.mxu1 %v3013_v28 }
  0x81   : > { %2687 = vmatprep.subr.bf16.mxu0 %v3015_v31  ;;  %2791 = vmatprep.subr.bf16.mxu1 %v3016_v33 }
  0x82   : > { %1936 = vmatprep.mubr.bf16.mxu0 %v3304_v25  ;;  %2793 = vmatprep.mubr.msk.bf16.mxu1 %vm451_vm0, %v3018_v35  ;;  %v1669_v25 = vld [vmem:[%s3099_s14 + $0x84] sm:$0xff] }
  0x83   : > { %v2451_v41 = vcombine.high %v1282_v18, %v1669_v25  ;;  %v2450_v42 = vcombine.low %v1282_v18, %v1669_v25 }
  0x84   : > { %2688 = vmatpush3.bf16.msra.mxu0 %v3017_v36  ;;  %2792 = vmatpush3.bf16.msra.mxu1 %v3016_v33 }
  0x87   : > { %1937 = vmatmul.mubr.bf16.vlgmr.msra.gmra.mrb[48].mxu0 %v3327_v32  ;;  %2794 = vmatmul.mubr.msk.bf16.vlgmr.msra.gmra.mrb[0].mxu1 %vm451_vm0, %v3019_v37 }
  0x88   : > { %1944 = vmatprep.mubr.bf16.mxu0 %v3333_v34  ;;  %2797 = vmatprep.mubr.msk.bf16.mxu1 %vm451_vm0, %v3020_v38 }
  0x8f   : > { %1945 = vmatmul.mubr.bf16.gmra.mrb[52].mxu0 %v3352_v40  ;;  %2798 = vmatmul.mubr.msk.bf16.gmra.mrb[4].mxu1 %vm451_vm0, %v3021_v39 }
  0x90   : > { %1952 = vmatprep.mubr.bf16.mxu0 %v3390_v56 }
  0x97   : > { %1953 = vmatmul.mubr.bf16.gmra.mrb[56].mxu0 %v3412_v19 }
  0x98   : > { %1960 = vmatprep.mubr.bf16.mxu0 %v2451_v41 }
  0x9f   : > { %1961 = vmatmul.mubr.bf16.gmra.mrb[60].mxu0 %v2450_v42 }
  0xfa   : > { %v2497_v32 = vpop.f32.mrb[0].mxu0 }
  0xfb   : > { %v2498_v43 = vpop.f32.mrb[1].mxu0 }
  0xfc   : > { %v2499_v44 = vadd.f32 %v2498_v43, %v2497_v32  ;;  %v2500_v34 = vpop.f32.mrb[2].mxu0 }
  0xfd   : > { %v2501_v13 = vpop.f32.mrb[3].mxu0 }
  0xfe   : > { %v2502_v45 = vadd.f32 %v2501_v13, %v2500_v34 }
 0x102   : > { %v2503_v46 = vpop.f32.mrb[4].mxu0 }
 0x103   : > { %v2504_v47 = vpop.f32.mrb[5].mxu0 }
 0x104   : > { %v2505_v40 = vadd.f32 %v2504_v47, %v2503_v46  ;;  %v2506_v48 = vpop.f32.mrb[6].mxu0 }
 0x105   : > { %v2507_v54 = vpop.f32.mrb[7].mxu0 }
 0x106   : > { %v2508_v55 = vadd.f32 %v2507_v54, %v2506_v48 }
 0x10a   : > { %v2509_v56 = vpop.f32.mrb[8].mxu0  ;;  %v2545_v57 = vpop.f32.mrb[8].mxu1 }
 0x10b   : > { %v2510_v16 = vpop.f32.mrb[9].mxu0  ;;  %v2546_v15 = vpop.f32.mrb[9].mxu1 }
 0x10c   : > { %v2511_v14 = vadd.f32 %v2510_v16, %v2509_v56  ;;  %v2512_v19 = vpop.f32.mrb[10].mxu0  ;;  %v2547_v50 = vadd.f32 %v2546_v15, %v2545_v57  ;;  %v2548_v58 = vpop.f32.mrb[10].mxu1 }
 0x10d   : > { %v2513_v51 = vpop.f32.mrb[11].mxu0  ;;  %v2549_v59 = vpop.f32.mrb[11].mxu1 }
 0x10e   : > { %v2514_v53 = vadd.f32 %v2513_v51, %v2512_v19  ;;  %v2806_v60 = vadd.f32 %v2547_v50, %v2499_v44  ;;  %v2550_v61 = vadd.f32 %v2549_v59, %v2548_v58 }
 0x110   : > { %v2816_v62 = vadd.f32 %v2550_v61, %v2502_v45 }
 0x112   : > { %v2515_v63 = vpop.f32.mrb[12].mxu0  ;;  %v2551_v0 = vpop.f32.mrb[12].mxu1 }
 0x113   : > { %v2516_v1 = vpop.f32.mrb[13].mxu0  ;;  %v2552_v49 = vpop.f32.mrb[13].mxu1 }
 0x114   : > { %v2517_v2 = vadd.f32 %v2516_v1, %v2515_v63  ;;  %v2518_v4 = vpop.f32.mrb[14].mxu0  ;;  %v2553_v6 = vadd.f32 %v2552_v49, %v2551_v0  ;;  %v2554_v52 = vpop.f32.mrb[14].mxu1 }
 0x115   : > { %v2519_v7 = vpop.f32.mrb[15].mxu0  ;;  %v2555_v9 = vpop.f32.mrb[15].mxu1 }
 0x116   : > { %v2520_v8 = vadd.f32 %v2519_v7, %v2518_v4  ;;  %v2801_v3 = vadd.f32 %v2553_v6, %v2505_v40  ;;  %v2556_v10 = vadd.f32 %v2555_v9, %v2554_v52 }
 0x118   : > { %v2811_v11 = vadd.f32 %v2556_v10, %v2508_v55 }
 0x11a   : > { %v2557_v12 = vpop.f32.mrb[16].mxu1  ;;  %v2593_v17 = vpop.f32.mrb[16].mxu0 }
 0x11b   : > { %v2558_v5 = vpop.f32.mrb[17].mxu1  ;;  %v2594_v18 = vpop.f32.mrb[17].mxu0 }
 0x11c   : > { %v2559_v21 = vadd.f32 %v2558_v5, %v2557_v12  ;;  %v2595_v20 = vadd.f32 %v2594_v18, %v2593_v17  ;;  %v2560_v23 = vpop.f32.mrb[18].mxu1  ;;  %v2596_v24 = vpop.f32.mrb[18].mxu0 }
 0x11d   : > { %v2561_v26 = vpop.f32.mrb[19].mxu1  ;;  %v2597_v27 = vpop.f32.mrb[19].mxu0 }
 0x11e   : > { %v2826_v28 = vadd.f32 %v2559_v21, %v2511_v14  ;;  %v2807_v22 = vadd.f32 %v2806_v60, %v2595_v20  ;;  %v2562_v29 = vadd.f32 %v2561_v26, %v2560_v23  ;;  %v2598_v30 = vadd.f32 %v2597_v27, %v2596_v24 }
 0x120   : > { %v2836_v31 = vadd.f32 %v2562_v29, %v2514_v53  ;;  %v2817_v33 = vadd.f32 %v2816_v62, %v2598_v30 }
 0x122   : > { %v2563_v35 = vpop.f32.mrb[20].mxu1  ;;  %v2599_v36 = vpop.f32.mrb[20].mxu0 }
 0x123   : > { %v2564_v37 = vpop.f32.mrb[21].mxu1  ;;  %v2600_v38 = vpop.f32.mrb[21].mxu0 }
 0x124   : > { %v2565_v39 = vadd.f32 %v2564_v37, %v2563_v35  ;;  %v2601_v25 = vadd.f32 %v2600_v38, %v2599_v36  ;;  %v2566_v41 = vpop.f32.mrb[22].mxu1  ;;  %v2602_v42 = vpop.f32.mrb[22].mxu0 }
 0x125   : > { %v2567_v32 = vpop.f32.mrb[23].mxu1  ;;  %v2603_v43 = vpop.f32.mrb[23].mxu0 }
 0x126   : > { %v2821_v44 = vadd.f32 %v2565_v39, %v2517_v2  ;;  %v2802_v34 = vadd.f32 %v2801_v3, %v2601_v25  ;;  %v2568_v13 = vadd.f32 %v2567_v32, %v2566_v41  ;;  %v2604_v45 = vadd.f32 %v2603_v43, %v2602_v42 }
 0x128   : > { %v2831_v46 = vadd.f32 %v2568_v13, %v2520_v8  ;;  %v2812_v47 = vadd.f32 %v2811_v11, %v2604_v45 }
 0x12a   : > { %v2605_v40 = vpop.f32.mrb[24].mxu0 }
 0x12b   : > { %v2606_v48 = vpop.f32.mrb[25].mxu0 }
 0x12c   : > { %v2607_v54 = vadd.f32 %v2606_v48, %v2605_v40  ;;  %v2608_v55 = vpop.f32.mrb[26].mxu0 }
 0x12d   : > { %v2609_v56 = vpop.f32.mrb[27].mxu0 }
 0x12e   : > { %v2827_v57 = vadd.f32 %v2826_v28, %v2607_v54  ;;  %v2610_v16 = vadd.f32 %v2609_v56, %v2608_v55 }
 0x130   : > { %v2837_v14 = vadd.f32 %v2836_v31, %v2610_v16 }
 0x132   : > { %v2611_v15 = vpop.f32.mrb[28].mxu0 }
 0x133   : > { %v2612_v19 = vpop.f32.mrb[29].mxu0 }
 0x134   : > { %v2613_v50 = vadd.f32 %v2612_v19, %v2611_v15  ;;  %v2614_v58 = vpop.f32.mrb[30].mxu0 }
 0x135   : > { %v2615_v51 = vpop.f32.mrb[31].mxu0 }
 0x136   : > { %v2822_v53 = vadd.f32 %v2821_v44, %v2613_v50  ;;  %v2616_v59 = vadd.f32 %v2615_v51, %v2614_v58 }
 0x138   : > { %v2832_v60 = vadd.f32 %v2831_v46, %v2616_v59 }
 0x13a   : > { %v2641_v61 = vpop.f32.mrb[32].mxu0 }
 0x13b   : > { %v2642_v62 = vpop.f32.mrb[33].mxu0 }
 0x13c   : > { %v2643_v63 = vadd.f32 %v2642_v62, %v2641_v61  ;;  %v2644_v0 = vpop.f32.mrb[34].mxu0 }
 0x13d   : > { %v2645_v1 = vpop.f32.mrb[35].mxu0 }
 0x13e   : > { %v2808_v2 = vadd.f32 %v2807_v22, %v2643_v63  ;;  %v2646_v49 = vadd.f32 %v2645_v1, %v2644_v0 }
 0x140   : > { %v2818_v4 = vadd.f32 %v2817_v33, %v2646_v49 }
 0x142   : > { %v2647_v6 = vpop.f32.mrb[36].mxu0 }
 0x143   : > { %v2648_v52 = vpop.f32.mrb[37].mxu0 }
 0x144   : > { %v2649_v7 = vadd.f32 %v2648_v52, %v2647_v6  ;;  %v2650_v8 = vpop.f32.mrb[38].mxu0 }
 0x145   : > { %v2651_v9 = vpop.f32.mrb[39].mxu0 }
 0x146   : > { %v2803_v3 = vadd.f32 %v2802_v34, %v2649_v7  ;;  %v2652_v10 = vadd.f32 %v2651_v9, %v2650_v8  ;;  %v2477_v34 = vld [vmem:[%s3576_s2] ss:$0 sm:$0xff] }
 0x148   : > { %v2813_v11 = vadd.f32 %v2812_v47, %v2652_v10 }
 0x14a   : > { %v2653_v12 = vpop.f32.mrb[40].mxu0 }
 0x14b   : > { %v2654_v17 = vpop.f32.mrb[41].mxu0 }
 0x14c   : > { %v2655_v5 = vadd.f32 %v2654_v17, %v2653_v12  ;;  %v2656_v18 = vpop.f32.mrb[42].mxu0 }
 0x14d   : > { %v2657_v21 = vpop.f32.mrb[43].mxu0 }
 0x14e   : > { %v2828_v20 = vadd.f32 %v2827_v57, %v2655_v5  ;;  %v2658_v23 = vadd.f32 %v2657_v21, %v2656_v18 }
 0x150   : > { %v2838_v24 = vadd.f32 %v2837_v14, %v2658_v23 }
 0x152   : > { %v2659_v26 = vpop.f32.mrb[44].mxu0 }
 0x153   : > { %v2660_v27 = vpop.f32.mrb[45].mxu0 }
 0x154   : > { %v2661_v28 = vadd.f32 %v2660_v27, %v2659_v26  ;;  %v2662_v22 = vpop.f32.mrb[46].mxu0 }
 0x155   : > { %v2663_v29 = vpop.f32.mrb[47].mxu0 }
 0x156   : > { %v3540_v30 = vadd.f32 %v2822_v53, %v2661_v28  ;;  %v2664_v31 = vadd.f32 %v2663_v29, %v2662_v22 }
 0x158   : > { %v3542_v33 = vadd.f32 %v2832_v60, %v2664_v31 }
 0x15a   : > { %v2689_v35 = vpop.f32.mrb[48].mxu0  ;;  %v2795_v36 = vpop.f32.mrb[0].mxu1 }
 0x15b   : > { %v2690_v37 = vpop.f32.mrb[49].mxu0  ;;  %v2003_v38 = vpop.f32.mrb[1].mxu1 }
 0x15c   : > { %v2691_v39 = vadd.f32 %v2690_v37, %v2689_v35  ;;  %v2692_v25 = vpop.f32.mrb[50].mxu0  ;;  %v2796_v41 = vpop.f32.mrb[2].mxu1 }
 0x15d   : > { %v2693_v42 = vpop.f32.mrb[51].mxu0  ;;  %v2006_v32 = vpop.f32.mrb[3].mxu1 }
 0x15e   : > { %v2809_v43 = vadd.f32 %v2808_v2, %v2691_v39  ;;  %v2694_v44 = vadd.f32 %v2693_v42, %v2692_v25 }
 0x160   : > { %v2810_v13 = vadd.f32 %v2809_v43, %v2003_v38  ;;  %v2819_v45 = vadd.f32 %v2818_v4, %v2694_v44 }
 0x162   : > { %v2049_v46 = vadd.f32 %v2810_v13, %v2477_v34  ;;  %v2820_v47 = vadd.f32 %v2819_v45, %v2006_v32  ;;  %v2695_v40 = vpop.f32.mrb[52].mxu0  ;;  %v2799_v48 = vpop.f32.mrb[4].mxu1 }
 0x163   : > { %v2696_v54 = vpop.f32.mrb[53].mxu0  ;;  %v2019_v55 = vpop.f32.mrb[5].mxu1 }
 0x164   : > { %v2057_v56 = vmax.f32 %v2049_v46, 0.0  ;;  %v2050_v57 = vadd.f32 %v2820_v47, %v2477_v34  ;;  %v2697_v16 = vadd.f32 %v2696_v54, %v2695_v40  ;;  %v2698_v14 = vpop.f32.mrb[54].mxu0  ;;  %v2800_v15 = vpop.f32.mrb[6].mxu1 }
 0x165   : > { %v2699_v19 = vpop.f32.mrb[55].mxu0  ;;  %v2022_v50 = vpop.f32.mrb[7].mxu1 }
 0x166   : > { %2066 = vst.msk [vmem:[%s3551_s29] sm:$0xff] %vm2065_vm1, %v2057_v56  ;;  %v2058_v58 = vmax.f32 %v2050_v57, 0.0  ;;  %v2804_v51 = vadd.f32 %v2803_v3, %v2697_v16  ;;  %v2700_v53 = vadd.f32 %v2699_v19, %v2698_v14 }
 0x168   : > { %2067 = vst.msk [vmem:[%s3551_s29 + $0x8] sm:$0xff] %vm2065_vm1, %v2058_v58  ;;  %v2805_v59 = vadd.f32 %v2804_v51, %v2795_v36  ;;  %v2814_v60 = vadd.f32 %v2813_v11, %v2700_v53 }
 0x16a   : > { %v2051_v61 = vadd.f32 %v2805_v59, %v2477_v34  ;;  %v2815_v62 = vadd.f32 %v2814_v60, %v2796_v41  ;;  %v2701_v63 = vpop.f32.mrb[56].mxu0 }
 0x16b   : > { %v2702_v0 = vpop.f32.mrb[57].mxu0 }
 0x16c   : > { %v2059_v1 = vmax.f32 %v2051_v61, 0.0  ;;  %v2052_v2 = vadd.f32 %v2815_v62, %v2477_v34  ;;  %v2703_v49 = vadd.f32 %v2702_v0, %v2701_v63  ;;  %v2704_v4 = vpop.f32.mrb[58].mxu0 }
 0x16d   : > { %v2705_v6 = vpop.f32.mrb[59].mxu0 }
 0x16e   : > { %2068 = vst.msk [vmem:[%s3551_s29 + $0x10] sm:$0xff] %vm2065_vm1, %v2059_v1  ;;  %v2060_v52 = vmax.f32 %v2052_v2, 0.0  ;;  %v2829_v7 = vadd.f32 %v2828_v20, %v2703_v49  ;;  %v2706_v8 = vadd.f32 %v2705_v6, %v2704_v4 }
 0x170   : > { %2069 = vst.msk [vmem:[%s3551_s29 + $0x18] sm:$0xff] %vm2065_vm1, %v2060_v52  ;;  %v2830_v9 = vadd.f32 %v2829_v7, %v2019_v55  ;;  %v2839_v3 = vadd.f32 %v2838_v24, %v2706_v8 }
 0x172   : > { %v2053_v10 = vadd.f32 %v2830_v9, %v2477_v34  ;;  %v2840_v11 = vadd.f32 %v2839_v3, %v2022_v50  ;;  %v2707_v12 = vpop.f32.mrb[60].mxu0 }
 0x173   : > { %v2708_v17 = vpop.f32.mrb[61].mxu0 }
 0x174   : > { %v2061_v5 = vmax.f32 %v2053_v10, 0.0  ;;  %v2054_v18 = vadd.f32 %v2840_v11, %v2477_v34  ;;  %v2709_v21 = vadd.f32 %v2708_v17, %v2707_v12  ;;  %v2710_v23 = vpop.f32.mrb[62].mxu0 }
 0x175   : > { %v2711_v26 = vpop.f32.mrb[63].mxu0 }
 0x176   : > { %2070 = vst.msk [vmem:[%s3551_s29 + $0x20] sm:$0xff] %vm2065_vm1, %v2061_v5  ;;  %v2062_v20 = vmax.f32 %v2054_v18, 0.0  ;;  %v2824_v27 = vadd.f32 %v3540_v30, %v2709_v21  ;;  %v2712_v28 = vadd.f32 %v2711_v26, %v2710_v23 }
 0x178   : > { %2071 = vst.msk [vmem:[%s3551_s29 + $0x28] sm:$0xff] %vm2065_vm1, %v2062_v20  ;;  %v2825_v24 = vadd.f32 %v2824_v27, %v2799_v48  ;;  %v2834_v22 = vadd.f32 %v3542_v33, %v2712_v28 }
 0x17a   : > { %v2055_v29 = vadd.f32 %v2825_v24, %v2477_v34  ;;  %v2835_v31 = vadd.f32 %v2834_v22, %v2800_v15 }
 0x17c   : > { %v2063_v35 = vmax.f32 %v2055_v29, 0.0  ;;  %v2056_v36 = vadd.f32 %v2835_v31, %v2477_v34 }
 0x17e   : > { %2072 = vst.msk [vmem:[%s3551_s29 + $0x30] sm:$0xff] %vm2065_vm1, %v2063_v35  ;;  %v2064_v37 = vmax.f32 %v2056_v36, 0.0 }
 0x180   : > { %2073 = vst.msk [vmem:[%s3551_s29 + $0x38] sm:$0xff] %vm2065_vm1, %v2064_v37 }
 0x181 PF: > { %s13_s12 = sadd.s32 1, %s3030_s12  }
 0x182   : > { %p10_p4 = scmp.ge.s32.totalorder %s13_s12, 4  }
 0x184   :  { %12 = sbr.rel (!%p10_p4) target bundleno = 1 (0x1), region = 66 }

// kernel: dann_forward_pallas.5
= control target key start
LH: loop header
LB: loop body
LE: loop exit
PB: predicated region body
PF: predicated region fallthrough
CT: control target
= control target key end

     0   :  { %16 = vsyncpa [#allocation3], 0  ;;  %v140_v7 = vlaneseq  ;;  %v1724_v8 = vmov 1966171168   ;;  %s2264_s0 = inlined_call_operand.vmem [shape: bf16[2,800], index: 0, kind: input, shape index: {}]   ;;  %s2265_s1 = inlined_call_operand.vmem [shape: bf16[800,256], index: 1, kind: input, shape index: {}]   ;;  %s2266_s2 = inlined_call_operand.vmem [shape: f32[1,256], index: 2, kind: input, shape index: {}]   ;;  %s2267_s3 = inlined_call_operand.vmem [shape: bf16[128,100], index: 3, kind: input, shape index: {}]   ;;  %s2268_s4 = inlined_call_operand.vmem [shape: f32[1,100], index: 4, kind: input, shape index: {}]   ;;  %s2269_s5 = inlined_call_operand.vmem [shape: bf16[100,10], index: 5, kind: input, shape index: {}]   ;;  %s2270_s6 = inlined_call_operand.vmem [shape: f32[1,10], index: 6, kind: input, shape index: {}]   ;;  %s2271_s7 = inlined_call_operand.vmem [shape: bf16[128,2], index: 7, kind: input, shape index: {}]   ;;  %s2272_s8 = inlined_call_operand.vmem [shape: f32[1,2], index: 8, kind: input, shape index: {}]   ;;  %s2273_s9 = inlined_call_operand.hbm [shape: f32[2,10], index: 9, kind: output, shape index: {0}]   ;;  %s2274_s10 = inlined_call_operand.hbm [shape: f32[2,2], index: 10, kind: output, shape index: {1}]  }
   0x1   :  { %v1494_v0 = vld [vmem:[%s2265_s1 + $0x104] ss:$8 sps:$4 sm:$0xff]   ;;  %v1496_v1 = vld [vmem:[%s2265_s1 + $0x100] ss:$8 sps:$4 sm:$0xff]   ;;  %v1497_v2 = vld [vmem:[%s2265_s1 + $0x114] ss:$8 sps:$4 sm:$0xff]   ;;  %v153_v9 = vunpack.c.l.s4 %v1724_v8 }
   0x2   :  { %750 = vmatprep.subr.bf16.mxu0 %v1494_v0  ;;  %v1499_v3 = vld [vmem:[%s2265_s1 + $0x110] ss:$8 sps:$4 sm:$0xff]   ;;  %v1500_v4 = vld [vmem:[%s2265_s1 + $0x124] ss:$8 sps:$4 sm:$0xff]   ;;  %v1502_v5 = vld [vmem:[%s2265_s1 + $0x120] ss:$8 sps:$4 sm:$0xff]  }
   0x3   :  { %751 = vmatpush1.bf16.msra.mxu0 %v1496_v1  ;;  %v1503_v6 = vld [vmem:[%s2265_s1 + $0x134] ss:$8 sps:$4 sm:$0xff]   ;;  %v1505_v10 = vld [vmem:[%s2265_s1 + $0x130] ss:$8 sps:$4 sm:$0xff]   ;;  %v1506_v11 = vld [vmem:[%s2265_s1 + $0x144] ss:$8 sps:$4 sm:$0xff]   ;;  %v154_v13 = vunpack.c.0.s8 %v153_v9 }
   0x4   :  { %752 = vmatprep.subr.bf16.mxu0 %v1497_v2  ;;  %v1812_v12 = vshrl.u32 %v140_v7, 7  ;;  %v1508_v14 = vld [vmem:[%s2265_s1 + $0x140] ss:$8 sps:$4 sm:$0xff]   ;;  %v1509_v15 = vld [vmem:[%s2265_s1 + $0x154] ss:$8 sps:$4 sm:$0xff]  }
   0x5   :  { %v1511_v17 = vld [vmem:[%s2265_s1 + $0x150] ss:$8 sps:$4 sm:$0xff]   ;;  %v1512_v18 = vld [vmem:[%s2265_s1 + $0x164] ss:$8 sps:$4 sm:$0xff]   ;;  %v1514_v22 = vld [vmem:[%s2265_s1 + $0x160] ss:$8 sps:$4 sm:$0xff]  }
   0x6   :  { %v1821_v16 = vsub.s32 %v154_v13, %v1812_v12  ;;  %v37_v19 = vld [vmem:[%s2264_s0] sm:$0x7f]  ;;  %v1515_v23 = vld [vmem:[%s2265_s1 + $0x174] ss:$8 sps:$4 sm:$0xff]   ;;  %v1517_v27 = vld [vmem:[%s2265_s1 + $0x170] ss:$8 sps:$4 sm:$0xff]  }
   0x7   :  { %753 = vmatpush1.bf16.msra.mxu0 %v1499_v3  ;;  %v151_v20 = vcombine.high %v37_v19, %v37_v19  ;;  %v1549_v26 = vld [vmem:[%s2265_s1 + $0x4] ss:$8 sps:$4 sm:$0xff]   ;;  %v1554_v29 = vld [vmem:[%s2265_s1] ss:$8 sps:$4 sm:$0xff]   ;;  %v1555_v31 = vld [vmem:[%s2265_s1 + $0x14] ss:$8 sps:$4 sm:$0xff]  }
   0x8   :  { %754 = vmatprep.subr.bf16.mxu0 %v1500_v4  ;;  %v1833_v21 = vrot.slane %v37_v19, %v1821_v16  ;;  %709 = vmatprep.subr.bf16.mxu1 %v1549_v26  ;;  %v1518_v32 = vld [vmem:[%s2265_s1 + $0x184] ss:$8 sps:$4 sm:$0xff]   ;;  %v1560_v34 = vld [vmem:[%s2265_s1 + $0x10] ss:$8 sps:$4 sm:$0xff]   ;;  %v1520_v36 = vld [vmem:[%s2265_s1 + $0x180] ss:$8 sps:$4 sm:$0xff]  }
   0x9   :  { %v1844_v25 = vrot.slane %v151_v20, %v1821_v16  ;;  %710 = vmatpush1.bf16.msra.mxu1 %v1554_v29  ;;  %v1561_v35 = vld [vmem:[%s2265_s1 + $0x24] ss:$8 sps:$4 sm:$0xff]   ;;  %v1521_v37 = vld [vmem:[%s2265_s1 + $0x194] ss:$8 sps:$4 sm:$0xff]   ;;  %v1566_v38 = vld [vmem:[%s2265_s1 + $0x20] ss:$8 sps:$4 sm:$0xff]  }
   0xa   :  { %v166_v24 = vcombine.high %v1833_v21, %v1833_v21  ;;  %711 = vmatprep.subr.bf16.mxu1 %v1555_v31  ;;  %v1567_v39 = vld [vmem:[%s2265_s1 + $0x34] ss:$8 sps:$4 sm:$0xff]   ;;  %v1523_v40 = vld [vmem:[%s2265_s1 + $0x190] ss:$8 sps:$4 sm:$0xff]   ;;  %v1524_v41 = vld [vmem:[%s2265_s1 + $0x1a4] ss:$8 sps:$4 sm:$0xff]   ;;  %v1961_v1 = vrot.slane %v1833_v21, %v1821_v16 }
   0xb   :  { %755 = vmatpush1.bf16.msra.mxu0 %v1502_v5  ;;  %v1858_v30 = vrot.slane %v1844_v25, %v1821_v16  ;;  %v1572_v42 = vld [vmem:[%s2265_s1 + $0x30] ss:$8 sps:$4 sm:$0xff]   ;;  %v1573_v43 = vld [vmem:[%s2265_s1 + $0x44] ss:$8 sps:$4 sm:$0xff]   ;;  %v1526_v44 = vld [vmem:[%s2265_s1 + $0x1a0] ss:$8 sps:$4 sm:$0xff]   ;;  %v167_v3 = vcombine.high %v1844_v25, %v1844_v25 }
   0xc   :  { %756 = vmatprep.subr.bf16.mxu0 %v1503_v6  ;;  %v188_v28 = vrot.slane %v166_v24, %v1821_v16  ;;  %v1527_v45 = vld [vmem:[%s2265_s1 + $0x1b4] ss:$8 sps:$4 sm:$0xff]   ;;  %v1578_v46 = vld [vmem:[%s2265_s1 + $0x40] ss:$8 sps:$4 sm:$0xff]   ;;  %v1529_v48 = vld [vmem:[%s2265_s1 + $0x1b0] ss:$8 sps:$4 sm:$0xff]   ;;  %v196_v6 = vcombine.high %v1961_v1, %v1961_v1 }
   0xd   :  { %712 = vmatpush1.bf16.msra.mxu1 %v1560_v34  ;;  %v1579_v47 = vld [vmem:[%s2265_s1 + $0x54] ss:$8 sps:$4 sm:$0xff]   ;;  %v1530_v49 = vld [vmem:[%s2265_s1 + $0x1c4] ss:$8 sps:$4 sm:$0xff]   ;;  %v1584_v50 = vld [vmem:[%s2265_s1 + $0x50] ss:$8 sps:$4 sm:$0xff]   ;;  %v195_v9 = vrot.slane %v167_v3, %v1821_v16 }
   0xe   :  { %v198_v33 = vcombine.high %v188_v28, %v188_v28  ;;  %741 = vmatprep.mubr.bf16.mxu1 %v188_v28  ;;  %713 = vmatprep.subr.bf16.mxu1 %v1561_v35  ;;  %v1585_v51 = vld [vmem:[%s2265_s1 + $0x64] ss:$8 sps:$4 sm:$0xff]   ;;  %v1532_v52 = vld [vmem:[%s2265_s1 + $0x1c0] ss:$8 sps:$4 sm:$0xff]   ;;  %v1533_v53 = vld [vmem:[%s2265_s1 + $0x1d4] ss:$8 sps:$4 sm:$0xff]  }
   0xf   :  { %757 = vmatpush1.bf16.msra.mxu0 %v1505_v10  ;;  %v1590_v54 = vld [vmem:[%s2265_s1 + $0x60] ss:$8 sps:$4 sm:$0xff]   ;;  %v1591_v55 = vld [vmem:[%s2265_s1 + $0x74] ss:$8 sps:$4 sm:$0xff]   ;;  %v1535_v56 = vld [vmem:[%s2265_s1 + $0x1d0] ss:$8 sps:$4 sm:$0xff]  }
  0x10   :  { %758 = vmatprep.subr.bf16.mxu0 %v1506_v11  ;;  %782 = vmatprep.mubr.bf16.mxu0 %v198_v33  ;;  %v1536_v57 = vld [vmem:[%s2265_s1 + $0x1e4] ss:$8 sps:$4 sm:$0xff]   ;;  %v1596_v58 = vld [vmem:[%s2265_s1 + $0x70] ss:$8 sps:$4 sm:$0xff]   ;;  %v1538_v60 = vld [vmem:[%s2265_s1 + $0x1e0] ss:$8 sps:$4 sm:$0xff]  }
  0x11   :  { %714 = vmatpush1.bf16.msra.mxu1 %v1566_v38  ;;  %v1597_v59 = vld [vmem:[%s2265_s1 + $0x84] ss:$8 sps:$4 sm:$0xff]   ;;  %v1539_v61 = vld [vmem:[%s2265_s1 + $0x1f4] ss:$8 sps:$4 sm:$0xff]   ;;  %v1602_v62 = vld [vmem:[%s2265_s1 + $0x80] ss:$8 sps:$4 sm:$0xff]  }
  0x12   :  { %715 = vmatprep.subr.bf16.mxu1 %v1567_v39  ;;  %v1603_v63 = vld [vmem:[%s2265_s1 + $0x94] ss:$8 sps:$4 sm:$0xff]   ;;  %v1541_v0 = vld [vmem:[%s2265_s1 + $0x1f0] ss:$8 sps:$4 sm:$0xff]   ;;  %v1545_v2 = vld [vmem:[%s2265_s1 + $0x204] ss:$8 sps:$4 sm:$0xff]  }
  0x13   :  { %759 = vmatpush1.bf16.msra.mxu0 %v1508_v14  ;;  %v1608_v4 = vld [vmem:[%s2265_s1 + $0x90] ss:$8 sps:$4 sm:$0xff]   ;;  %v1609_v5 = vld [vmem:[%s2265_s1 + $0xa4] ss:$8 sps:$4 sm:$0xff]   ;;  %v1543_v7 = vld [vmem:[%s2265_s1 + $0x200] ss:$8 sps:$4 sm:$0xff]  }
  0x14   :  { %760 = vmatprep.subr.bf16.mxu0 %v1509_v15  ;;  %v1548_v8 = vld [vmem:[%s2265_s1 + $0x214] ss:$8 sps:$4 sm:$0xff]   ;;  %v1614_v10 = vld [vmem:[%s2265_s1 + $0xa0] ss:$8 sps:$4 sm:$0xff]   ;;  %v1546_v13 = vld [vmem:[%s2265_s1 + $0x210] ss:$8 sps:$4 sm:$0xff]  }
  0x15   :  { %716 = vmatpush1.bf16.msra.mxu1 %v1572_v42  ;;  %v1615_v11 = vld [vmem:[%s2265_s1 + $0xb4] ss:$8 sps:$4 sm:$0xff]   ;;  %v1553_v14 = vld [vmem:[%s2265_s1 + $0x224] ss:$8 sps:$4 sm:$0xff]   ;;  %v1620_v15 = vld [vmem:[%s2265_s1 + $0xb0] ss:$8 sps:$4 sm:$0xff]  }
  0x16   :  { %717 = vmatprep.subr.bf16.mxu1 %v1573_v43  ;;  %v1551_v16 = vld [vmem:[%s2265_s1 + $0x220] ss:$8 sps:$4 sm:$0xff]   ;;  %v1627_v20 = vld [vmem:[%s2265_s1 + $0xd4] ss:$8 sps:$4 sm:$0xff]   ;;  %v1557_v21 = vld [vmem:[%s2265_s1 + $0x230] ss:$8 sps:$4 sm:$0xff]  }
  0x17   :  { %761 = vmatpush1.bf16.msra.mxu0 %v1511_v17  ;;  %v1621_v17 = vld [vmem:[%s2265_s1 + $0xc4] ss:$8 sps:$4 sm:$0xff]   ;;  %v1626_v19 = vld [vmem:[%s2265_s1 + $0xc0] ss:$8 sps:$4 sm:$0xff]   ;;  %v1571_v26 = vld [vmem:[%s2265_s1 + $0x254] ss:$8 sps:$4 sm:$0xff]  }
  0x18   :  { %762 = vmatprep.subr.bf16.mxu0 %v1512_v18  ;;  %v1559_v18 = vld [vmem:[%s2265_s1 + $0x234] ss:$8 sps:$4 sm:$0xff]   ;;  %v1633_v24 = vld [vmem:[%s2265_s1 + $0xe4] ss:$8 sps:$4 sm:$0xff]   ;;  %v1563_v25 = vld [vmem:[%s2265_s1 + $0x240] ss:$8 sps:$4 sm:$0xff]  }
  0x19   :  { %718 = vmatpush1.bf16.msra.mxu1 %v1578_v46  ;;  %v1639_v28 = vld [vmem:[%s2265_s1 + $0xf4] ss:$8 sps:$4 sm:$0xff]   ;;  %v1569_v29 = vld [vmem:[%s2265_s1 + $0x250] ss:$8 sps:$4 sm:$0xff]   ;;  %v1577_v31 = vld [vmem:[%s2265_s1 + $0x264] ss:$8 sps:$4 sm:$0xff]  }
  0x1a   :  { %719 = vmatprep.subr.bf16.mxu1 %v1579_v47 }
  0x1b   :  { %763 = vmatpush1.bf16.msra.mxu0 %v1514_v22  ;;  %v1565_v22 = vld [vmem:[%s2265_s1 + $0x244] ss:$8 sps:$4 sm:$0xff]  }
  0x1c   :  { %764 = vmatprep.subr.bf16.mxu0 %v1515_v23  ;;  %v1632_v23 = vld [vmem:[%s2265_s1 + $0xd0] ss:$8 sps:$4 sm:$0xff]  }
  0x1d   :  { %720 = vmatpush1.bf16.msra.mxu1 %v1584_v50 }
  0x1e   :  { %721 = vmatprep.subr.bf16.mxu1 %v1585_v51 }
  0x1f   :  { %765 = vmatpush1.bf16.msra.mxu0 %v1517_v27  ;;  %v1638_v27 = vld [vmem:[%s2265_s1 + $0xe0] ss:$8 sps:$4 sm:$0xff]  }
  0x20   :  { %766 = vmatprep.subr.bf16.mxu0 %v1518_v32  ;;  %v1641_v32 = vld [vmem:[%s2265_s1 + $0xf0] ss:$8 sps:$4 sm:$0xff]  }
  0x21   :  { %722 = vmatpush1.bf16.msra.mxu1 %v1590_v54 }
  0x22   :  { %723 = vmatprep.subr.bf16.mxu1 %v1591_v55 }
  0x23   :  { %767 = vmatpush1.bf16.msra.mxu0 %v1520_v36 }
  0x24   :  { %768 = vmatprep.subr.bf16.mxu0 %v1521_v37 }
  0x25   :  { %724 = vmatpush1.bf16.msra.mxu1 %v1596_v58 }
  0x26   :  { %725 = vmatprep.subr.bf16.mxu1 %v1597_v59 }
  0x27   :  { %769 = vmatpush1.bf16.msra.mxu0 %v1523_v40 }
  0x28   :  { %770 = vmatprep.subr.bf16.mxu0 %v1524_v41 }
  0x29   :  { %726 = vmatpush1.bf16.msra.mxu1 %v1602_v62 }
  0x2a   :  { %727 = vmatprep.subr.bf16.mxu1 %v1603_v63 }
  0x2b   :  { %771 = vmatpush1.bf16.msra.mxu0 %v1526_v44 }
  0x2c   :  { %772 = vmatprep.subr.bf16.mxu0 %v1527_v45 }
  0x2d   :  { %728 = vmatpush1.bf16.msra.mxu1 %v1608_v4 }
  0x2e   :  { %729 = vmatprep.subr.bf16.mxu1 %v1609_v5 }
  0x2f   :  { %773 = vmatpush1.bf16.msra.mxu0 %v1529_v48 }
  0x30   :  { %774 = vmatprep.subr.bf16.mxu0 %v1530_v49 }
  0x31   :  { %730 = vmatpush1.bf16.msra.mxu1 %v1614_v10 }
  0x32   :  { %731 = vmatprep.subr.bf16.mxu1 %v1615_v11 }
  0x33   :  { %775 = vmatpush1.bf16.msra.mxu0 %v1532_v52 }
  0x34   :  { %776 = vmatprep.subr.bf16.mxu0 %v1533_v53 }
  0x35   :  { %732 = vmatpush1.bf16.msra.mxu1 %v1620_v15 }
  0x36   :  { %733 = vmatprep.subr.bf16.mxu1 %v1621_v17 }
  0x37   :  { %777 = vmatpush1.bf16.msra.mxu0 %v1535_v56 }
  0x38   :  { %778 = vmatprep.subr.bf16.mxu0 %v1536_v57 }
  0x39   :  { %734 = vmatpush1.bf16.msra.mxu1 %v1626_v19 }
  0x3a   :  { %735 = vmatprep.subr.bf16.mxu1 %v1627_v20 }
  0x3b   :  { %779 = vmatpush1.bf16.msra.mxu0 %v1538_v60 }
  0x3c   :  { %780 = vmatprep.subr.bf16.mxu0 %v1539_v61 }
  0x3d   :  { %736 = vmatpush1.bf16.msra.mxu1 %v1632_v23 }
  0x3e   :  { %737 = vmatprep.subr.bf16.mxu1 %v1633_v24 }
  0x3f   :  { %781 = vmatpush1.bf16.msra.mxu0 %v1541_v0 }
  0x40   :  { %791 = vmatprep.subr.bf16.mxu0 %v1545_v2 }
  0x41   :  { %738 = vmatpush1.bf16.msra.mxu1 %v1638_v27 }
  0x42   :  { %783 = vmatmul.mubr.bf16.vlgmr.msra.gmra.mrb[0].mxu0 %v196_v6 }
  0x43   :  { %792 = vmatpush1.bf16.msra.mxu0 %v1543_v7  ;;  %823 = vmatprep.mubr.bf16.mxu0 %v195_v9 }
  0x44   :  { %793 = vmatprep.subr.bf16.mxu0 %v1548_v8 }
  0x47   :  { %794 = vmatpush1.bf16.msra.mxu0 %v1546_v13 }
  0x48   :  { %795 = vmatprep.subr.bf16.mxu0 %v1553_v14 }
  0x4b   :  { %796 = vmatpush1.bf16.msra.mxu0 %v1551_v16 }
  0x4c   :  { %797 = vmatprep.subr.bf16.mxu0 %v1559_v18 }
  0x4f   :  { %798 = vmatpush1.bf16.msra.mxu0 %v1557_v21 }
  0x50   :  { %799 = vmatprep.subr.bf16.mxu0 %v1565_v22 }
  0x53   :  { %800 = vmatpush1.bf16.msra.mxu0 %v1563_v25 }
  0x54   :  { %801 = vmatprep.subr.bf16.mxu0 %v1571_v26 }
  0x55   :  { %17 = vsyncpa [#allocation5], 0  ;;  %739 = vmatprep.subr.bf16.mxu1 %v1639_v28  ;;  %v1575_v33 = vld [vmem:[%s2265_s1 + $0x260] ss:$8 sps:$4 sm:$0xff]   ;;  %v1583_v34 = vld [vmem:[%s2265_s1 + $0x274] ss:$8 sps:$4 sm:$0xff]   ;;  %v197_v63 = vcombine.high %v1858_v30, %v1858_v30 }
  0x56   :  { %740 = vmatpush1.bf16.msra.mxu1 %v1641_v32  ;;  %v1645_v35 = vld [vmem:[%s2267_s3] sm:$0xff]   ;;  %v1725_v36 = vmov 0.0   ;;  %v1581_v37 = vld [vmem:[%s2265_s1 + $0x270] ss:$8 sps:$4 sm:$0xff]   ;;  %v1646_v39 = vld [vmem:[%s2267_s3 + $0x8] sm:$0xff]   ;;  %v1726_v62 = vmov 0  }
  0x57   :  { %802 = vmatpush1.bf16.msra.mxu0 %v1569_v29  ;;  %1418 = vmatprep.subr.bf16.mxu1 %v1725_v36  ;;  %v1589_v38 = vld [vmem:[%s2265_s1 + $0x284] ss:$8 sps:$4 sm:$0xff]   ;;  %v1587_v40 = vld [vmem:[%s2265_s1 + $0x280] ss:$8 sps:$4 sm:$0xff]   ;;  %v1595_v41 = vld [vmem:[%s2265_s1 + $0x294] ss:$8 sps:$4 sm:$0xff]  }
  0x58   :  { %803 = vmatprep.subr.bf16.mxu0 %v1577_v31  ;;  %v1647_v42 = vld [vmem:[%s2267_s3 + $0x10] sm:$0xff]   ;;  %v1601_v44 = vld [vmem:[%s2265_s1 + $0x2a4] ss:$8 sps:$4 sm:$0xff]   ;;  %v1648_v45 = vld [vmem:[%s2267_s3 + $0x18] sm:$0xff]   ;;  %vm705_vm0 = vcmask 261120   ;;  %vm1727_vm1 = vmmov 0  }
  0x59   :  { %742 = vmatmul.mubr.bf16.vlgmr.msra.gmra.mrb[0].mxu1 %v1961_v1  ;;  %v1593_v43 = vld [vmem:[%s2265_s1 + $0x290] ss:$8 sps:$4 sm:$0xff]   ;;  %v1599_v46 = vld [vmem:[%s2265_s1 + $0x2a0] ss:$8 sps:$4 sm:$0xff]   ;;  %v1607_v47 = vld [vmem:[%s2265_s1 + $0x2b4] ss:$8 sps:$4 sm:$0xff]  }
  0x5a   :  { %1419 = vmatpush3.bf16.msra.mxu1 %v1645_v35  ;;  %v1649_v48 = vld [vmem:[%s2267_s3 + $0x20] sm:$0xff]   ;;  %v1605_v49 = vld [vmem:[%s2265_s1 + $0x2b0] ss:$8 sps:$4 sm:$0xff]   ;;  %v1619_v52 = vld [vmem:[%s2265_s1 + $0x2d4] ss:$8 sps:$4 sm:$0xff]   ;;  %1434 = vmatprep.mubr.msk.bf16.mxu1 %vm1727_vm1, %v1725_v36  ;;  %v142_v6 = vsub.s32 0, %v1812_v12 }
  0x5b   :  { %804 = vmatpush1.bf16.msra.mxu0 %v1575_v33  ;;  %1420 = vmatprep.subr.bf16.mxu1 %v1725_v36  ;;  %v1613_v50 = vld [vmem:[%s2265_s1 + $0x2c4] ss:$8 sps:$4 sm:$0xff]   ;;  %v1611_v51 = vld [vmem:[%s2265_s1 + $0x2c0] ss:$8 sps:$4 sm:$0xff]   ;;  %v1617_v53 = vld [vmem:[%s2265_s1 + $0x2d0] ss:$8 sps:$4 sm:$0xff]  }
  0x5c   :  { %805 = vmatprep.subr.bf16.mxu0 %v1583_v34  ;;  %v1625_v54 = vld [vmem:[%s2265_s1 + $0x2e4] ss:$8 sps:$4 sm:$0xff]   ;;  %v1623_v55 = vld [vmem:[%s2265_s1 + $0x2e0] ss:$8 sps:$4 sm:$0xff]   ;;  %v1631_v56 = vld [vmem:[%s2265_s1 + $0x2f4] ss:$8 sps:$4 sm:$0xff]  }
  0x5d   :  { %v1629_v57 = vld [vmem:[%s2265_s1 + $0x2f0] ss:$8 sps:$4 sm:$0xff]   ;;  %v1637_v58 = vld [vmem:[%s2265_s1 + $0x304] ss:$8 sps:$4 sm:$0xff]   ;;  %v1635_v59 = vld [vmem:[%s2265_s1 + $0x300] ss:$8 sps:$4 sm:$0xff]  }
  0x5e   :  { %1421 = vmatpush3.bf16.msra.mxu1 %v1646_v39  ;;  %v1644_v60 = vld [vmem:[%s2265_s1 + $0x314] ss:$8 sps:$4 sm:$0xff]   ;;  %v1642_v61 = vld [vmem:[%s2265_s1 + $0x310] ss:$8 sps:$4 sm:$0xff]   ;;  %v1650_v0 = vld [vmem:[%s2267_s3 + $0x28] sm:$0xff]   ;;  %v146_v8 = vsub.s32 1, %v1812_v12 }
  0x5f   :  { %806 = vmatpush1.bf16.msra.mxu0 %v1581_v37  ;;  %1422 = vmatprep.subr.bf16.mxu1 %v1725_v36  ;;  %v1651_v1 = vld [vmem:[%s2267_s3 + $0x30] sm:$0xff]   ;;  %v138_v7 = vld [vmem:[%s2266_s2] sm:$0x3]  ;;  %v1654_v12 = vld [vmem:[%s2269_s5 + $0x8] sm:$0xff]   ;;  %vm1053_vm2 = vcmask 1041408   ;;  %vm1049_vm3 = vcmask 818176  }
  0x60   :  { %807 = vmatprep.subr.bf16.mxu0 %v1589_v38  ;;  %v143_v9 = vrot.slane %v138_v7, %v142_v6  ;;  %v147_v10 = vrot.slane %v138_v7, %v146_v8  ;;  %v1653_v21 = vld [vmem:[%s2269_s5] sm:$0xff]   ;;  %v1655_v23 = vld [vmem:[%s2269_s5 + $0x10] sm:$0xff]   ;;  %v1656_v24 = vld [vmem:[%s2269_s5 + $0x18] sm:$0xff]   ;;  %vm1208_vm4 = vcmask 74752   ;;  %vm1222_vm5 = vcmask 9216  }
  0x61   :  { %v1657_v25 = vld [vmem:[%s2269_s5 + $0x20] sm:$0xff]   ;;  %v1658_v26 = vld [vmem:[%s2269_s5 + $0x28] sm:$0xff]   ;;  %v1659_v27 = vld [vmem:[%s2269_s5 + $0x30] ss:$0 sps:$4 sm:$0x33]  }
  0x62   :  { %1423 = vmatpush3.bf16.msra.mxu1 %v1647_v42  ;;  %v1055_v28 = vsel %vm1053_vm2, %v1659_v27, 0  ;;  %v1365_v29 = vld [vmem:[%s2268_s4] ss:$0 sm:$0xff]  ;;  %v1663_v42 = vld [vmem:[%s2271_s7 + $0x18] sm:$0xff]  }
  0x63   :  { %808 = vmatpush1.bf16.msra.mxu0 %v1587_v40  ;;  %1424 = vmatprep.subr.bf16.mxu1 %v1725_v36  ;;  %v1660_v38 = vld [vmem:[%s2271_s7] sm:$0xff]   ;;  %v1661_v40 = vld [vmem:[%s2271_s7 + $0x8] sm:$0xff]  }
  0x64   :  { %809 = vmatprep.subr.bf16.mxu0 %v1595_v41  ;;  %v1662_v41 = vld [vmem:[%s2271_s7 + $0x10] sm:$0xff]  }
  0x66   :  { %1425 = vmatpush3.bf16.msra.mxu1 %v1648_v45  ;;  %v1666_v45 = vld [vmem:[%s2271_s7 + $0x30] sm:$0xff]  }
  0x67   :  { %810 = vmatpush1.bf16.msra.mxu0 %v1593_v43  ;;  %1426 = vmatprep.subr.bf16.mxu1 %v1725_v36  ;;  %v1664_v43 = vld [vmem:[%s2271_s7 + $0x20] sm:$0xff]  }
  0x68   :  { %811 = vmatprep.subr.bf16.mxu0 %v1601_v44  ;;  %v1665_v44 = vld [vmem:[%s2271_s7 + $0x28] sm:$0xff]  }
  0x6a   :  { %1427 = vmatpush3.bf16.msra.mxu1 %v1649_v48 }
  0x6b   :  { %812 = vmatpush1.bf16.msra.mxu0 %v1599_v46  ;;  %1428 = vmatprep.subr.bf16.mxu1 %v1725_v36  ;;  %v1667_v46 = vld [vmem:[%s2271_s7 + $0x38] sm:$0xff]  }
  0x6c   :  { %813 = vmatprep.subr.bf16.mxu0 %v1607_v47 }
  0x6e   :  { %1429 = vmatpush3.bf16.msra.mxu1 %v1650_v0 }
  0x6f   :  { %814 = vmatpush1.bf16.msra.mxu0 %v1605_v49  ;;  %1430 = vmatprep.subr.bf16.mxu1 %v1725_v36  ;;  %v1374_v49 = vld [vmem:[%s2270_s6] ss:$0 sm:$0xff]  ;;  %s1728_s6 = smov [#allocation2]  }
  0x70   :  { %815 = vmatprep.subr.bf16.mxu0 %v1613_v50 }
  0x72   :  { %1431 = vmatpush3.bf16.msra.mxu1 %v1651_v1 }
  0x73   :  { %816 = vmatpush1.bf16.msra.mxu0 %v1611_v51  ;;  %1432 = vmatprep.subr.bf16.mxu1 %v1725_v36 }
  0x74   :  { %817 = vmatprep.subr.bf16.mxu0 %v1619_v52 }
  0x77   :  { %818 = vmatpush1.bf16.msra.mxu0 %v1617_v53 }
  0x78   :  { %819 = vmatprep.subr.bf16.mxu0 %v1625_v54 }
  0x7b   :  { %820 = vmatpush1.bf16.msra.mxu0 %v1623_v55 }
  0x7c   :  { %821 = vmatprep.subr.bf16.mxu0 %v1631_v56 }
  0x7f   :  { %822 = vmatpush1.bf16.msra.mxu0 %v1629_v57 }
  0x80   :  { %832 = vmatprep.subr.bf16.mxu0 %v1637_v58 }
  0x82   :  { %824 = vmatmul.mubr.bf16.vlgmr.msra.gmra.mrb[0].mxu0 %v1858_v30  ;;  %v1652_v30 = vld [vmem:[%s2267_s3 + $0x38] sm:$0xff]  }
  0x83   :  { %833 = vmatpush1.bf16.msra.mxu0 %v1635_v59  ;;  %864 = vmatprep.mubr.bf16.mxu0 %v1726_v62 }
  0x84   :  { %834 = vmatprep.subr.bf16.mxu0 %v1644_v60  ;;  %1433 = vmatpush3.bf16.msra.mxu1 %v1652_v30 }
  0x85   :  { %1438 = vmatprep.subr.bf16.mxu1 %v1725_v36 }
  0x87   :  { %835 = vmatpush1.bf16.msra.mxu0 %v1642_v61 }
  0x8e   :  { %1364 = vmatmul.mubr.msk.bf16.vlgmr.msra.gmra.mrb[0].mxu0 %vm705_vm0, %v197_v63 }
 0x12c   :  { %v743_v2 = vpop.f32.mrb[0].mxu1 }
 0x12d   :  { %v745_v3 = vpop.f32.mrb[1].mxu1  ;;  %v744_v11 = vadd.f32 %v743_v2, %v143_v9 }
 0x12e   :  { %v747_v4 = vpop.f32.mrb[2].mxu1  ;;  %v746_v13 = vadd.f32 %v745_v3, %v147_v10 }
 0x12f   :  { %v748_v5 = vpop.f32.mrb[3].mxu1 }
 0x161   :  { %v866_v14 = vpop.f32.mrb[0].mxu0 }
 0x162   :  { %v1477_v15 = vadd.f32 %v866_v14, %v744_v11  ;;  %v868_v16 = vpop.f32.mrb[1].mxu0 }
 0x163   :  { %v2159_v17 = vadd.f32 %v868_v16, %v746_v13  ;;  %v870_v18 = vpop.f32.mrb[2].mxu0 }
 0x164   :  { %v873_v19 = vmax.f32 %v1477_v15, 0.0  ;;  %v871_v20 = vpop.f32.mrb[3].mxu0 }
 0x165   :  { %v874_v47 = vmax.f32 %v2159_v17, 0.0 }
 0x166   :  { %v875_v22 = vpack.c.bf16 %v873_v19, %v873_v19 }
 0x167   :  { %v876_v48 = vpack.c.bf16 %v874_v47, %v874_v47 }
 0x168   :  { %1435 = vmatmul.mubr.bf16.vlgmr.msra.gmra.mrb[4].mxu1 %v875_v22 }
 0x169   :  { %1439 = vmatpush3.bf16.msra.mxu1 %v1653_v21  ;;  %1452 = vmatprep.mubr.msk.bf16.mxu1 %vm1727_vm1, %v1725_v36 }
 0x16a   :  { %1440 = vmatprep.subr.bf16.mxu1 %v1725_v36 }
 0x16d   :  { %1441 = vmatpush3.bf16.msra.mxu1 %v1654_v12 }
 0x16e   :  { %1442 = vmatprep.subr.bf16.mxu1 %v1725_v36 }
 0x171   :  { %1443 = vmatpush3.bf16.msra.mxu1 %v1655_v23 }
 0x172   :  { %1444 = vmatprep.subr.bf16.mxu1 %v1725_v36 }
 0x175   :  { %1445 = vmatpush3.bf16.msra.mxu1 %v1656_v24 }
 0x176   :  { %1446 = vmatprep.subr.bf16.mxu1 %v1725_v36 }
 0x179   :  { %1447 = vmatpush3.bf16.msra.mxu1 %v1657_v25 }
 0x17a   :  { %1448 = vmatprep.subr.bf16.mxu1 %v1725_v36 }
 0x17d   :  { %1449 = vmatpush3.bf16.msra.mxu1 %v1658_v26 }
 0x17e   :  { %1450 = vmatprep.subr.bf16.mxu1 %v1725_v36 }
 0x181   :  { %1451 = vmatpush3.bf16.msra.mxu1 %v1055_v28 }
 0x182   :  { %1456 = vmatprep.subr.bf16.mxu1 %v1725_v36 }
 0x23b   :  { %v982_v31 = vpop.f32.mrb[4].mxu1 }
 0x23c   :  { %v983_v32 = vadd.f32 %v1365_v29, %v982_v31  ;;  %v1436_v33 = vpop.f32.mrb[5].mxu1 }
 0x23d   :  { %v985_v34 = vpop.f32.mrb[6].mxu1 }
 0x23e   :  { %v988_v35 = vmax.f32 %v983_v32, 0.0  ;;  %v1437_v37 = vpop.f32.mrb[7].mxu1 }
 0x240   :  { %v989_v39 = vpack.c.bf16 %v988_v35, %v988_v35 }
 0x242   :  { %1453 = vmatmul.mubr.msk.bf16.vlgmr.msra.gmra.mrb[8].mxu1 %vm1049_vm3, %v989_v39 }
 0x243   :  { %1457 = vmatpush3.bf16.msra.mxu1 %v1660_v38  ;;  %1472 = vmatprep.mubr.msk.bf16.mxu1 %vm1727_vm1, %v1725_v36 }
 0x244   :  { %1458 = vmatprep.subr.bf16.mxu1 %v1725_v36 }
 0x247   :  { %1459 = vmatpush3.bf16.msra.mxu1 %v1661_v40 }
 0x248   :  { %1460 = vmatprep.subr.bf16.mxu1 %v1725_v36 }
 0x24b   :  { %1461 = vmatpush3.bf16.msra.mxu1 %v1662_v41 }
 0x24c   :  { %1462 = vmatprep.subr.bf16.mxu1 %v1725_v36 }
 0x24f   :  { %1463 = vmatpush3.bf16.msra.mxu1 %v1663_v42 }
 0x250   :  { %1464 = vmatprep.subr.bf16.mxu1 %v1725_v36 }
 0x253   :  { %1465 = vmatpush3.bf16.msra.mxu1 %v1664_v43 }
 0x254   :  { %1466 = vmatprep.subr.bf16.mxu1 %v1725_v36 }
 0x257   :  { %1467 = vmatpush3.bf16.msra.mxu1 %v1665_v44 }
 0x258   :  { %1468 = vmatprep.subr.bf16.mxu1 %v1725_v36 }
 0x25b   :  { %1469 = vmatpush3.bf16.msra.mxu1 %v1666_v45 }
 0x25c   :  { %1470 = vmatprep.subr.bf16.mxu1 %v1725_v36  ;;  %v1383_v36 = vld [vmem:[%s2272_s8] ss:$0 sm:$0xff]  ;;  %s1242_s8 = sshll.u32 %s1728_s6, 4  ;;  %s1243_s8 = int_to_ptr.vmem [resolvable:$true] %s1242_s8 }
 0x25d   :  { %s1676_s29 = scalar_lea.vmem %s1243_s8, 32  ;;  %p1681_p1 = scmp.lt.s32.totalorder %s1243_s8, %s1243_s8 }
 0x25e   :  { %p1677_p0 = scmp.ne.s32.totalorder %s1243_s8, %s1676_s29  ;;  %p1682_p2 = scmp.lt.s32.totalorder %s1676_s29, %s1676_s29 }
 0x25f   :  { %1471 = vmatpush3.bf16.msra.mxu1 %v1667_v46 }
 0x260   :  { %p1683_p3 = por %p1682_p2, %p1681_p1 }
 0x262   :  { %1473 = vmatmul.mubr.bf16.vlgmr.msra.gmra.mrb[12].mxu1 %v876_v48  ;;  %p1684_p4 = pnand %p1683_p3, %p1677_p0 }
 0x315   :  { %v1091_v50 = vpop.f32.mrb[8].mxu1 }
 0x316   :  { %v1092_v51 = vadd.f32 %v1374_v49, %v1091_v50  ;;  %v1454_v52 = vpop.f32.mrb[9].mxu1 }
 0x317   :  { %v1094_v53 = vpop.f32.mrb[10].mxu1 }
 0x318   :  { %v1455_v54 = vpop.f32.mrb[11].mxu1  ;;  %v1209_v55 = vsel %vm1208_vm4, %v1092_v51, -inf }
 0x319   :  { %1210 = vmax.xlane.f32.xlu0 %v1209_v55 }
 0x335   :  { %v1202_v56 = vpop.f32.mrb[12].mxu1 }
 0x336   :  { %v1203_v57 = vadd.f32 %v1383_v36, %v1202_v56  ;;  %v1474_v58 = vpop.f32.mrb[13].mxu1 }
 0x337   :  { %v1205_v59 = vpop.f32.mrb[14].mxu1 }
 0x338   :  { %v1475_v60 = vpop.f32.mrb[15].mxu1  ;;  %v1223_v61 = vsel %vm1222_vm5, %v1203_v57, -inf }
 0x339   :  { %1224 = vmax.xlane.f32.xlu0 %v1223_v61 }
 0x3a6   :  { %v1211_v62 = vpop.xlane.xlu0 %1210 }
 0x3a7   :  { %v1212_v63 = vsub.f32 %v1092_v51, %v1211_v62 }
 0x3a9   :  { %v1213_v0 = vmul.f32 1.442695, %v1212_v63 }
 0x3ab   :  { %1668 = vpow2.f32 %v1213_v0 }
 0x3b5   :  { %v1669_v1 = vpop.eup %1668 }
 0x3b6   :  { %v1215_v30 = vsel %vm1208_vm4, %v1669_v1, 0.0 }
 0x3b7   :  { %1216 = vadd.xlane.f32.xlu1 %v1215_v30 }
 0x3c6   :  { %v1225_v2 = vpop.xlane.xlu0 %1224 }
 0x3c7   :  { %v1226_v3 = vsub.f32 %v1203_v57, %v1225_v2 }
 0x3c9   :  { %v1227_v4 = vmul.f32 1.442695, %v1226_v3 }
 0x3cb   :  { %1670 = vpow2.f32 %v1227_v4 }
 0x3d5   :  { %v1671_v5 = vpop.eup %1670 }
 0x3d6   :  { %v1229_v6 = vsel %vm1222_vm5, %v1671_v5, 0.0 }
 0x3d7   :  { %1230 = vadd.xlane.f32.xlu1 %v1229_v6 }
 0x444   :  { %v1217_v7 = vpop.xlane.xlu1 %1216 }
 0x445   :  { %1672 = vlog2.f32 %v1217_v7 }
 0x44f   :  { %v1673_v8 = vpop.eup %1672 }
 0x450   :  { %v1219_v9 = vmul.f32 0.6931472, %v1673_v8 }
 0x452   :  { %v1220_v10 = vsub.f32 %v1212_v63, %v1219_v9 }
 0x454   :  { %1221 = vst.msk [vmem:[#allocation2] sm:$0x3] %vm1208_vm4, %v1220_v10 }
 0x455   :  { %1687 = shalt.err (!%p1684_p4)
}
 0x456   :  { %s1688_s12 = scalar_lea.hbm %s2273_s9, 32 }
 0x457   :  { %p1689_p5 = scmp.ne.s32.totalorder %s2273_s9, %s1688_s12  ;;  %p1692_p6 = scmp.lt.u32.totalorder %s1688_s12, %s2273_s9 }
 0x459   :  { %p1694_p7 = pnand %p1692_p6, %p1689_p5 }
 0x45b   :  { %1697 = shalt.err (!%p1694_p7)
}
 0x45c   :  { %1245 = dma.vmem_to_hbm [thread:$0]  %s1243_s8, 32, %s2273_s9, [#allocation3]  }
 0x45d   :  { %s1729_s18 = smov [#allocation4]  }
 0x45e   :  { %s1252_s4 = sshll.u32 %s1729_s18, 4  ;;  %s1253_s4 = int_to_ptr.vmem [resolvable:$true] %s1252_s4 }
 0x45f   :  { %s1698_s19 = scalar_lea.vmem %s1253_s4, 32  ;;  %p1703_p9 = scmp.lt.s32.totalorder %s1253_s4, %s1253_s4 }
 0x460   :  { %p1699_p8 = scmp.ne.s32.totalorder %s1253_s4, %s1698_s19  ;;  %p1704_p10 = scmp.lt.s32.totalorder %s1698_s19, %s1698_s19 }
 0x462   :  { %p1705_p11 = por %p1704_p10, %p1703_p9 }
 0x464   :  { %v1231_v11 = vpop.xlane.xlu1 %1230  ;;  %p1706_p12 = pnand %p1705_p11, %p1699_p8 }
 0x465   :  { %1674 = vlog2.f32 %v1231_v11 }
 0x46f   :  { %v1675_v13 = vpop.eup %1674 }
 0x470   :  { %v1233_v14 = vmul.f32 0.6931472, %v1675_v13 }
 0x472   :  { %v1234_v15 = vsub.f32 %v1226_v3, %v1233_v14 }
 0x474   :  { %1235 = vst.msk [vmem:[#allocation4] sm:$0x3] %vm1222_vm5, %v1234_v15 }
 0x475   :  { %1709 = shalt.err (!%p1706_p12)
}
 0x476   :  { %s1710_s9 = scalar_lea.hbm %s2274_s10, 32 }
 0x477   :  { %p1711_p13 = scmp.ne.s32.totalorder %s2274_s10, %s1710_s9  ;;  %p1714_p0 = scmp.lt.u32.totalorder %s1710_s9, %s2274_s10 }
 0x479   :  { %p1716_p1 = pnand %p1714_p0, %p1711_p13 }
 0x47b   :  { %1719 = shalt.err (!%p1716_p1)
}
 0x47c   :  { %1255 = dma.vmem_to_hbm [thread:$0]  %s1253_s4, 32, %s2274_s10, [#allocation5]  }
 0x47d   :  { %1720 = dma.done.wait [#allocation3], 32  }
 0x47e   :  { %1721 = vsyncadd [#allocation3], 4294967264 }
 0x47f   :  { %1722 = dma.done.wait [#allocation5], 32  }
 0x480   :  { %1723 = vsyncadd [#allocation5], 4294967264 }
 0x481   :  { %1262 = vsyncpa [#allocation3], 1 }
 0x482   :  { %1263 = vsyncpa [#allocation5], 1 }

</bundles_post_ra>
